<compile_context>
chip_gen: v7x
topology: tpu7x:2x2x1
jax: 0.10.0
libtpu: 0.0.40
codegen_flags: <defaults>
</compile_context>

<pallas_src>
import functools
import math

import jax
import jax.numpy as jnp
from jax.experimental import pallas as pl
from jax.experimental.pallas import tpu as pltpu


def _split_channels(num_chan, num_groups):
    split = [num_chan // num_groups for _ in range(num_groups)]
    split[0] += num_chan - sum(split)
    return split


def _get_padding(kernel_size, stride=1, dilation=1):
    return (stride - 1 + dilation * (kernel_size - 1)) // 2


def _round_up(x, m):
    return ((x + m - 1) // m) * m


def _conv_group_kernel(x_ref, w_ref, o_ref, col_ref, *, K, TH, Wo, Cin):
    """One output row-tile of a single-group conv as a packed MXU matmul.

    layout: x_ref   (1, Hp, Wp, Cin)      padded input, resident across H-blocks
            w_ref   (K*K*Cin, Cout_pad)   flattened lane-padded weights (resident)
            o_ref   (1, TH*Wo, Cout_pad)  output row-tile (flat rows, lane-dense)
            col_ref (TH*Wo, K*K*Cin)      VMEM scratch: im2col LHS for this tile
    """
    hb = pl.program_id(1)
    h0 = pl.multiple_of(hb * TH, TH)
    # Build the im2col LHS once per tile: each (kh, kw) tap contributes a
    # (TH*Wo, Cin) column block; the tap index is folded into the contraction.
    for kh in range(K):
        for kw in range(K):
            tap = kh * K + kw
            win = x_ref[0, pl.ds(h0 + kh, TH), pl.ds(kw, Wo), :]
            col_ref[:, tap * Cin:(tap + 1) * Cin] = win.reshape(TH * Wo, Cin)
    # Single MXU matmul with contraction K*K*Cin, f32 accumulation.
    acc = jnp.dot(col_ref[...], w_ref[...], preferred_element_type=jnp.float32)
    o_ref[0] = acc.astype(o_ref.dtype)


def _conv2d_group_pallas(x_nhwc, w_packed, K, pad, cout, *, tile_rows=512):
    """Single-group stride-1 conv: spatial pad (glue) + tiled Pallas conv."""
    N, H, W, Cin = x_nhwc.shape
    KKC, Cout_pad = w_packed.shape
    assert KKC == K * K * Cin
    Ho = H + 2 * pad - (K - 1)
    Wo = W + 2 * pad - (K - 1)

    # Row-tile: ~tile_rows output pixels per grid step, with TH*Wo a multiple
    # of 8 so the output block is sublane-aligned.
    TH = max(1, min(Ho, tile_rows // max(1, Wo)))
    TH *= 8 // math.gcd(TH * Wo, 8)
    Ho_pad = _round_up(Ho, TH)
    n_hb = Ho_pad // TH

    Hp = Ho_pad + (K - 1)
    Wp = Wo + (K - 1)
    xp = jnp.pad(x_nhwc, ((0, 0), (pad, Hp - H - pad), (pad, pad), (0, 0)))

    # VMEM budget: double-buffered input image + weight slab + output tile,
    # plus the im2col scratch.  Sized to fit v7x (64 MiB) as well as v5e/v6e.
    isz = xp.dtype.itemsize
    est = (2 * Hp * Wp * Cin * isz
           + 2 * KKC * Cout_pad * isz
           + 2 * TH * Wo * Cout_pad * isz
           + TH * Wo * KKC * isz
           + (1 << 20))
    vmem_limit = int(min(max(est, 16 << 20), 48 << 20))

    kernel = functools.partial(_conv_group_kernel, K=K, TH=TH, Wo=Wo, Cin=Cin)
    out = pl.pallas_call(
        kernel,
        out_shape=jax.ShapeDtypeStruct((N, Ho_pad * Wo, Cout_pad), xp.dtype),
        grid_spec=pltpu.PrefetchScalarGridSpec(
            num_scalar_prefetch=0,
            grid=(N, n_hb),
            in_specs=[
                # Full padded image per batch element; block index only depends
                # on n, so it stays VMEM-resident across the H-block axis.
                pl.BlockSpec((1, Hp, Wp, Cin), lambda n, hb: (n, 0, 0, 0)),
                # Tiny flattened weight slab, resident for the whole call.
                pl.BlockSpec((KKC, Cout_pad), lambda n, hb: (0, 0)),
            ],
            out_specs=pl.BlockSpec((1, TH * Wo, Cout_pad),
                                   lambda n, hb: (n, hb, 0)),
            scratch_shapes=[pltpu.VMEM((TH * Wo, KKC), xp.dtype)],
        ),
        compiler_params=pltpu.CompilerParams(
            dimension_semantics=("parallel", "arbitrary"),
            vmem_limit_bytes=vmem_limit),
    )(xp, w_packed)

    out = out.reshape(N, Ho_pad, Wo, Cout_pad)
    return out[:, :Ho, :, :cout]


class MixedConv2dPallas:
    """JAX/Pallas port of MixedConv2d (stride=1, padding='', not depthwise/dilated)."""

    def __init__(self, key, in_channels, out_channels, kernel_size=3,
                 stride=1, dilated=False, depthwise=False, dtype=jnp.float32,
                 tile_rows=512):
        assert stride == 1 and not dilated and not depthwise, \
            "this port covers the default stride-1 static-pad, non-depthwise path"
        ks = kernel_size if isinstance(kernel_size, list) else [kernel_size]
        num_groups = len(ks)
        self.kernel_size = ks
        self.in_splits = _split_channels(in_channels, num_groups)
        self.out_splits = _split_channels(out_channels, num_groups)
        self.pads = [_get_padding(k, stride=stride, dilation=1) for k in ks]
        self.tile_rows = tile_rows
        self.weights_oihw = []    # PyTorch (Cout, Cin, K, K) — reference layout
        self.weights_packed = []  # (K*K*Cin, Cout_pad)       — kernel RHS slab
        for k, cin, cout in zip(ks, self.in_splits, self.out_splits):
            key, sub = jax.random.split(key)
            fan_in = cin * k * k
            bound = 1.0 / math.sqrt(fan_in)
            # PyTorch nn.Conv2d weight layout (Cout, Cin, K, K); bias=False
            # (conv2d_pad defaults bias to False).
            w = jax.random.uniform(sub, (cout, cin, k, k), dtype,
                                   minval=-bound, maxval=bound)
            self.weights_oihw.append(w)
            # (Cout,Cin,K,K) -> (K,K,Cin,Cout) -> (K*K*Cin, Cout); row order
            # (kh, kw, ci) matches the in-kernel im2col tap ordering.  Pad Cout
            # to a multiple of 128 so the kernel's output stores are lane-dense.
            w_flat = jnp.transpose(w, (2, 3, 1, 0)).reshape(k * k * cin, cout)
            cout_pad = _round_up(cout, 128)
            self.weights_packed.append(
                jnp.pad(w_flat, ((0, 0), (0, cout_pad - cout))))

    def __call__(self, x_nchw):
        # layout: NCHW in/out (PyTorch convention); kernels compute in NHWC.
        x_nhwc = jnp.transpose(x_nchw, (0, 2, 3, 1))
        outs, start = [], 0
        for k, pad, cin, cout, wp in zip(self.kernel_size, self.pads,
                                         self.in_splits, self.out_splits,
                                         self.weights_packed):
            xg = x_nhwc[..., start:start + cin]      # torch.split along channels
            start += cin
            outs.append(_conv2d_group_pallas(xg, wp, k, pad, cout,
                                             tile_rows=self.tile_rows))
        y = jnp.concatenate(outs, axis=-1)           # torch.cat along channels
        return jnp.transpose(y, (0, 3, 1, 2))


if __name__ == "__main__":
    key = jax.random.PRNGKey(0)
    kx, kw = jax.random.split(key)

    N, Cin, H, W = 2, 8, 16, 16
    Cout = 8
    kernel_sizes = [3, 5]                            # two mixed groups, 4 chans each

    x = jax.random.normal(kx, (N, Cin, H, W), jnp.float32)
    # tile_rows=128 -> two H-blocks per image at this size, exercising the grid
    # + dynamic row-tile path as well as the lane-padded output.
    model = MixedConv2dPallas(kw, Cin, Cout, kernel_size=kernel_sizes,
                              tile_rows=128)

    y = jax.jit(model.__call__)(x)
    y = jax.block_until_ready(y)
    assert y.shape == (N, Cout, H, W), y.shape

    # Pure-JAX reference (same params) to validate the Pallas path.
    outs, start = [], 0
    for w, pad, cin in zip(model.weights_oihw, model.pads, model.in_splits):
        xg = x[:, start:start + cin]
        start += cin
        outs.append(jax.lax.conv_general_dilated(
            xg, w, window_strides=(1, 1),
            padding=[(pad, pad), (pad, pad)],
            dimension_numbers=("NCHW", "OIHW", "NCHW")))
    y_ref = jnp.concatenate(outs, axis=1)

    err = float(jnp.max(jnp.abs(y - y_ref)))
    assert jnp.allclose(y, y_ref, atol=2e-4, rtol=2e-4), err
    print("KERNEL_OK")
</pallas_src>

<mosaic_0001>
module attributes {stable_mosaic.version = 11 : i64} {
  func.func @_conv_group_kernel(%arg0: i32, %arg1: i32, %arg2: memref<1x18x18x4xf32, #tpu.memory_space<vmem>>, %arg3: memref<36x128xf32, #tpu.memory_space<vmem>>, %arg4: memref<1x128x128xf32, #tpu.memory_space<vmem>>, %arg5: memref<128x36xf32, #tpu.memory_space<vmem>>) attributes {dimension_semantics = [#tpu.dimension_semantics<parallel>, #tpu.dimension_semantics<arbitrary>], iteration_bounds = array<i64: 2, 2>, scalar_prefetch = 0 : i64, scratch_operands = 1 : i64, tpu.core_type = #tpu.core_type<tc>, window_params = [{transform_indices = @transform_0, window_bounds = array<i64: 1, 18, 18, 4>}, {pipeline_mode = #tpu.pipeline_mode<synchronous>, transform_indices = @transform_1, window_bounds = array<i64: 36, 128>}, {transform_indices = @transform_2, window_bounds = array<i64: 1, 128, 128>}]} {
    %c8_i32 = arith.constant 8 : i32
    %0 = arith.muli %arg1, %c8_i32 : i32
    %1 = tpu.assume_multiple %0, 8 : i32
    %c0_i32 = arith.constant 0 : i32
    %2 = arith.addi %1, %c0_i32 : i32
    %c0 = arith.constant 0 : index
    %3 = arith.index_cast %2 : i32 to index
    %c0_0 = arith.constant 0 : index
    %c0_1 = arith.constant 0 : index
    %4 = vector.load %arg2[%c0, %3, %c0_0, %c0_1] : memref<1x18x18x4xf32, #tpu.memory_space<vmem>>, vector<1x8x16x4xf32>
    %5 = vector.shape_cast %4 : vector<1x8x16x4xf32> to vector<8x16x4xf32>
    %6 = vector.shape_cast %5 : vector<8x16x4xf32> to vector<128x4xf32>
    %c0_2 = arith.constant 0 : index
    %c0_3 = arith.constant 0 : index
    %7 = vector.load %arg5[%c0_2, %c0_3] : memref<128x36xf32, #tpu.memory_space<vmem>>, vector<128x4xf32>
    tpu.vector_store %arg5[%c0_2, %c0_3], %6 {strides = array<i32>} : memref<128x36xf32, #tpu.memory_space<vmem>>, vector<128x4xf32>,
    %c0_i32_4 = arith.constant 0 : i32
    %8 = arith.addi %1, %c0_i32_4 : i32
    %c0_5 = arith.constant 0 : index
    %9 = arith.index_cast %8 : i32 to index
    %c1 = arith.constant 1 : index
    %c0_6 = arith.constant 0 : index
    %10 = vector.load %arg2[%c0_5, %9, %c1, %c0_6] : memref<1x18x18x4xf32, #tpu.memory_space<vmem>>, vector<1x8x16x4xf32>
    %11 = vector.shape_cast %10 : vector<1x8x16x4xf32> to vector<8x16x4xf32>
    %12 = vector.shape_cast %11 : vector<8x16x4xf32> to vector<128x4xf32>
    %c0_7 = arith.constant 0 : index
    %c4 = arith.constant 4 : index
    %13 = vector.load %arg5[%c0_7, %c4] : memref<128x36xf32, #tpu.memory_space<vmem>>, vector<128x4xf32>
    tpu.vector_store %arg5[%c0_7, %c4], %12 {strides = array<i32>} : memref<128x36xf32, #tpu.memory_space<vmem>>, vector<128x4xf32>,
    %c0_i32_8 = arith.constant 0 : i32
    %14 = arith.addi %1, %c0_i32_8 : i32
    %c0_9 = arith.constant 0 : index
    %15 = arith.index_cast %14 : i32 to index
    %c2 = arith.constant 2 : index
    %c0_10 = arith.constant 0 : index
    %16 = vector.load %arg2[%c0_9, %15, %c2, %c0_10] : memref<1x18x18x4xf32, #tpu.memory_space<vmem>>, vector<1x8x16x4xf32>
    %17 = vector.shape_cast %16 : vector<1x8x16x4xf32> to vector<8x16x4xf32>
    %18 = vector.shape_cast %17 : vector<8x16x4xf32> to vector<128x4xf32>
    %c0_11 = arith.constant 0 : index
    %c8 = arith.constant 8 : index
    %19 = vector.load %arg5[%c0_11, %c8] : memref<128x36xf32, #tpu.memory_space<vmem>>, vector<128x4xf32>
    tpu.vector_store %arg5[%c0_11, %c8], %18 {strides = array<i32>} : memref<128x36xf32, #tpu.memory_space<vmem>>, vector<128x4xf32>,
    %c1_i32 = arith.constant 1 : i32
    %20 = arith.addi %1, %c1_i32 : i32
    %c0_12 = arith.constant 0 : index
    %21 = arith.index_cast %20 : i32 to index
    %c0_13 = arith.constant 0 : index
    %c0_14 = arith.constant 0 : index
    %22 = vector.load %arg2[%c0_12, %21, %c0_13, %c0_14] : memref<1x18x18x4xf32, #tpu.memory_space<vmem>>, vector<1x8x16x4xf32>
    %23 = vector.shape_cast %22 : vector<1x8x16x4xf32> to vector<8x16x4xf32>
    %24 = vector.shape_cast %23 : vector<8x16x4xf32> to vector<128x4xf32>
    %c0_15 = arith.constant 0 : index
    %c12 = arith.constant 12 : index
    %25 = vector.load %arg5[%c0_15, %c12] : memref<128x36xf32, #tpu.memory_space<vmem>>, vector<128x4xf32>
    tpu.vector_store %arg5[%c0_15, %c12], %24 {strides = array<i32>} : memref<128x36xf32, #tpu.memory_space<vmem>>, vector<128x4xf32>,
    %c1_i32_16 = arith.constant 1 : i32
    %26 = arith.addi %1, %c1_i32_16 : i32
    %c0_17 = arith.constant 0 : index
    %27 = arith.index_cast %26 : i32 to index
    %c1_18 = arith.constant 1 : index
    %c0_19 = arith.constant 0 : index
    %28 = vector.load %arg2[%c0_17, %27, %c1_18, %c0_19] : memref<1x18x18x4xf32, #tpu.memory_space<vmem>>, vector<1x8x16x4xf32>
    %29 = vector.shape_cast %28 : vector<1x8x16x4xf32> to vector<8x16x4xf32>
    %30 = vector.shape_cast %29 : vector<8x16x4xf32> to vector<128x4xf32>
    %c0_20 = arith.constant 0 : index
    %c16 = arith.constant 16 : index
    %31 = vector.load %arg5[%c0_20, %c16] : memref<128x36xf32, #tpu.memory_space<vmem>>, vector<128x4xf32>
    tpu.vector_store %arg5[%c0_20, %c16], %30 {strides = array<i32>} : memref<128x36xf32, #tpu.memory_space<vmem>>, vector<128x4xf32>,
    %c1_i32_21 = arith.constant 1 : i32
    %32 = arith.addi %1, %c1_i32_21 : i32
    %c0_22 = arith.constant 0 : index
    %33 = arith.index_cast %32 : i32 to index
    %c2_23 = arith.constant 2 : index
    %c0_24 = arith.constant 0 : index
    %34 = vector.load %arg2[%c0_22, %33, %c2_23, %c0_24] : memref<1x18x18x4xf32, #tpu.memory_space<vmem>>, vector<1x8x16x4xf32>
    %35 = vector.shape_cast %34 : vector<1x8x16x4xf32> to vector<8x16x4xf32>
    %36 = vector.shape_cast %35 : vector<8x16x4xf32> to vector<128x4xf32>
    %c0_25 = arith.constant 0 : index
    %c20 = arith.constant 20 : index
    %37 = vector.load %arg5[%c0_25, %c20] : memref<128x36xf32, #tpu.memory_space<vmem>>, vector<128x4xf32>
    tpu.vector_store %arg5[%c0_25, %c20], %36 {strides = array<i32>} : memref<128x36xf32, #tpu.memory_space<vmem>>, vector<128x4xf32>,
    %c2_i32 = arith.constant 2 : i32
    %38 = arith.addi %1, %c2_i32 : i32
    %c0_26 = arith.constant 0 : index
    %39 = arith.index_cast %38 : i32 to index
    %c0_27 = arith.constant 0 : index
    %c0_28 = arith.constant 0 : index
    %40 = vector.load %arg2[%c0_26, %39, %c0_27, %c0_28] : memref<1x18x18x4xf32, #tpu.memory_space<vmem>>, vector<1x8x16x4xf32>
    %41 = vector.shape_cast %40 : vector<1x8x16x4xf32> to vector<8x16x4xf32>
    %42 = vector.shape_cast %41 : vector<8x16x4xf32> to vector<128x4xf32>
    %c0_29 = arith.constant 0 : index
    %c24 = arith.constant 24 : index
    %43 = vector.load %arg5[%c0_29, %c24] : memref<128x36xf32, #tpu.memory_space<vmem>>, vector<128x4xf32>
    tpu.vector_store %arg5[%c0_29, %c24], %42 {strides = array<i32>} : memref<128x36xf32, #tpu.memory_space<vmem>>, vector<128x4xf32>,
    %c2_i32_30 = arith.constant 2 : i32
    %44 = arith.addi %1, %c2_i32_30 : i32
    %c0_31 = arith.constant 0 : index
    %45 = arith.index_cast %44 : i32 to index
    %c1_32 = arith.constant 1 : index
    %c0_33 = arith.constant 0 : index
    %46 = vector.load %arg2[%c0_31, %45, %c1_32, %c0_33] : memref<1x18x18x4xf32, #tpu.memory_space<vmem>>, vector<1x8x16x4xf32>
    %47 = vector.shape_cast %46 : vector<1x8x16x4xf32> to vector<8x16x4xf32>
    %48 = vector.shape_cast %47 : vector<8x16x4xf32> to vector<128x4xf32>
    %c0_34 = arith.constant 0 : index
    %c28 = arith.constant 28 : index
    %49 = vector.load %arg5[%c0_34, %c28] : memref<128x36xf32, #tpu.memory_space<vmem>>, vector<128x4xf32>
    tpu.vector_store %arg5[%c0_34, %c28], %48 {strides = array<i32>} : memref<128x36xf32, #tpu.memory_space<vmem>>, vector<128x4xf32>,
    %c2_i32_35 = arith.constant 2 : i32
    %50 = arith.addi %1, %c2_i32_35 : i32
    %c0_36 = arith.constant 0 : index
    %51 = arith.index_cast %50 : i32 to index
    %c2_37 = arith.constant 2 : index
    %c0_38 = arith.constant 0 : index
    %52 = vector.load %arg2[%c0_36, %51, %c2_37, %c0_38] : memref<1x18x18x4xf32, #tpu.memory_space<vmem>>, vector<1x8x16x4xf32>
    %53 = vector.shape_cast %52 : vector<1x8x16x4xf32> to vector<8x16x4xf32>
    %54 = vector.shape_cast %53 : vector<8x16x4xf32> to vector<128x4xf32>
    %c0_39 = arith.constant 0 : index
    %c32 = arith.constant 32 : index
    %55 = vector.load %arg5[%c0_39, %c32] : memref<128x36xf32, #tpu.memory_space<vmem>>, vector<128x4xf32>
    tpu.vector_store %arg5[%c0_39, %c32], %54 {strides = array<i32>} : memref<128x36xf32, #tpu.memory_space<vmem>>, vector<128x4xf32>,
    %c0_40 = arith.constant 0 : index
    %c0_41 = arith.constant 0 : index
    %56 = vector.load %arg5[%c0_40, %c0_41] : memref<128x36xf32, #tpu.memory_space<vmem>>, vector<128x36xf32>
    %c0_42 = arith.constant 0 : index
    %c0_43 = arith.constant 0 : index
    %57 = vector.load %arg3[%c0_42, %c0_43] : memref<36x128xf32, #tpu.memory_space<vmem>>, vector<36x128xf32>
    %cst = arith.constant dense<0.000000e+00> : vector<128x128xf32>
    %58 = tpu.matmul %56, %57, %cst {dimension_numbers = #tpu.dot_dimension_numbers<[1], [0], [0], [1], [0, 0, 1, 1], [], []>} : vector<128x36xf32>, vector<36x128xf32>, vector<128x128xf32> -> vector<128x128xf32>
    %c0_44 = arith.constant 0 : index
    %c0_45 = arith.constant 0 : index
    %c0_46 = arith.constant 0 : index
    %59 = vector.load %arg4[%c0_44, %c0_45, %c0_46] : memref<1x128x128xf32, #tpu.memory_space<vmem>>, vector<1x128x128xf32>
    %60 = vector.shape_cast %59 : vector<1x128x128xf32> to vector<128x128xf32>
    %61 = vector.shape_cast %58 : vector<128x128xf32> to vector<1x128x128xf32>
    tpu.vector_store %arg4[%c0_44, %c0_45, %c0_46], %61 {strides = array<i32>} : memref<1x128x128xf32, #tpu.memory_space<vmem>>, vector<1x128x128xf32>,
    return
  }
  func.func @transform_0(%arg0: i32, %arg1: i32) -> (i32, i32, i32, i32) {
    %c0_i32 = arith.constant 0 : i32
    %c0_i32_0 = arith.constant 0 : i32
    %c0_i32_1 = arith.constant 0 : i32
    %c0_i32_2 = arith.constant 0 : i32
    return %arg0, %c0_i32, %c0_i32_0, %c0_i32_1 : i32, i32, i32, i32
  }
  func.func @transform_1(%arg0: i32, %arg1: i32) -> (i32, i32) {
    %c0_i32 = arith.constant 0 : i32
    %c0_i32_0 = arith.constant 0 : i32
    %c0_i32_1 = arith.constant 0 : i32
    return %c0_i32, %c0_i32_0 : i32, i32
  }
  func.func @transform_2(%arg0: i32, %arg1: i32) -> (i32, i32, i32) {
    %c0_i32 = arith.constant 0 : i32
    %c0_i32_0 = arith.constant 0 : i32
    return %arg0, %arg1, %c0_i32 : i32, i32, i32
  }
}

module attributes {stable_mosaic.version = 11 : i64} {
  func.func @_conv_group_kernel(%arg0: i32, %arg1: i32, %arg2: memref<1x20x20x4xf32, #tpu.memory_space<vmem>>, %arg3: memref<100x128xf32, #tpu.memory_space<vmem>>, %arg4: memref<1x128x128xf32, #tpu.memory_space<vmem>>, %arg5: memref<128x100xf32, #tpu.memory_space<vmem>>) attributes {dimension_semantics = [#tpu.dimension_semantics<parallel>, #tpu.dimension_semantics<arbitrary>], iteration_bounds = array<i64: 2, 2>, scalar_prefetch = 0 : i64, scratch_operands = 1 : i64, tpu.core_type = #tpu.core_type<tc>, window_params = [{transform_indices = @transform_0, window_bounds = array<i64: 1, 20, 20, 4>}, {pipeline_mode = #tpu.pipeline_mode<synchronous>, transform_indices = @transform_1, window_bounds = array<i64: 100, 128>}, {transform_indices = @transform_2, window_bounds = array<i64: 1, 128, 128>}]} {
    %c8_i32 = arith.constant 8 : i32
    %0 = arith.muli %arg1, %c8_i32 : i32
    %1 = tpu.assume_multiple %0, 8 : i32
    %c0_i32 = arith.constant 0 : i32
    %2 = arith.addi %1, %c0_i32 : i32
    %c0 = arith.constant 0 : index
    %3 = arith.index_cast %2 : i32 to index
    %c0_0 = arith.constant 0 : index
    %c0_1 = arith.constant 0 : index
    %4 = vector.load %arg2[%c0, %3, %c0_0, %c0_1] : memref<1x20x20x4xf32, #tpu.memory_space<vmem>>, vector<1x8x16x4xf32>
    %5 = vector.shape_cast %4 : vector<1x8x16x4xf32> to vector<8x16x4xf32>
    %6 = vector.shape_cast %5 : vector<8x16x4xf32> to vector<128x4xf32>
    %c0_2 = arith.constant 0 : index
    %c0_3 = arith.constant 0 : index
    %7 = vector.load %arg5[%c0_2, %c0_3] : memref<128x100xf32, #tpu.memory_space<vmem>>, vector<128x4xf32>
    tpu.vector_store %arg5[%c0_2, %c0_3], %6 {strides = array<i32>} : memref<128x100xf32, #tpu.memory_space<vmem>>, vector<128x4xf32>,
    %c0_i32_4 = arith.constant 0 : i32
    %8 = arith.addi %1, %c0_i32_4 : i32
    %c0_5 = arith.constant 0 : index
    %9 = arith.index_cast %8 : i32 to index
    %c1 = arith.constant 1 : index
    %c0_6 = arith.constant 0 : index
    %10 = vector.load %arg2[%c0_5, %9, %c1, %c0_6] : memref<1x20x20x4xf32, #tpu.memory_space<vmem>>, vector<1x8x16x4xf32>
    %11 = vector.shape_cast %10 : vector<1x8x16x4xf32> to vector<8x16x4xf32>
    %12 = vector.shape_cast %11 : vector<8x16x4xf32> to vector<128x4xf32>
    %c0_7 = arith.constant 0 : index
    %c4 = arith.constant 4 : index
    %13 = vector.load %arg5[%c0_7, %c4] : memref<128x100xf32, #tpu.memory_space<vmem>>, vector<128x4xf32>
    tpu.vector_store %arg5[%c0_7, %c4], %12 {strides = array<i32>} : memref<128x100xf32, #tpu.memory_space<vmem>>, vector<128x4xf32>,
    %c0_i32_8 = arith.constant 0 : i32
    %14 = arith.addi %1, %c0_i32_8 : i32
    %c0_9 = arith.constant 0 : index
    %15 = arith.index_cast %14 : i32 to index
    %c2 = arith.constant 2 : index
    %c0_10 = arith.constant 0 : index
    %16 = vector.load %arg2[%c0_9, %15, %c2, %c0_10] : memref<1x20x20x4xf32, #tpu.memory_space<vmem>>, vector<1x8x16x4xf32>
    %17 = vector.shape_cast %16 : vector<1x8x16x4xf32> to vector<8x16x4xf32>
    %18 = vector.shape_cast %17 : vector<8x16x4xf32> to vector<128x4xf32>
    %c0_11 = arith.constant 0 : index
    %c8 = arith.constant 8 : index
    %19 = vector.load %arg5[%c0_11, %c8] : memref<128x100xf32, #tpu.memory_space<vmem>>, vector<128x4xf32>
    tpu.vector_store %arg5[%c0_11, %c8], %18 {strides = array<i32>} : memref<128x100xf32, #tpu.memory_space<vmem>>, vector<128x4xf32>,
    %c0_i32_12 = arith.constant 0 : i32
    %20 = arith.addi %1, %c0_i32_12 : i32
    %c0_13 = arith.constant 0 : index
    %21 = arith.index_cast %20 : i32 to index
    %c3 = arith.constant 3 : index
    %c0_14 = arith.constant 0 : index
    %22 = vector.load %arg2[%c0_13, %21, %c3, %c0_14] : memref<1x20x20x4xf32, #tpu.memory_space<vmem>>, vector<1x8x16x4xf32>
    %23 = vector.shape_cast %22 : vector<1x8x16x4xf32> to vector<8x16x4xf32>
    %24 = vector.shape_cast %23 : vector<8x16x4xf32> to vector<128x4xf32>
    %c0_15 = arith.constant 0 : index
    %c12 = arith.constant 12 : index
    %25 = vector.load %arg5[%c0_15, %c12] : memref<128x100xf32, #tpu.memory_space<vmem>>, vector<128x4xf32>
    tpu.vector_store %arg5[%c0_15, %c12], %24 {strides = array<i32>} : memref<128x100xf32, #tpu.memory_space<vmem>>, vector<128x4xf32>,
    %c0_i32_16 = arith.constant 0 : i32
    %26 = arith.addi %1, %c0_i32_16 : i32
    %c0_17 = arith.constant 0 : index
    %27 = arith.index_cast %26 : i32 to index
    %c4_18 = arith.constant 4 : index
    %c0_19 = arith.constant 0 : index
    %28 = vector.load %arg2[%c0_17, %27, %c4_18, %c0_19] : memref<1x20x20x4xf32, #tpu.memory_space<vmem>>, vector<1x8x16x4xf32>
    %29 = vector.shape_cast %28 : vector<1x8x16x4xf32> to vector<8x16x4xf32>
    %30 = vector.shape_cast %29 : vector<8x16x4xf32> to vector<128x4xf32>
    %c0_20 = arith.constant 0 : index
    %c16 = arith.constant 16 : index
    %31 = vector.load %arg5[%c0_20, %c16] : memref<128x100xf32, #tpu.memory_space<vmem>>, vector<128x4xf32>
    tpu.vector_store %arg5[%c0_20, %c16], %30 {strides = array<i32>} : memref<128x100xf32, #tpu.memory_space<vmem>>, vector<128x4xf32>,
    %c1_i32 = arith.constant 1 : i32
    %32 = arith.addi %1, %c1_i32 : i32
    %c0_21 = arith.constant 0 : index
    %33 = arith.index_cast %32 : i32 to index
    %c0_22 = arith.constant 0 : index
    %c0_23 = arith.constant 0 : index
    %34 = vector.load %arg2[%c0_21, %33, %c0_22, %c0_23] : memref<1x20x20x4xf32, #tpu.memory_space<vmem>>, vector<1x8x16x4xf32>
    %35 = vector.shape_cast %34 : vector<1x8x16x4xf32> to vector<8x16x4xf32>
    %36 = vector.shape_cast %35 : vector<8x16x4xf32> to vector<128x4xf32>
    %c0_24 = arith.constant 0 : index
    %c20 = arith.constant 20 : index
    %37 = vector.load %arg5[%c0_24, %c20] : memref<128x100xf32, #tpu.memory_space<vmem>>, vector<128x4xf32>
    tpu.vector_store %arg5[%c0_24, %c20], %36 {strides = array<i32>} : memref<128x100xf32, #tpu.memory_space<vmem>>, vector<128x4xf32>,
    %c1_i32_25 = arith.constant 1 : i32
    %38 = arith.addi %1, %c1_i32_25 : i32
    %c0_26 = arith.constant 0 : index
    %39 = arith.index_cast %38 : i32 to index
    %c1_27 = arith.constant 1 : index
    %c0_28 = arith.constant 0 : index
    %40 = vector.load %arg2[%c0_26, %39, %c1_27, %c0_28] : memref<1x20x20x4xf32, #tpu.memory_space<vmem>>, vector<1x8x16x4xf32>
    %41 = vector.shape_cast %40 : vector<1x8x16x4xf32> to vector<8x16x4xf32>
    %42 = vector.shape_cast %41 : vector<8x16x4xf32> to vector<128x4xf32>
    %c0_29 = arith.constant 0 : index
    %c24 = arith.constant 24 : index
    %43 = vector.load %arg5[%c0_29, %c24] : memref<128x100xf32, #tpu.memory_space<vmem>>, vector<128x4xf32>
    tpu.vector_store %arg5[%c0_29, %c24], %42 {strides = array<i32>} : memref<128x100xf32, #tpu.memory_space<vmem>>, vector<128x4xf32>,
    %c1_i32_30 = arith.constant 1 : i32
    %44 = arith.addi %1, %c1_i32_30 : i32
    %c0_31 = arith.constant 0 : index
    %45 = arith.index_cast %44 : i32 to index
    %c2_32 = arith.constant 2 : index
    %c0_33 = arith.constant 0 : index
    %46 = vector.load %arg2[%c0_31, %45, %c2_32, %c0_33] : memref<1x20x20x4xf32, #tpu.memory_space<vmem>>, vector<1x8x16x4xf32>
    %47 = vector.shape_cast %46 : vector<1x8x16x4xf32> to vector<8x16x4xf32>
    %48 = vector.shape_cast %47 : vector<8x16x4xf32> to vector<128x4xf32>
    %c0_34 = arith.constant 0 : index
    %c28 = arith.constant 28 : index
    %49 = vector.load %arg5[%c0_34, %c28] : memref<128x100xf32, #tpu.memory_space<vmem>>, vector<128x4xf32>
    tpu.vector_store %arg5[%c0_34, %c28], %48 {strides = array<i32>} : memref<128x100xf32, #tpu.memory_space<vmem>>, vector<128x4xf32>,
    %c1_i32_35 = arith.constant 1 : i32
    %50 = arith.addi %1, %c1_i32_35 : i32
    %c0_36 = arith.constant 0 : index
    %51 = arith.index_cast %50 : i32 to index
    %c3_37 = arith.constant 3 : index
    %c0_38 = arith.constant 0 : index
    %52 = vector.load %arg2[%c0_36, %51, %c3_37, %c0_38] : memref<1x20x20x4xf32, #tpu.memory_space<vmem>>, vector<1x8x16x4xf32>
    %53 = vector.shape_cast %52 : vector<1x8x16x4xf32> to vector<8x16x4xf32>
    %54 = vector.shape_cast %53 : vector<8x16x4xf32> to vector<128x4xf32>
    %c0_39 = arith.constant 0 : index
    %c32 = arith.constant 32 : index
    %55 = vector.load %arg5[%c0_39, %c32] : memref<128x100xf32, #tpu.memory_space<vmem>>, vector<128x4xf32>
    tpu.vector_store %arg5[%c0_39, %c32], %54 {strides = array<i32>} : memref<128x100xf32, #tpu.memory_space<vmem>>, vector<128x4xf32>,
    %c1_i32_40 = arith.constant 1 : i32
    %56 = arith.addi %1, %c1_i32_40 : i32
    %c0_41 = arith.constant 0 : index
    %57 = arith.index_cast %56 : i32 to index
    %c4_42 = arith.constant 4 : index
    %c0_43 = arith.constant 0 : index
    %58 = vector.load %arg2[%c0_41, %57, %c4_42, %c0_43] : memref<1x20x20x4xf32, #tpu.memory_space<vmem>>, vector<1x8x16x4xf32>
    %59 = vector.shape_cast %58 : vector<1x8x16x4xf32> to vector<8x16x4xf32>
    %60 = vector.shape_cast %59 : vector<8x16x4xf32> to vector<128x4xf32>
    %c0_44 = arith.constant 0 : index
    %c36 = arith.constant 36 : index
    %61 = vector.load %arg5[%c0_44, %c36] : memref<128x100xf32, #tpu.memory_space<vmem>>, vector<128x4xf32>
    tpu.vector_store %arg5[%c0_44, %c36], %60 {strides = array<i32>} : memref<128x100xf32, #tpu.memory_space<vmem>>, vector<128x4xf32>,
    %c2_i32 = arith.constant 2 : i32
    %62 = arith.addi %1, %c2_i32 : i32
    %c0_45 = arith.constant 0 : index
    %63 = arith.index_cast %62 : i32 to index
    %c0_46 = arith.constant 0 : index
    %c0_47 = arith.constant 0 : index
    %64 = vector.load %arg2[%c0_45, %63, %c0_46, %c0_47] : memref<1x20x20x4xf32, #tpu.memory_space<vmem>>, vector<1x8x16x4xf32>
    %65 = vector.shape_cast %64 : vector<1x8x16x4xf32> to vector<8x16x4xf32>
    %66 = vector.shape_cast %65 : vector<8x16x4xf32> to vector<128x4xf32>
    %c0_48 = arith.constant 0 : index
    %c40 = arith.constant 40 : index
    %67 = vector.load %arg5[%c0_48, %c40] : memref<128x100xf32, #tpu.memory_space<vmem>>, vector<128x4xf32>
    tpu.vector_store %arg5[%c0_48, %c40], %66 {strides = array<i32>} : memref<128x100xf32, #tpu.memory_space<vmem>>, vector<128x4xf32>,
    %c2_i32_49 = arith.constant 2 : i32
    %68 = arith.addi %1, %c2_i32_49 : i32
    %c0_50 = arith.constant 0 : index
    %69 = arith.index_cast %68 : i32 to index
    %c1_51 = arith.constant 1 : index
    %c0_52 = arith.constant 0 : index
    %70 = vector.load %arg2[%c0_50, %69, %c1_51, %c0_52] : memref<1x20x20x4xf32, #tpu.memory_space<vmem>>, vector<1x8x16x4xf32>
    %71 = vector.shape_cast %70 : vector<1x8x16x4xf32> to vector<8x16x4xf32>
    %72 = vector.shape_cast %71 : vector<8x16x4xf32> to vector<128x4xf32>
    %c0_53 = arith.constant 0 : index
    %c44 = arith.constant 44 : index
    %73 = vector.load %arg5[%c0_53, %c44] : memref<128x100xf32, #tpu.memory_space<vmem>>, vector<128x4xf32>
    tpu.vector_store %arg5[%c0_53, %c44], %72 {strides = array<i32>} : memref<128x100xf32, #tpu.memory_space<vmem>>, vector<128x4xf32>,
    %c2_i32_54 = arith.constant 2 : i32
    %74 = arith.addi %1, %c2_i32_54 : i32
    %c0_55 = arith.constant 0 : index
    %75 = arith.index_cast %74 : i32 to index
    %c2_56 = arith.constant 2 : index
    %c0_57 = arith.constant 0 : index
    %76 = vector.load %arg2[%c0_55, %75, %c2_56, %c0_57] : memref<1x20x20x4xf32, #tpu.memory_space<vmem>>, vector<1x8x16x4xf32>
    %77 = vector.shape_cast %76 : vector<1x8x16x4xf32> to vector<8x16x4xf32>
    %78 = vector.shape_cast %77 : vector<8x16x4xf32> to vector<128x4xf32>
    %c0_58 = arith.constant 0 : index
    %c48 = arith.constant 48 : index
    %79 = vector.load %arg5[%c0_58, %c48] : memref<128x100xf32, #tpu.memory_space<vmem>>, vector<128x4xf32>
    tpu.vector_store %arg5[%c0_58, %c48], %78 {strides = array<i32>} : memref<128x100xf32, #tpu.memory_space<vmem>>, vector<128x4xf32>,
    %c2_i32_59 = arith.constant 2 : i32
    %80 = arith.addi %1, %c2_i32_59 : i32
    %c0_60 = arith.constant 0 : index
    %81 = arith.index_cast %80 : i32 to index
    %c3_61 = arith.constant 3 : index
    %c0_62 = arith.constant 0 : index
    %82 = vector.load %arg2[%c0_60, %81, %c3_61, %c0_62] : memref<1x20x20x4xf32, #tpu.memory_space<vmem>>, vector<1x8x16x4xf32>
    %83 = vector.shape_cast %82 : vector<1x8x16x4xf32> to vector<8x16x4xf32>
    %84 = vector.shape_cast %83 : vector<8x16x4xf32> to vector<128x4xf32>
    %c0_63 = arith.constant 0 : index
    %c52 = arith.constant 52 : index
    %85 = vector.load %arg5[%c0_63, %c52] : memref<128x100xf32, #tpu.memory_space<vmem>>, vector<128x4xf32>
    tpu.vector_store %arg5[%c0_63, %c52], %84 {strides = array<i32>} : memref<128x100xf32, #tpu.memory_space<vmem>>, vector<128x4xf32>,
    %c2_i32_64 = arith.constant 2 : i32
    %86 = arith.addi %1, %c2_i32_64 : i32
    %c0_65 = arith.constant 0 : index
    %87 = arith.index_cast %86 : i32 to index
    %c4_66 = arith.constant 4 : index
    %c0_67 = arith.constant 0 : index
    %88 = vector.load %arg2[%c0_65, %87, %c4_66, %c0_67] : memref<1x20x20x4xf32, #tpu.memory_space<vmem>>, vector<1x8x16x4xf32>
    %89 = vector.shape_cast %88 : vector<1x8x16x4xf32> to vector<8x16x4xf32>
    %90 = vector.shape_cast %89 : vector<8x16x4xf32> to vector<128x4xf32>
    %c0_68 = arith.constant 0 : index
    %c56 = arith.constant 56 : index
    %91 = vector.load %arg5[%c0_68, %c56] : memref<128x100xf32, #tpu.memory_space<vmem>>, vector<128x4xf32>
    tpu.vector_store %arg5[%c0_68, %c56], %90 {strides = array<i32>} : memref<128x100xf32, #tpu.memory_space<vmem>>, vector<128x4xf32>,
    %c3_i32 = arith.constant 3 : i32
    %92 = arith.addi %1, %c3_i32 : i32
    %c0_69 = arith.constant 0 : index
    %93 = arith.index_cast %92 : i32 to index
    %c0_70 = arith.constant 0 : index
    %c0_71 = arith.constant 0 : index
    %94 = vector.load %arg2[%c0_69, %93, %c0_70, %c0_71] : memref<1x20x20x4xf32, #tpu.memory_space<vmem>>, vector<1x8x16x4xf32>
    %95 = vector.shape_cast %94 : vector<1x8x16x4xf32> to vector<8x16x4xf32>
    %96 = vector.shape_cast %95 : vector<8x16x4xf32> to vector<128x4xf32>
    %c0_72 = arith.constant 0 : index
    %c60 = arith.constant 60 : index
    %97 = vector.load %arg5[%c0_72, %c60] : memref<128x100xf32, #tpu.memory_space<vmem>>, vector<128x4xf32>
    tpu.vector_store %arg5[%c0_72, %c60], %96 {strides = array<i32>} : memref<128x100xf32, #tpu.memory_space<vmem>>, vector<128x4xf32>,
    %c3_i32_73 = arith.constant 3 : i32
    %98 = arith.addi %1, %c3_i32_73 : i32
    %c0_74 = arith.constant 0 : index
    %99 = arith.index_cast %98 : i32 to index
    %c1_75 = arith.constant 1 : index
    %c0_76 = arith.constant 0 : index
    %100 = vector.load %arg2[%c0_74, %99, %c1_75, %c0_76] : memref<1x20x20x4xf32, #tpu.memory_space<vmem>>, vector<1x8x16x4xf32>
    %101 = vector.shape_cast %100 : vector<1x8x16x4xf32> to vector<8x16x4xf32>
    %102 = vector.shape_cast %101 : vector<8x16x4xf32> to vector<128x4xf32>
    %c0_77 = arith.constant 0 : index
    %c64 = arith.constant 64 : index
    %103 = vector.load %arg5[%c0_77, %c64] : memref<128x100xf32, #tpu.memory_space<vmem>>, vector<128x4xf32>
    tpu.vector_store %arg5[%c0_77, %c64], %102 {strides = array<i32>} : memref<128x100xf32, #tpu.memory_space<vmem>>, vector<128x4xf32>,
    %c3_i32_78 = arith.constant 3 : i32
    %104 = arith.addi %1, %c3_i32_78 : i32
    %c0_79 = arith.constant 0 : index
    %105 = arith.index_cast %104 : i32 to index
    %c2_80 = arith.constant 2 : index
    %c0_81 = arith.constant 0 : index
    %106 = vector.load %arg2[%c0_79, %105, %c2_80, %c0_81] : memref<1x20x20x4xf32, #tpu.memory_space<vmem>>, vector<1x8x16x4xf32>
    %107 = vector.shape_cast %106 : vector<1x8x16x4xf32> to vector<8x16x4xf32>
    %108 = vector.shape_cast %107 : vector<8x16x4xf32> to vector<128x4xf32>
    %c0_82 = arith.constant 0 : index
    %c68 = arith.constant 68 : index
    %109 = vector.load %arg5[%c0_82, %c68] : memref<128x100xf32, #tpu.memory_space<vmem>>, vector<128x4xf32>
    tpu.vector_store %arg5[%c0_82, %c68], %108 {strides = array<i32>} : memref<128x100xf32, #tpu.memory_space<vmem>>, vector<128x4xf32>,
    %c3_i32_83 = arith.constant 3 : i32
    %110 = arith.addi %1, %c3_i32_83 : i32
    %c0_84 = arith.constant 0 : index
    %111 = arith.index_cast %110 : i32 to index
    %c3_85 = arith.constant 3 : index
    %c0_86 = arith.constant 0 : index
    %112 = vector.load %arg2[%c0_84, %111, %c3_85, %c0_86] : memref<1x20x20x4xf32, #tpu.memory_space<vmem>>, vector<1x8x16x4xf32>
    %113 = vector.shape_cast %112 : vector<1x8x16x4xf32> to vector<8x16x4xf32>
    %114 = vector.shape_cast %113 : vector<8x16x4xf32> to vector<128x4xf32>
    %c0_87 = arith.constant 0 : index
    %c72 = arith.constant 72 : index
    %115 = vector.load %arg5[%c0_87, %c72] : memref<128x100xf32, #tpu.memory_space<vmem>>, vector<128x4xf32>
    tpu.vector_store %arg5[%c0_87, %c72], %114 {strides = array<i32>} : memref<128x100xf32, #tpu.memory_space<vmem>>, vector<128x4xf32>,
    %c3_i32_88 = arith.constant 3 : i32
    %116 = arith.addi %1, %c3_i32_88 : i32
    %c0_89 = arith.constant 0 : index
    %117 = arith.index_cast %116 : i32 to index
    %c4_90 = arith.constant 4 : index
    %c0_91 = arith.constant 0 : index
    %118 = vector.load %arg2[%c0_89, %117, %c4_90, %c0_91] : memref<1x20x20x4xf32, #tpu.memory_space<vmem>>, vector<1x8x16x4xf32>
    %119 = vector.shape_cast %118 : vector<1x8x16x4xf32> to vector<8x16x4xf32>
    %120 = vector.shape_cast %119 : vector<8x16x4xf32> to vector<128x4xf32>
    %c0_92 = arith.constant 0 : index
    %c76 = arith.constant 76 : index
    %121 = vector.load %arg5[%c0_92, %c76] : memref<128x100xf32, #tpu.memory_space<vmem>>, vector<128x4xf32>
    tpu.vector_store %arg5[%c0_92, %c76], %120 {strides = array<i32>} : memref<128x100xf32, #tpu.memory_space<vmem>>, vector<128x4xf32>,
    %c4_i32 = arith.constant 4 : i32
    %122 = arith.addi %1, %c4_i32 : i32
    %c0_93 = arith.constant 0 : index
    %123 = arith.index_cast %122 : i32 to index
    %c0_94 = arith.constant 0 : index
    %c0_95 = arith.constant 0 : index
    %124 = vector.load %arg2[%c0_93, %123, %c0_94, %c0_95] : memref<1x20x20x4xf32, #tpu.memory_space<vmem>>, vector<1x8x16x4xf32>
    %125 = vector.shape_cast %124 : vector<1x8x16x4xf32> to vector<8x16x4xf32>
    %126 = vector.shape_cast %125 : vector<8x16x4xf32> to vector<128x4xf32>
    %c0_96 = arith.constant 0 : index
    %c80 = arith.constant 80 : index
    %127 = vector.load %arg5[%c0_96, %c80] : memref<128x100xf32, #tpu.memory_space<vmem>>, vector<128x4xf32>
    tpu.vector_store %arg5[%c0_96, %c80], %126 {strides = array<i32>} : memref<128x100xf32, #tpu.memory_space<vmem>>, vector<128x4xf32>,
    %c4_i32_97 = arith.constant 4 : i32
    %128 = arith.addi %1, %c4_i32_97 : i32
    %c0_98 = arith.constant 0 : index
    %129 = arith.index_cast %128 : i32 to index
    %c1_99 = arith.constant 1 : index
    %c0_100 = arith.constant 0 : index
    %130 = vector.load %arg2[%c0_98, %129, %c1_99, %c0_100] : memref<1x20x20x4xf32, #tpu.memory_space<vmem>>, vector<1x8x16x4xf32>
    %131 = vector.shape_cast %130 : vector<1x8x16x4xf32> to vector<8x16x4xf32>
    %132 = vector.shape_cast %131 : vector<8x16x4xf32> to vector<128x4xf32>
    %c0_101 = arith.constant 0 : index
    %c84 = arith.constant 84 : index
    %133 = vector.load %arg5[%c0_101, %c84] : memref<128x100xf32, #tpu.memory_space<vmem>>, vector<128x4xf32>
    tpu.vector_store %arg5[%c0_101, %c84], %132 {strides = array<i32>} : memref<128x100xf32, #tpu.memory_space<vmem>>, vector<128x4xf32>,
    %c4_i32_102 = arith.constant 4 : i32
    %134 = arith.addi %1, %c4_i32_102 : i32
    %c0_103 = arith.constant 0 : index
    %135 = arith.index_cast %134 : i32 to index
    %c2_104 = arith.constant 2 : index
    %c0_105 = arith.constant 0 : index
    %136 = vector.load %arg2[%c0_103, %135, %c2_104, %c0_105] : memref<1x20x20x4xf32, #tpu.memory_space<vmem>>, vector<1x8x16x4xf32>
    %137 = vector.shape_cast %136 : vector<1x8x16x4xf32> to vector<8x16x4xf32>
    %138 = vector.shape_cast %137 : vector<8x16x4xf32> to vector<128x4xf32>
    %c0_106 = arith.constant 0 : index
    %c88 = arith.constant 88 : index
    %139 = vector.load %arg5[%c0_106, %c88] : memref<128x100xf32, #tpu.memory_space<vmem>>, vector<128x4xf32>
    tpu.vector_store %arg5[%c0_106, %c88], %138 {strides = array<i32>} : memref<128x100xf32, #tpu.memory_space<vmem>>, vector<128x4xf32>,
    %c4_i32_107 = arith.constant 4 : i32
    %140 = arith.addi %1, %c4_i32_107 : i32
    %c0_108 = arith.constant 0 : index
    %141 = arith.index_cast %140 : i32 to index
    %c3_109 = arith.constant 3 : index
    %c0_110 = arith.constant 0 : index
    %142 = vector.load %arg2[%c0_108, %141, %c3_109, %c0_110] : memref<1x20x20x4xf32, #tpu.memory_space<vmem>>, vector<1x8x16x4xf32>
    %143 = vector.shape_cast %142 : vector<1x8x16x4xf32> to vector<8x16x4xf32>
    %144 = vector.shape_cast %143 : vector<8x16x4xf32> to vector<128x4xf32>
    %c0_111 = arith.constant 0 : index
    %c92 = arith.constant 92 : index
    %145 = vector.load %arg5[%c0_111, %c92] : memref<128x100xf32, #tpu.memory_space<vmem>>, vector<128x4xf32>
    tpu.vector_store %arg5[%c0_111, %c92], %144 {strides = array<i32>} : memref<128x100xf32, #tpu.memory_space<vmem>>, vector<128x4xf32>,
    %c4_i32_112 = arith.constant 4 : i32
    %146 = arith.addi %1, %c4_i32_112 : i32
    %c0_113 = arith.constant 0 : index
    %147 = arith.index_cast %146 : i32 to index
    %c4_114 = arith.constant 4 : index
    %c0_115 = arith.constant 0 : index
    %148 = vector.load %arg2[%c0_113, %147, %c4_114, %c0_115] : memref<1x20x20x4xf32, #tpu.memory_space<vmem>>, vector<1x8x16x4xf32>
    %149 = vector.shape_cast %148 : vector<1x8x16x4xf32> to vector<8x16x4xf32>
    %150 = vector.shape_cast %149 : vector<8x16x4xf32> to vector<128x4xf32>
    %c0_116 = arith.constant 0 : index
    %c96 = arith.constant 96 : index
    %151 = vector.load %arg5[%c0_116, %c96] : memref<128x100xf32, #tpu.memory_space<vmem>>, vector<128x4xf32>
    tpu.vector_store %arg5[%c0_116, %c96], %150 {strides = array<i32>} : memref<128x100xf32, #tpu.memory_space<vmem>>, vector<128x4xf32>,
    %c0_117 = arith.constant 0 : index
    %c0_118 = arith.constant 0 : index
    %152 = vector.load %arg5[%c0_117, %c0_118] : memref<128x100xf32, #tpu.memory_space<vmem>>, vector<128x100xf32>
    %c0_119 = arith.constant 0 : index
    %c0_120 = arith.constant 0 : index
    %153 = vector.load %arg3[%c0_119, %c0_120] : memref<100x128xf32, #tpu.memory_space<vmem>>, vector<100x128xf32>
    %cst = arith.constant dense<0.000000e+00> : vector<128x128xf32>
    %154 = tpu.matmul %152, %153, %cst {dimension_numbers = #tpu.dot_dimension_numbers<[1], [0], [0], [1], [0, 0, 1, 1], [], []>} : vector<128x100xf32>, vector<100x128xf32>, vector<128x128xf32> -> vector<128x128xf32>
    %c0_121 = arith.constant 0 : index
    %c0_122 = arith.constant 0 : index
    %c0_123 = arith.constant 0 : index
    %155 = vector.load %arg4[%c0_121, %c0_122, %c0_123] : memref<1x128x128xf32, #tpu.memory_space<vmem>>, vector<1x128x128xf32>
    %156 = vector.shape_cast %155 : vector<1x128x128xf32> to vector<128x128xf32>
    %157 = vector.shape_cast %154 : vector<128x128xf32> to vector<1x128x128xf32>
    tpu.vector_store %arg4[%c0_121, %c0_122, %c0_123], %157 {strides = array<i32>} : memref<1x128x128xf32, #tpu.memory_space<vmem>>, vector<1x128x128xf32>,
    return
  }
  func.func @transform_0(%arg0: i32, %arg1: i32) -> (i32, i32, i32, i32) {
    %c0_i32 = arith.constant 0 : i32
    %c0_i32_0 = arith.constant 0 : i32
    %c0_i32_1 = arith.constant 0 : i32
    %c0_i32_2 = arith.constant 0 : i32
    return %arg0, %c0_i32, %c0_i32_0, %c0_i32_1 : i32, i32, i32, i32
  }
  func.func @transform_1(%arg0: i32, %arg1: i32) -> (i32, i32) {
    %c0_i32 = arith.constant 0 : i32
    %c0_i32_0 = arith.constant 0 : i32
    %c0_i32_1 = arith.constant 0 : i32
    return %c0_i32, %c0_i32_0 : i32, i32
  }
  func.func @transform_2(%arg0: i32, %arg1: i32) -> (i32, i32, i32) {
    %c0_i32 = arith.constant 0 : i32
    %c0_i32_0 = arith.constant 0 : i32
    return %arg0, %arg1, %c0_i32 : i32, i32, i32
  }
}

</mosaic_0001>

<bundles_post_ra>
// kernel: a_call__.2
= control target key start
LH: loop header
LB: loop body
LE: loop exit
PB: predicated region body
PF: predicated region fallthrough
CT: control target
= control target key end

     0   :  { %s1625_s9 = smov 0   ;;  %s1627_s10 = smov 0   ;;  %s2167_s0 = inlined_call_operand.vmem [shape: f32[2,18,18,4], index: 0, kind: input, shape index: {}]   ;;  %s2168_s1 = inlined_call_operand.vmem [shape: f32[36,128], index: 1, kind: input, shape index: {}]   ;;  %s2169_s2 = inlined_call_operand.vmem [shape: f32[2,256,128], index: 2, kind: output, shape index: {}]  }
   0x1   :  { %s1629_s11 = smov 0   ;;  %s1631_s12 = smov 0  }
   0x2   :  { %s1633_s13 = smov 0  }
   0x3 LB: > { %s21_s14 = sadd.s32 1, %s1592_s11  ;;  %s24_s15 = sadd.s32 1, %s1596_s12  ;;  %s1600_s13 = sphi %s1633_s13, %s12_s13   ;;  %s1596_s12 = sphi %s1631_s12, %s2173_s12   ;;  %s1592_s11 = sphi %s1629_s11, %s2172_s11   ;;  %s1588_s10 = sphi %s1627_s10, %s2171_s10   ;;  %s1584_s9 = sphi %s1625_s9, %s2170_s9  }
   0x4   : > { %p22_p0 = scmp.ge.s32.totalorder %s21_s14, 2  ;;  %p1318_p1 = scmp.ge.s32.totalorder %s1600_s13, 1 }
   0x5   : > { %p126_p2 = scmp.lt.s32.totalorder %s1600_s13, 5 }
   0x6   : > { %s2175_s14 = smov (%p22_p0, %s21_s14), 0  ;;  %s2177_s15 = smov (!%p22_p0, %s24_s15), %s1596_s12 }
   0x7   : > { %p127_p3 = pnand %p1318_p1, %p126_p2  ;;  %p26_p4 = scmp.ge.s32.totalorder %s2177_s15, 2 }
   0x8   : > { %p152_p5 = scmp.lt.s32.totalorder (!%p127_p3), %s1588_s10, 1  ;;  %s1324_s16 = smul.u32 (!%p127_p3), 192, %s1584_s9  ;;  %vm186_vm0 = vcmask (!%p127_p3), 31744   ;;  %v1001_v38 = vld [vmem:[%s2168_s1] sm:$0xff] (!%p127_p3)  ;;  %v1002_v39 = vld [vmem:[%s2168_s1 + $0x8] sm:$0xff] (!%p127_p3)  ;;  %v1003_v41 = vld [vmem:[%s2168_s1 + $0x10] sm:$0xff] (!%p127_p3) }
   0x9   : > { %s2179_s15 = smov (%p26_p4, %s2177_s15), 0  ;;  %130 = sbr.rel (%p127_p3) target bundleno = 612 (0x264), region = 28 }
   0xa   : > { %s1602_s22 = smov (!%p127_p3), 4   ;;  %s1603_s23 = smov (!%p127_p3), 8   ;;  %v1499_v40 = vpack.c.bf16 (!%p127_p3), %v1002_v39, %v1001_v38  ;;  %v1004_v42 = vld [vmem:[%s2168_s1 + $0x18] sm:$0xff] (!%p127_p3)  ;;  %v1005_v44 = vld [vmem:[%s2168_s1 + $0x20] sm:$0xf] (!%p127_p3)  ;;  %vm1055_vm1 = vcmask (!%p127_p3), 1043456  }
   0xb   : > { %s1604_s24 = smov (!%p127_p3), 12   ;;  %s1605_s25 = smov (!%p127_p3), 16   ;;  %v1503_v43 = vpack.c.bf16 (!%p127_p3), %v1004_v42, %v1003_v41  ;;  %vm283_vm2 = vcmask (!%p127_p3), 64544   ;;  %vm380_vm3 = vcmask (!%p127_p3), 97344   ;;  %vm480_vm4 = vcmask (!%p127_p3), 130144  }
   0xc   : > { %s1606_s26 = smov (!%p127_p3), 20   ;;  %s1607_s27 = smov (!%p127_p3), 24   ;;  %1500 = vmatprep.subr.bf16.mxu0 (!%p127_p3), %v1499_v40  ;;  %1507 = vmatprep.subr.bf16.mxu1 (!%p127_p3), %v1499_v40  ;;  %vm577_vm5 = vcmask (!%p127_p3), 162944   ;;  %vm674_vm6 = vcmask (!%p127_p3), 195744   ;;  %vm774_vm7 = vcmask (!%p127_p3), 228544   ;;  %vm871_vm8 = vcmask (!%p127_p3), 261344  }
   0xd   : > { %s1608_s28 = smov (!%p127_p3), 28   ;;  %s1609_s5 = smov (!%p127_p3), 32   ;;  %1502 = vmatpush3.bf16.msra.mxu0 (!%p127_p3), %v1499_v40  ;;  %1510 = vmatpush3.bf16.msra.mxu1 (!%p127_p3), %v1499_v40  ;;  %vm968_vm9 = vcmask (!%p127_p3), 294144   ;;  %vm1006_vm10 = vcmask (!%p127_p3), 293888  }
   0xe   : > { %1504 = vmatprep.subr.bf16.mxu0 (!%p127_p3), %v1503_v43  ;;  %1508 = vmatprep.subr.bf16.mxu1 (!%p127_p3), %v1503_v43  ;;  %s1320_s19 = sshll.u32 (!%p127_p3), %s1584_s9, 4 }
   0xf   : > { %p160_p6 = scmp.lt.s32.totalorder (!%p127_p3), %s1320_s19, 31 }
  0x10   : > { %s2181_s10 = smov (!%p152_p5, %s1588_s10), 1 }
  0x11   : > { %s1513_s17 = smul.u32 432, %s2181_s10  ;;  %1506 = vmatpush3.bf16.msra.mxu0 %v1503_v43  ;;  %1511 = vmatpush3.bf16.msra.mxu1 %v1503_v43  ;;  %s2183_s19 = smov (!%p160_p6, %s1320_s19), 31 }
  0x12   : > { %1473 = vmatprep.subr.msk.mxu0 %vm1055_vm1, %v1005_v44  ;;  %1509 = vmatprep.subr.msk.mxu1 %vm1055_vm1, %v1005_v44 }
  0x13   : > { %s156_s20 = scalar_lea.vmem %s2167_s0, %s1513_s17 }
  0x14   : > { %s1664_s21 = scalar_lea.vmem %s156_s20, %s1324_s16  ;;  %s1321_s20 = sshll.u32 %s2181_s10, 5 }
  0x15   : > { %v204_v0 = vld [vmem:[%s1664_s21 + $0x9] sm:$0xff]  ;;  %v203_v1 = vld [vmem:[%s1664_s21 + $0x1] sm:$0xff]  ;;  %v1677_v4 = vld [vmem:[%s1664_s21 + $0x78] sm:$0xff]  ;;  %1474 = vmatpush3.msk.msra.mxu0 %vm1055_vm1, %v1005_v44  ;;  %1512 = vmatpush3.msk.msra.mxu1 %vm1055_vm1, %v1005_v44 }
  0x16   : > { %237 = vrot.lane.b32.xlu1 %v204_v0, %s1602_s22  ;;  %235 = vrot.lane.b32.xlu0 %v203_v1, %s1602_s22  ;;  %v1671_v2 = vld [vmem:[%s1664_s21 + $0x69] sm:$0xff]  ;;  %v1674_v3 = vld [vmem:[%s1664_s21 + $0x61] sm:$0xff]  ;;  %197 = vst.msk [vmem:[#allocation2 + $0x50] sm:$0xff] %vm186_vm0, %v1677_v4 }
  0x17   : > { %v1327_v5 = vld [vmem:[%s1664_s21 + $0x18] sm:$0xff]  ;;  %v1681_v6 = vld [vmem:[%s1664_s21 + $0x80] sm:$0xff]  ;;  %v1699_v10 = vld [vmem:[%s1664_s21 + $0x90] sm:$0xff] }
  0x18   : > { %v1328_v7 = vld [vmem:[%s1664_s21 + $0x20] sm:$0xff]  ;;  %189 = vst.msk [vmem:[#allocation2 + $0x10] sm:$0xff] %vm186_vm0, %v1327_v5  ;;  %198 = vst.msk [vmem:[#allocation2 + $0x58] sm:$0xff] %vm186_vm0, %v1681_v6  ;;  %v1702_v11 = vld [vmem:[%s1664_s21 + $0x30] sm:$0xff] }
  0x19   : > { %190 = vst.msk [vmem:[#allocation2 + $0x18] sm:$0xff] %vm186_vm0, %v1328_v7  ;;  %v1695_v8 = vld [vmem:[%s1664_s21 + $0x62] sm:$0xff]  ;;  %v1705_v12 = vld [vmem:[%s1664_s21 + $0x98] sm:$0xff]  ;;  %199 = vst.msk [vmem:[#allocation2 + $0x60] sm:$0xff] %vm186_vm0, %v1699_v10 }
  0x1a   : > { %253 = vrot.lane.b32.xlu1 %v1671_v2, %s1602_s22  ;;  %251 = vrot.lane.b32.xlu0 %v1674_v3, %s1602_s22  ;;  %v300_v9 = vld [vmem:[%s1664_s21 + $0x2] sm:$0xff]  ;;  %v1708_v13 = vld [vmem:[%s1664_s21 + $0x38] sm:$0xff]  ;;  %191 = vst.msk [vmem:[#allocation2 + $0x20] sm:$0xff] %vm186_vm0, %v1702_v11  ;;  %200 = vst.msk [vmem:[#allocation2 + $0x68] sm:$0xff] %vm186_vm0, %v1705_v12 }
  0x1b   : > { %192 = vst.msk [vmem:[#allocation2 + $0x28] sm:$0xff] %vm186_vm0, %v1708_v13  ;;  %v1722_v14 = vld [vmem:[%s1664_s21 + $0x6a] sm:$0xff]  ;;  %v170_v17 = vld [vmem:[%s1664_s21] sm:$0xff]  ;;  %v1417_v36 = vld [vmem:[%s1664_s21 + $0x92] sm:$0xff] }
  0x1c   : > { %v301_v15 = vld [vmem:[%s1664_s21 + $0xa] sm:$0xff]  ;;  %187 = vst.msk [vmem:[#allocation2] sm:$0xff] %vm186_vm0, %v170_v17  ;;  %v1742_v21 = vld [vmem:[%s1664_s21 + $0x60] sm:$0xff]  ;;  %v1409_v37 = vld [vmem:[%s1664_s21 + $0x32] sm:$0xff] }
  0x1d   : > { %v171_v16 = vld [vmem:[%s1664_s21 + $0x8] sm:$0xff]  ;;  %195 = vst.msk [vmem:[#allocation2 + $0x40] sm:$0xff] %vm186_vm0, %v1742_v21  ;;  %v1753_v22 = vld [vmem:[%s1664_s21 + $0xb0] sm:$0xff]  ;;  %v1769_v24 = vld [vmem:[%s1664_s21 + $0x79] sm:$0xff] }
  0x1e   : > { %348 = vrot.lane.b32.xlu1 %v1695_v8, %s1603_s23  ;;  %332 = vrot.lane.b32.xlu0 %v300_v9, %s1603_s23  ;;  %188 = vst.msk [vmem:[#allocation2 + $0x8] sm:$0xff] %vm186_vm0, %v171_v16  ;;  %v1729_v18 = vld [vmem:[%s1664_s21 + $0xa8] sm:$0xff]  ;;  %v1756_v23 = vld [vmem:[%s1664_s21 + $0x50] sm:$0xff]  ;;  %202 = vst.msk [vmem:[#allocation2 + $0x78] sm:$0xff] %vm186_vm0, %v1753_v22 }
  0x1f   : > { %v1732_v19 = vld [vmem:[%s1664_s21 + $0x48] sm:$0xff]  ;;  %201 = vst.msk [vmem:[#allocation2 + $0x70] sm:$0xff] %vm186_vm0, %v1729_v18  ;;  %194 = vst.msk [vmem:[#allocation2 + $0x38] sm:$0xff] %vm186_vm0, %v1756_v23  ;;  %v1343_v25 = vld [vmem:[%s1664_s21 + $0x19] sm:$0xff] }
  0x20   : > { %v1739_v20 = vld [vmem:[%s1664_s21 + $0x68] sm:$0xff]  ;;  %193 = vst.msk [vmem:[#allocation2 + $0x30] sm:$0xff] %vm186_vm0, %v1732_v19  ;;  %v1786_v28 = vld [vmem:[%s1664_s21 + $0x7a] sm:$0xff]  ;;  %v1401_v32 = vld [vmem:[%s1664_s21 + $0x91] sm:$0xff] }
  0x21   : > { %196 = vst.msk [vmem:[#allocation2 + $0x48] sm:$0xff] %vm186_vm0, %v1739_v20  ;;  %v1779_v26 = vld [vmem:[%s1664_s21 + $0x81] sm:$0xff]  ;;  %v1393_v33 = vld [vmem:[%s1664_s21 + $0x31] sm:$0xff]  ;;  %v1402_v34 = vld [vmem:[%s1664_s21 + $0x99] sm:$0xff] }
  0x22   : > { %350 = vrot.lane.b32.xlu1 %v1722_v14, %s1603_s23  ;;  %334 = vrot.lane.b32.xlu0 %v301_v15, %s1603_s23  ;;  %v1344_v27 = vld [vmem:[%s1664_s21 + $0x21] sm:$0xff]  ;;  %v1394_v35 = vld [vmem:[%s1664_s21 + $0x39] sm:$0xff] }
  0x23   : > { %v1359_v29 = vld [vmem:[%s1664_s21 + $0x1a] sm:$0xff]  ;;  %v1799_v30 = vld [vmem:[%s1664_s21 + $0x82] sm:$0xff]  ;;  %v1404_v63 = vld [vmem:[%s1664_s21 + $0xb1] sm:$0xff] }
  0x24   : > { %v1360_v31 = vld [vmem:[%s1664_s21 + $0x22] sm:$0xff]  ;;  %v1418_v45 = vld [vmem:[%s1664_s21 + $0x9a] sm:$0xff]  ;;  %v1396_v0 = vld [vmem:[%s1664_s21 + $0x51] sm:$0xff] }
  0x25   : > { %v1410_v46 = vld [vmem:[%s1664_s21 + $0x3a] sm:$0xff]  ;;  %v1403_v55 = vld [vmem:[%s1664_s21 + $0xa9] sm:$0xff] }
  0x26   : > { %448 = vrot.lane.b32.xlu1 %v1677_v4, %s1604_s24  ;;  %432 = vrot.lane.b32.xlu0 %v1327_v5, %s1604_s24  ;;  %v1395_v56 = vld [vmem:[%s1664_s21 + $0x49] sm:$0xff] }
  0x27   : > { %v1411_v9 = vld [vmem:[%s1664_s21 + $0x4a] sm:$0xff] }
  0x28   : > { %v1390_v42 = vld [vmem:[%s1664_s21 + $0xc8] sm:$0xff] }
  0x2a   : > { %450 = vrot.lane.b32.xlu1 %v1681_v6, %s1604_s24  ;;  %434 = vrot.lane.b32.xlu0 %v1328_v7, %s1604_s24  ;;  %v1419_v7 = vld [vmem:[%s1664_s21 + $0xaa] sm:$0xff] }
  0x2e   : > { %545 = vrot.lane.b32.xlu1 %v1769_v24, %s1605_s25  ;;  %529 = vrot.lane.b32.xlu0 %v1343_v25, %s1605_s25 }
  0x32   : > { %255 = vrot.lane.b32.xlu1 %v1769_v24, %s1602_s22  ;;  %239 = vrot.lane.b32.xlu0 %v1343_v25, %s1602_s22 }
  0x36   : > { %547 = vrot.lane.b32.xlu1 %v1779_v26, %s1605_s25  ;;  %531 = vrot.lane.b32.xlu0 %v1344_v27, %s1605_s25 }
  0x3a   : > { %642 = vrot.lane.b32.xlu1 %v1786_v28, %s1606_s26  ;;  %626 = vrot.lane.b32.xlu0 %v1359_v29, %s1606_s26 }
  0x3e   : > { %257 = vrot.lane.b32.xlu1 %v1779_v26, %s1602_s22  ;;  %241 = vrot.lane.b32.xlu0 %v1344_v27, %s1602_s22 }
  0x42   : > { %352 = vrot.lane.b32.xlu1 %v1786_v28, %s1603_s23  ;;  %336 = vrot.lane.b32.xlu0 %v1359_v29, %s1603_s23 }
  0x46   : > { %644 = vrot.lane.b32.xlu1 %v1799_v30, %s1606_s26  ;;  %628 = vrot.lane.b32.xlu0 %v1360_v31, %s1606_s26 }
  0x4a   : > { %742 = vrot.lane.b32.xlu1 %v1699_v10, %s1607_s27  ;;  %726 = vrot.lane.b32.xlu0 %v1702_v11, %s1607_s27 }
  0x4e   : > { %354 = vrot.lane.b32.xlu1 %v1799_v30, %s1603_s23  ;;  %338 = vrot.lane.b32.xlu0 %v1360_v31, %s1603_s23 }
  0x52   : > { %452 = vrot.lane.b32.xlu1 %v1699_v10, %s1604_s24  ;;  %436 = vrot.lane.b32.xlu0 %v1702_v11, %s1604_s24 }
  0x56   : > { %744 = vrot.lane.b32.xlu1 %v1705_v12, %s1607_s27  ;;  %728 = vrot.lane.b32.xlu0 %v1708_v13, %s1607_s27 }
  0x5a   : > { %839 = vrot.lane.b32.xlu1 %v1401_v32, %s1608_s28  ;;  %823 = vrot.lane.b32.xlu0 %v1393_v33, %s1608_s28 }
  0x5e   : > { %454 = vrot.lane.b32.xlu1 %v1705_v12, %s1604_s24  ;;  %438 = vrot.lane.b32.xlu0 %v1708_v13, %s1604_s24 }
  0x62   : > { %549 = vrot.lane.b32.xlu1 %v1401_v32, %s1605_s25  ;;  %533 = vrot.lane.b32.xlu0 %v1393_v33, %s1605_s25 }
  0x66   : > { %841 = vrot.lane.b32.xlu1 %v1402_v34, %s1608_s28  ;;  %825 = vrot.lane.b32.xlu0 %v1394_v35, %s1608_s28 }
  0x6a   : > { %936 = vrot.lane.b32.xlu1 %v1417_v36, %s1609_s5  ;;  %920 = vrot.lane.b32.xlu0 %v1409_v37, %s1609_s5 }
  0x6e   : > { %259 = vrot.lane.b32.xlu1 %v1401_v32, %s1602_s22  ;;  %243 = vrot.lane.b32.xlu0 %v1393_v33, %s1602_s22 }
  0x72   : > { %551 = vrot.lane.b32.xlu1 %v1402_v34, %s1605_s25  ;;  %535 = vrot.lane.b32.xlu0 %v1394_v35, %s1605_s25 }
  0x76   : > { %646 = vrot.lane.b32.xlu1 %v1417_v36, %s1606_s26  ;;  %630 = vrot.lane.b32.xlu0 %v1409_v37, %s1606_s26 }
  0x7a   : > { %938 = vrot.lane.b32.xlu1 %v1418_v45, %s1609_s5  ;;  %922 = vrot.lane.b32.xlu0 %v1410_v46, %s1609_s5 }
  0x7e   : > { %261 = vrot.lane.b32.xlu1 %v1402_v34, %s1602_s22  ;;  %245 = vrot.lane.b32.xlu0 %v1394_v35, %s1602_s22  ;;  %v1389_v35 = vld [vmem:[%s1664_s21 + $0xc0] sm:$0xff] }
  0x82   : > { %356 = vrot.lane.b32.xlu1 %v1417_v36, %s1603_s23  ;;  %340 = vrot.lane.b32.xlu0 %v1409_v37, %s1603_s23 }
  0x86   : > { %648 = vrot.lane.b32.xlu1 %v1418_v45, %s1606_s26  ;;  %632 = vrot.lane.b32.xlu0 %v1410_v46, %s1606_s26 }
  0x88   : > { %v238_v47 = vpop.permute.xlu1 %237  ;;  %v236_v48 = vpop.permute.xlu0 %235 }
  0x89   : > { %285 = vst.msk [vmem:[#allocation2 + $0x8] sm:$0xff] %vm283_vm2, %v238_v47  ;;  %284 = vst.msk [vmem:[#allocation2] sm:$0xff] %vm283_vm2, %v236_v48 }
  0x8a   : > { %746 = vrot.lane.b32.xlu1 %v1729_v18, %s1607_s27  ;;  %730 = vrot.lane.b32.xlu0 %v1732_v19, %s1607_s27 }
  0x8c   : > { %v254_v49 = vpop.permute.xlu1 %253  ;;  %v252_v50 = vpop.permute.xlu0 %251 }
  0x8d   : > { %293 = vst.msk [vmem:[#allocation2 + $0x48] sm:$0xff] %vm283_vm2, %v254_v49  ;;  %292 = vst.msk [vmem:[#allocation2 + $0x40] sm:$0xff] %vm283_vm2, %v252_v50 }
  0x8e   : > { %358 = vrot.lane.b32.xlu1 %v1418_v45, %s1603_s23  ;;  %342 = vrot.lane.b32.xlu0 %v1410_v46, %s1603_s23  ;;  %v1405_v45 = vld [vmem:[%s1664_s21 + $0xc1] sm:$0xff] }
  0x90   : > { %v349_v51 = vpop.permute.xlu1 %348  ;;  %v333_v52 = vpop.permute.xlu0 %332 }
  0x91   : > { %389 = vst.msk [vmem:[#allocation2 + $0x40] sm:$0xff] %vm380_vm3, %v349_v51  ;;  %381 = vst.msk [vmem:[#allocation2] sm:$0xff] %vm380_vm3, %v333_v52  ;;  %v1406_v51 = vld [vmem:[%s1664_s21 + $0xc9] sm:$0xff] }
  0x92   : > { %456 = vrot.lane.b32.xlu1 %v1729_v18, %s1604_s24  ;;  %440 = vrot.lane.b32.xlu0 %v1732_v19, %s1604_s24  ;;  %v1420_v19 = vld [vmem:[%s1664_s21 + $0xb2] sm:$0xff] }
  0x94   : > { %v351_v53 = vpop.permute.xlu1 %350  ;;  %v335_v54 = vpop.permute.xlu0 %334 }
  0x95   : > { %390 = vst.msk [vmem:[#allocation2 + $0x48] sm:$0xff] %vm380_vm3, %v351_v53  ;;  %382 = vst.msk [vmem:[#allocation2 + $0x8] sm:$0xff] %vm380_vm3, %v335_v54 }
  0x96   : > { %748 = vrot.lane.b32.xlu1 %v1753_v22, %s1607_s27  ;;  %732 = vrot.lane.b32.xlu0 %v1756_v23, %s1607_s27 }
  0x98   : > { %v449_v57 = vpop.permute.xlu1 %448  ;;  %v433_v58 = vpop.permute.xlu0 %432 }
  0x99   : > { %489 = vst.msk [vmem:[#allocation2 + $0x40] sm:$0xff] %vm480_vm4, %v449_v57  ;;  %481 = vst.msk [vmem:[#allocation2] sm:$0xff] %vm480_vm4, %v433_v58 }
  0x9a   : > { %843 = vrot.lane.b32.xlu1 %v1403_v55, %s1608_s28  ;;  %827 = vrot.lane.b32.xlu0 %v1395_v56, %s1608_s28 }
  0x9c   : > { %v451_v59 = vpop.permute.xlu1 %450  ;;  %v435_v60 = vpop.permute.xlu0 %434 }
  0x9d   : > { %490 = vst.msk [vmem:[#allocation2 + $0x48] sm:$0xff] %vm480_vm4, %v451_v59  ;;  %482 = vst.msk [vmem:[#allocation2 + $0x8] sm:$0xff] %vm480_vm4, %v435_v60 }
  0x9e   : > { %458 = vrot.lane.b32.xlu1 %v1753_v22, %s1604_s24  ;;  %442 = vrot.lane.b32.xlu0 %v1756_v23, %s1604_s24  ;;  %v1412_v22 = vld [vmem:[%s1664_s21 + $0x52] sm:$0xff] }
  0xa0   : > { %v546_v61 = vpop.permute.xlu1 %545  ;;  %v530_v62 = vpop.permute.xlu0 %529 }
  0xa1   : > { %586 = vst.msk [vmem:[#allocation2 + $0x40] sm:$0xff] %vm577_vm5, %v546_v61  ;;  %578 = vst.msk [vmem:[#allocation2] sm:$0xff] %vm577_vm5, %v530_v62  ;;  %v1422_v61 = vld [vmem:[%s1664_s21 + $0xca] sm:$0xff] }
  0xa2   : > { %553 = vrot.lane.b32.xlu1 %v1403_v55, %s1605_s25  ;;  %537 = vrot.lane.b32.xlu0 %v1395_v56, %s1605_s25 }
  0xa4   : > { %v256_v1 = vpop.permute.xlu1 %255  ;;  %v240_v5 = vpop.permute.xlu0 %239 }
  0xa5   : > { %294 = vst.msk [vmem:[#allocation2 + $0x50] sm:$0xff] %vm283_vm2, %v256_v1  ;;  %286 = vst.msk [vmem:[#allocation2 + $0x10] sm:$0xff] %vm283_vm2, %v240_v5  ;;  %v1391_v5 = vld [vmem:[%s1664_s21 + $0xd8] sm:$0xff] }
  0xa6   : > { %845 = vrot.lane.b32.xlu1 %v1404_v63, %s1608_s28  ;;  %829 = vrot.lane.b32.xlu0 %v1396_v0, %s1608_s28 }
  0xa8   : > { %v548_v10 = vpop.permute.xlu1 %547  ;;  %v532_v11 = vpop.permute.xlu0 %531 }
  0xa9   : > { %587 = vst.msk [vmem:[#allocation2 + $0x48] sm:$0xff] %vm577_vm5, %v548_v10  ;;  %579 = vst.msk [vmem:[#allocation2 + $0x8] sm:$0xff] %vm577_vm5, %v532_v11  ;;  %v1392_v10 = vld [vmem:[%s1664_s21 + $0xe0] sm:$0xff] }
  0xaa   : > { %940 = vrot.lane.b32.xlu1 %v1419_v7, %s1609_s5  ;;  %924 = vrot.lane.b32.xlu0 %v1411_v9, %s1609_s5 }
  0xac   : > { %v643_v12 = vpop.permute.xlu1 %642  ;;  %v627_v13 = vpop.permute.xlu0 %626 }
  0xad   : > { %683 = vst.msk [vmem:[#allocation2 + $0x40] sm:$0xff] %vm674_vm6, %v643_v12  ;;  %675 = vst.msk [vmem:[#allocation2] sm:$0xff] %vm674_vm6, %v627_v13 }
  0xae   : > { %263 = vrot.lane.b32.xlu1 %v1403_v55, %s1602_s22  ;;  %247 = vrot.lane.b32.xlu0 %v1395_v56, %s1602_s22 }
  0xb0   : > { %v258_v15 = vpop.permute.xlu1 %257  ;;  %v242_v16 = vpop.permute.xlu0 %241 }
  0xb1   : > { %295 = vst.msk [vmem:[#allocation2 + $0x58] sm:$0xff] %vm283_vm2, %v258_v15  ;;  %287 = vst.msk [vmem:[#allocation2 + $0x18] sm:$0xff] %vm283_vm2, %v242_v16 }
  0xb2   : > { %555 = vrot.lane.b32.xlu1 %v1404_v63, %s1605_s25  ;;  %539 = vrot.lane.b32.xlu0 %v1396_v0, %s1605_s25 }
  0xb4   : > { %v353_v17 = vpop.permute.xlu1 %352  ;;  %v337_v18 = vpop.permute.xlu0 %336 }
  0xb5   : > { %391 = vst.msk [vmem:[#allocation2 + $0x50] sm:$0xff] %vm380_vm3, %v353_v17  ;;  %383 = vst.msk [vmem:[#allocation2 + $0x10] sm:$0xff] %vm380_vm3, %v337_v18 }
  0xb6   : > { %650 = vrot.lane.b32.xlu1 %v1419_v7, %s1606_s26  ;;  %634 = vrot.lane.b32.xlu0 %v1411_v9, %s1606_s26 }
  0xb8   : > { %v645_v23 = vpop.permute.xlu1 %644  ;;  %v629_v25 = vpop.permute.xlu0 %628 }
  0xb9   : > { %684 = vst.msk [vmem:[#allocation2 + $0x48] sm:$0xff] %vm674_vm6, %v645_v23  ;;  %676 = vst.msk [vmem:[#allocation2 + $0x8] sm:$0xff] %vm674_vm6, %v629_v25 }
  0xba   : > { %942 = vrot.lane.b32.xlu1 %v1420_v19, %s1609_s5  ;;  %926 = vrot.lane.b32.xlu0 %v1412_v22, %s1609_s5 }
  0xbc   : > { %v743_v27 = vpop.permute.xlu1 %742  ;;  %v727_v29 = vpop.permute.xlu0 %726 }
  0xbd   : > { %783 = vst.msk [vmem:[#allocation2 + $0x40] sm:$0xff] %vm774_vm7, %v743_v27  ;;  %775 = vst.msk [vmem:[#allocation2] sm:$0xff] %vm774_vm7, %v727_v29 }
  0xbe   : > { %265 = vrot.lane.b32.xlu1 %v1404_v63, %s1602_s22  ;;  %249 = vrot.lane.b32.xlu0 %v1396_v0, %s1602_s22 }
  0xc0   : > { %v355_v31 = vpop.permute.xlu1 %354  ;;  %v339_v32 = vpop.permute.xlu0 %338 }
  0xc1   : > { %392 = vst.msk [vmem:[#allocation2 + $0x58] sm:$0xff] %vm380_vm3, %v355_v31  ;;  %384 = vst.msk [vmem:[#allocation2 + $0x18] sm:$0xff] %vm380_vm3, %v339_v32 }
  0xc2   : > { %360 = vrot.lane.b32.xlu1 %v1419_v7, %s1603_s23  ;;  %344 = vrot.lane.b32.xlu0 %v1411_v9, %s1603_s23 }
  0xc4   : > { %v453_v33 = vpop.permute.xlu1 %452  ;;  %v437_v34 = vpop.permute.xlu0 %436 }
  0xc5   : > { %491 = vst.msk [vmem:[#allocation2 + $0x50] sm:$0xff] %vm480_vm4, %v453_v33  ;;  %483 = vst.msk [vmem:[#allocation2 + $0x10] sm:$0xff] %vm480_vm4, %v437_v34 }
  0xc6   : > { %652 = vrot.lane.b32.xlu1 %v1420_v19, %s1606_s26  ;;  %636 = vrot.lane.b32.xlu0 %v1412_v22, %s1606_s26 }
  0xc8   : > { %v745_v36 = vpop.permute.xlu1 %744  ;;  %v729_v37 = vpop.permute.xlu0 %728 }
  0xc9   : > { %784 = vst.msk [vmem:[#allocation2 + $0x48] sm:$0xff] %vm774_vm7, %v745_v36  ;;  %776 = vst.msk [vmem:[#allocation2 + $0x8] sm:$0xff] %vm774_vm7, %v729_v37 }
  0xca   : > { %750 = vrot.lane.b32.xlu1 %v1389_v35, %s1607_s27  ;;  %734 = vrot.lane.b32.xlu0 %v1742_v21, %s1607_s27 }
  0xcc   : > { %v840_v38 = vpop.permute.xlu1 %839  ;;  %v824_v39 = vpop.permute.xlu0 %823 }
  0xcd   : > { %880 = vst.msk [vmem:[#allocation2 + $0x40] sm:$0xff] %vm871_vm8, %v840_v38  ;;  %872 = vst.msk [vmem:[#allocation2] sm:$0xff] %vm871_vm8, %v824_v39 }
  0xce   : > { %362 = vrot.lane.b32.xlu1 %v1420_v19, %s1603_s23  ;;  %346 = vrot.lane.b32.xlu0 %v1412_v22, %s1603_s23 }
  0xd0   : > { %v455_v40 = vpop.permute.xlu1 %454  ;;  %v439_v41 = vpop.permute.xlu0 %438 }
  0xd1   : > { %492 = vst.msk [vmem:[#allocation2 + $0x58] sm:$0xff] %vm480_vm4, %v455_v40  ;;  %484 = vst.msk [vmem:[#allocation2 + $0x18] sm:$0xff] %vm480_vm4, %v439_v41 }
  0xd2   : > { %460 = vrot.lane.b32.xlu1 %v1389_v35, %s1604_s24  ;;  %444 = vrot.lane.b32.xlu0 %v1742_v21, %s1604_s24 }
  0xd4   : > { %v550_v43 = vpop.permute.xlu1 %549  ;;  %v534_v44 = vpop.permute.xlu0 %533 }
  0xd5   : > { %588 = vst.msk [vmem:[#allocation2 + $0x50] sm:$0xff] %vm577_vm5, %v550_v43  ;;  %580 = vst.msk [vmem:[#allocation2 + $0x10] sm:$0xff] %vm577_vm5, %v534_v44 }
  0xd6   : > { %752 = vrot.lane.b32.xlu1 %v1390_v42, %s1607_s27  ;;  %736 = vrot.lane.b32.xlu0 %v1739_v20, %s1607_s27 }
  0xd8   : > { %v842_v46 = vpop.permute.xlu1 %841  ;;  %v826_v47 = vpop.permute.xlu0 %825 }
  0xd9   : > { %881 = vst.msk [vmem:[#allocation2 + $0x48] sm:$0xff] %vm871_vm8, %v842_v46  ;;  %873 = vst.msk [vmem:[#allocation2 + $0x8] sm:$0xff] %vm871_vm8, %v826_v47 }
  0xda   : > { %847 = vrot.lane.b32.xlu1 %v1405_v45, %s1608_s28  ;;  %831 = vrot.lane.b32.xlu0 %v1674_v3, %s1608_s28 }
  0xdc   : > { %v937_v21 = vpop.permute.xlu1 %936  ;;  %v921_v48 = vpop.permute.xlu0 %920 }
  0xdd   : > { %977 = vst.msk [vmem:[#allocation2 + $0x40] sm:$0xff] %vm968_vm9, %v937_v21  ;;  %969 = vst.msk [vmem:[#allocation2] sm:$0xff] %vm968_vm9, %v921_v48 }
  0xde   : > { %462 = vrot.lane.b32.xlu1 %v1390_v42, %s1604_s24  ;;  %446 = vrot.lane.b32.xlu0 %v1739_v20, %s1604_s24 }
  0xe0   : > { %v260_v49 = vpop.permute.xlu1 %259  ;;  %v244_v50 = vpop.permute.xlu0 %243 }
  0xe1   : > { %296 = vst.msk [vmem:[#allocation2 + $0x60] sm:$0xff] %vm283_vm2, %v260_v49  ;;  %288 = vst.msk [vmem:[#allocation2 + $0x20] sm:$0xff] %vm283_vm2, %v244_v50 }
  0xe2   : > { %557 = vrot.lane.b32.xlu1 %v1405_v45, %s1605_s25  ;;  %541 = vrot.lane.b32.xlu0 %v1674_v3, %s1605_s25  ;;  %v1421_v3 = vld [vmem:[%s1664_s21 + $0xc2] sm:$0xff] }
  0xe4   : > { %v552_v52 = vpop.permute.xlu1 %551  ;;  %v536_v53 = vpop.permute.xlu0 %535  ;;  %v985_v54 = vld [vmem:[#allocation2] sm:$0xff] }
  0xe5   : > { %v993_v55 = vld [vmem:[#allocation2 + $0x40] sm:$0xff]  ;;  %589 = vst.msk [vmem:[#allocation2 + $0x58] sm:$0xff] %vm577_vm5, %v552_v52  ;;  %581 = vst.msk [vmem:[#allocation2 + $0x18] sm:$0xff] %vm577_vm5, %v536_v53  ;;  %1475 = vmatprep.mubr.msk.f32.mxu0 %vm1006_vm10, %v985_v54 }
  0xe6   : > { %1487 = vmatprep.mubr.msk.f32.mxu1 %vm1006_vm10, %v993_v55  ;;  %849 = vrot.lane.b32.xlu1 %v1406_v51, %s1608_s28 }
  0xe7   : > { %833 = vrot.lane.b32.xlu0 %v1671_v2, %s1608_s28 }
  0xe8   : > { %v647_v20 = vpop.permute.xlu1 %646  ;;  %v631_v56 = vpop.permute.xlu0 %630 }
  0xe9   : > { %685 = vst.msk [vmem:[#allocation2 + $0x50] sm:$0xff] %vm674_vm6, %v647_v20  ;;  %677 = vst.msk [vmem:[#allocation2 + $0x10] sm:$0xff] %vm674_vm6, %v631_v56 }
  0xea   : > { %944 = vrot.lane.b32.xlu1 %v1421_v3, %s1609_s5 }
  0xeb   : > { %928 = vrot.lane.b32.xlu0 %v1695_v8, %s1609_s5 }
  0xec   : > { %v939_v57 = vpop.permute.xlu1 %938  ;;  %v923_v58 = vpop.permute.xlu0 %922 }
  0xed   : > { %978 = vst.msk [vmem:[#allocation2 + $0x48] sm:$0xff] %vm968_vm9, %v939_v57  ;;  %970 = vst.msk [vmem:[#allocation2 + $0x8] sm:$0xff] %vm968_vm9, %v923_v58 }
  0xee   : > { %559 = vrot.lane.b32.xlu1 %v1406_v51, %s1605_s25 }
  0xef   : > { %543 = vrot.lane.b32.xlu0 %v1671_v2, %s1605_s25 }
  0xf0   : > { %v262_v59 = vpop.permute.xlu1 %261  ;;  %v246_v60 = vpop.permute.xlu0 %245 }
  0xf1   : > { %297 = vst.msk [vmem:[#allocation2 + $0x68] sm:$0xff] %vm283_vm2, %v262_v59  ;;  %289 = vst.msk [vmem:[#allocation2 + $0x28] sm:$0xff] %vm283_vm2, %v246_v60 }
  0xf2   : > { %654 = vrot.lane.b32.xlu1 %v1421_v3, %s1606_s26 }
  0xf3   : > { %638 = vrot.lane.b32.xlu0 %v1695_v8, %s1606_s26 }
  0xf4   : > { %v357_v62 = vpop.permute.xlu1 %356  ;;  %v341_v63 = vpop.permute.xlu0 %340  ;;  %v986_v0 = vld [vmem:[#allocation2 + $0x8] sm:$0xff] }
  0xf5   : > { %v994_v1 = vld [vmem:[#allocation2 + $0x48] sm:$0xff]  ;;  %393 = vst.msk [vmem:[#allocation2 + $0x60] sm:$0xff] %vm380_vm3, %v357_v62  ;;  %385 = vst.msk [vmem:[#allocation2 + $0x20] sm:$0xff] %vm380_vm3, %v341_v63  ;;  %1476 = vmatmul.mubr.msk.f32.vlgmr.msra.gmra.mrb[0].mxu0 %vm1006_vm10, %v986_v0 }
  0xf6   : > { %1488 = vmatmul.mubr.msk.f32.vlgmr.msra.gmra.mrb[0].mxu1 %vm1006_vm10, %v994_v1  ;;  %946 = vrot.lane.b32.xlu1 %v1422_v61, %s1609_s5 }
  0xf7   : > { %930 = vrot.lane.b32.xlu0 %v1722_v14, %s1609_s5 }
  0xf8   : > { %v649_v2 = vpop.permute.xlu1 %648  ;;  %v633_v8 = vpop.permute.xlu0 %632 }
  0xf9   : > { %686 = vst.msk [vmem:[#allocation2 + $0x58] sm:$0xff] %vm674_vm6, %v649_v2  ;;  %678 = vst.msk [vmem:[#allocation2 + $0x18] sm:$0xff] %vm674_vm6, %v633_v8 }
  0xfa   : > { %656 = vrot.lane.b32.xlu1 %v1422_v61, %s1606_s26 }
  0xfb   : > { %640 = vrot.lane.b32.xlu0 %v1722_v14, %s1606_s26  ;;  %v1407_v14 = vld [vmem:[%s1664_s21 + $0xd9] sm:$0xff] }
  0xfc   : > { %v747_v7 = vpop.permute.xlu1 %746  ;;  %v731_v9 = vpop.permute.xlu0 %730 }
  0xfd   : > { %785 = vst.msk [vmem:[#allocation2 + $0x50] sm:$0xff] %vm774_vm7, %v747_v7  ;;  %777 = vst.msk [vmem:[#allocation2 + $0x10] sm:$0xff] %vm774_vm7, %v731_v9 }
  0xfe   : > { %754 = vrot.lane.b32.xlu1 %v1391_v5, %s1607_s27 }
  0xff   : > { %738 = vrot.lane.b32.xlu0 %v1677_v4, %s1607_s27  ;;  %v1408_v4 = vld [vmem:[%s1664_s21 + $0xe1] sm:$0xff] }
 0x100   : > { %v359_v11 = vpop.permute.xlu1 %358  ;;  %v343_v12 = vpop.permute.xlu0 %342 }
 0x101   : > { %394 = vst.msk [vmem:[#allocation2 + $0x68] sm:$0xff] %vm380_vm3, %v359_v11  ;;  %386 = vst.msk [vmem:[#allocation2 + $0x28] sm:$0xff] %vm380_vm3, %v343_v12 }
 0x102   : > { %756 = vrot.lane.b32.xlu1 %v1392_v10, %s1607_s27 }
 0x103   : > { %740 = vrot.lane.b32.xlu0 %v1681_v6, %s1607_s27  ;;  %v1423_v6 = vld [vmem:[%s1664_s21 + $0xda] sm:$0xff] }
 0x104   : > { %v457_v13 = vpop.permute.xlu1 %456  ;;  %v441_v15 = vpop.permute.xlu0 %440 }
 0x105   : > { %493 = vst.msk [vmem:[#allocation2 + $0x60] sm:$0xff] %vm480_vm4, %v457_v13  ;;  %485 = vst.msk [vmem:[#allocation2 + $0x20] sm:$0xff] %vm480_vm4, %v441_v15 }
 0x106   : > { %851 = vrot.lane.b32.xlu1 %v1407_v14, %s1608_s28 }
 0x107   : > { %835 = vrot.lane.b32.xlu0 %v1769_v24, %s1608_s28  ;;  %v1424_v24 = vld [vmem:[%s1664_s21 + $0xe2] sm:$0xff]  ;;  %s163_s21 = sadd.s32 %s1321_s20, %s2183_s19 }
 0x108   : > { %v749_v16 = vpop.permute.xlu1 %748  ;;  %v733_v17 = vpop.permute.xlu0 %732  ;;  %s1322_s22 = sshll.u32 %s163_s21, 3 }
 0x109   : > { %786 = vst.msk [vmem:[#allocation2 + $0x58] sm:$0xff] %vm774_vm7, %v749_v16  ;;  %778 = vst.msk [vmem:[#allocation2 + $0x18] sm:$0xff] %vm774_vm7, %v733_v17  ;;  %s2134_s25 = scalar_lea.vmem %s2169_s2, %s1322_s22 }
 0x10a   : > { %853 = vrot.lane.b32.xlu1 %v1408_v4, %s1608_s28 }
 0x10b   : > { %837 = vrot.lane.b32.xlu0 %v1779_v26, %s1608_s28 }
 0x10c   : > { %v844_v18 = vpop.permute.xlu1 %843  ;;  %v828_v19 = vpop.permute.xlu0 %827 }
 0x10d   : > { %882 = vst.msk [vmem:[#allocation2 + $0x50] sm:$0xff] %vm871_vm8, %v844_v18  ;;  %874 = vst.msk [vmem:[#allocation2 + $0x10] sm:$0xff] %vm871_vm8, %v828_v19 }
 0x10e   : > { %948 = vrot.lane.b32.xlu1 %v1423_v6, %s1609_s5 }
 0x10f   : > { %932 = vrot.lane.b32.xlu0 %v1786_v28, %s1609_s5 }
 0x110   : > { %v459_v22 = vpop.permute.xlu1 %458  ;;  %v443_v23 = vpop.permute.xlu0 %442 }
 0x111   : > { %494 = vst.msk [vmem:[#allocation2 + $0x68] sm:$0xff] %vm480_vm4, %v459_v22  ;;  %486 = vst.msk [vmem:[#allocation2 + $0x28] sm:$0xff] %vm480_vm4, %v443_v23 }
 0x112   : > { %950 = vrot.lane.b32.xlu1 %v1424_v24, %s1609_s5 }
 0x113   : > { %934 = vrot.lane.b32.xlu0 %v1799_v30, %s1609_s5 }
 0x114   : > { %v554_v26 = vpop.permute.xlu1 %553  ;;  %v538_v25 = vpop.permute.xlu0 %537 }
 0x115   : > { %590 = vst.msk [vmem:[#allocation2 + $0x60] sm:$0xff] %vm577_vm5, %v554_v26  ;;  %582 = vst.msk [vmem:[#allocation2 + $0x20] sm:$0xff] %vm577_vm5, %v538_v25 }
 0x118   : > { %v846_v27 = vpop.permute.xlu1 %845  ;;  %v830_v28 = vpop.permute.xlu0 %829 }
 0x119   : > { %883 = vst.msk [vmem:[#allocation2 + $0x58] sm:$0xff] %vm871_vm8, %v846_v27  ;;  %875 = vst.msk [vmem:[#allocation2 + $0x18] sm:$0xff] %vm871_vm8, %v830_v28 }
 0x11c   : > { %v941_v29 = vpop.permute.xlu1 %940  ;;  %v925_v31 = vpop.permute.xlu0 %924 }
 0x11d   : > { %979 = vst.msk [vmem:[#allocation2 + $0x50] sm:$0xff] %vm968_vm9, %v941_v29  ;;  %971 = vst.msk [vmem:[#allocation2 + $0x10] sm:$0xff] %vm968_vm9, %v925_v31 }
 0x120   : > { %v264_v32 = vpop.permute.xlu1 %263  ;;  %v248_v30 = vpop.permute.xlu0 %247 }
 0x121   : > { %298 = vst.msk [vmem:[#allocation2 + $0x70] sm:$0xff] %vm283_vm2, %v264_v32  ;;  %290 = vst.msk [vmem:[#allocation2 + $0x30] sm:$0xff] %vm283_vm2, %v248_v30 }
 0x124   : > { %v556_v33 = vpop.permute.xlu1 %555  ;;  %v540_v34 = vpop.permute.xlu0 %539  ;;  %v987_v35 = vld [vmem:[#allocation2 + $0x10] sm:$0xff] }
 0x125   : > { %v995_v36 = vld [vmem:[#allocation2 + $0x50] sm:$0xff]  ;;  %591 = vst.msk [vmem:[#allocation2 + $0x68] sm:$0xff] %vm577_vm5, %v556_v33  ;;  %583 = vst.msk [vmem:[#allocation2 + $0x28] sm:$0xff] %vm577_vm5, %v540_v34  ;;  %1478 = vmatprep.mubr.msk.f32.mxu0 %vm1006_vm10, %v987_v35 }
 0x126   : > { %1490 = vmatprep.mubr.msk.f32.mxu1 %vm1006_vm10, %v995_v36 }
 0x128   : > { %v651_v37 = vpop.permute.xlu1 %650  ;;  %v635_v38 = vpop.permute.xlu0 %634 }
 0x129   : > { %687 = vst.msk [vmem:[#allocation2 + $0x60] sm:$0xff] %vm674_vm6, %v651_v37  ;;  %679 = vst.msk [vmem:[#allocation2 + $0x20] sm:$0xff] %vm674_vm6, %v635_v38 }
 0x12c   : > { %v943_v39 = vpop.permute.xlu1 %942  ;;  %v927_v40 = vpop.permute.xlu0 %926 }
 0x12d   : > { %980 = vst.msk [vmem:[#allocation2 + $0x58] sm:$0xff] %vm968_vm9, %v943_v39  ;;  %972 = vst.msk [vmem:[#allocation2 + $0x18] sm:$0xff] %vm968_vm9, %v927_v40 }
 0x130   : > { %v266_v41 = vpop.permute.xlu1 %265  ;;  %v250_v42 = vpop.permute.xlu0 %249 }
 0x131   : > { %299 = vst.msk [vmem:[#allocation2 + $0x78] sm:$0xff] %vm283_vm2, %v266_v41  ;;  %291 = vst.msk [vmem:[#allocation2 + $0x38] sm:$0xff] %vm283_vm2, %v250_v42 }
 0x134   : > { %v361_v43 = vpop.permute.xlu1 %360  ;;  %v345_v44 = vpop.permute.xlu0 %344  ;;  %v988_v45 = vld [vmem:[#allocation2 + $0x18] sm:$0xff] }
 0x135   : > { %v996_v46 = vld [vmem:[#allocation2 + $0x58] sm:$0xff]  ;;  %395 = vst.msk [vmem:[#allocation2 + $0x70] sm:$0xff] %vm380_vm3, %v361_v43  ;;  %387 = vst.msk [vmem:[#allocation2 + $0x30] sm:$0xff] %vm380_vm3, %v345_v44  ;;  %1479 = vmatmul.mubr.msk.f32.gmra.mrb[2].mxu0 %vm1006_vm10, %v988_v45 }
 0x136   : > { %1491 = vmatmul.mubr.msk.f32.gmra.mrb[2].mxu1 %vm1006_vm10, %v996_v46 }
 0x138   : > { %v653_v47 = vpop.permute.xlu1 %652  ;;  %v637_v21 = vpop.permute.xlu0 %636 }
 0x139   : > { %688 = vst.msk [vmem:[#allocation2 + $0x68] sm:$0xff] %vm674_vm6, %v653_v47  ;;  %680 = vst.msk [vmem:[#allocation2 + $0x28] sm:$0xff] %vm674_vm6, %v637_v21 }
 0x13c   : > { %v751_v48 = vpop.permute.xlu1 %750  ;;  %v735_v49 = vpop.permute.xlu0 %734 }
 0x13d   : > { %787 = vst.msk [vmem:[#allocation2 + $0x60] sm:$0xff] %vm774_vm7, %v751_v48  ;;  %779 = vst.msk [vmem:[#allocation2 + $0x20] sm:$0xff] %vm774_vm7, %v735_v49 }
 0x140   : > { %v363_v50 = vpop.permute.xlu1 %362  ;;  %v347_v51 = vpop.permute.xlu0 %346 }
 0x141   : > { %396 = vst.msk [vmem:[#allocation2 + $0x78] sm:$0xff] %vm380_vm3, %v363_v50  ;;  %388 = vst.msk [vmem:[#allocation2 + $0x38] sm:$0xff] %vm380_vm3, %v347_v51 }
 0x144   : > { %v461_v52 = vpop.permute.xlu1 %460  ;;  %v445_v53 = vpop.permute.xlu0 %444 }
 0x145   : > { %495 = vst.msk [vmem:[#allocation2 + $0x70] sm:$0xff] %vm480_vm4, %v461_v52  ;;  %487 = vst.msk [vmem:[#allocation2 + $0x30] sm:$0xff] %vm480_vm4, %v445_v53 }
 0x148   : > { %v753_v54 = vpop.permute.xlu1 %752  ;;  %v737_v55 = vpop.permute.xlu0 %736 }
 0x149   : > { %788 = vst.msk [vmem:[#allocation2 + $0x68] sm:$0xff] %vm774_vm7, %v753_v54  ;;  %780 = vst.msk [vmem:[#allocation2 + $0x28] sm:$0xff] %vm774_vm7, %v737_v55 }
 0x14c   : > { %v848_v3 = vpop.permute.xlu1 %847  ;;  %v832_v20 = vpop.permute.xlu0 %831 }
 0x14d   : > { %884 = vst.msk [vmem:[#allocation2 + $0x60] sm:$0xff] %vm871_vm8, %v848_v3  ;;  %876 = vst.msk [vmem:[#allocation2 + $0x20] sm:$0xff] %vm871_vm8, %v832_v20 }
 0x150   : > { %v463_v56 = vpop.permute.xlu1 %462  ;;  %v447_v57 = vpop.permute.xlu0 %446 }
 0x151   : > { %496 = vst.msk [vmem:[#allocation2 + $0x78] sm:$0xff] %vm480_vm4, %v463_v56  ;;  %488 = vst.msk [vmem:[#allocation2 + $0x38] sm:$0xff] %vm480_vm4, %v447_v57 }
 0x154   : > { %v558_v58 = vpop.permute.xlu1 %557  ;;  %v542_v59 = vpop.permute.xlu0 %541 }
 0x155   : > { %592 = vst.msk [vmem:[#allocation2 + $0x70] sm:$0xff] %vm577_vm5, %v558_v58  ;;  %584 = vst.msk [vmem:[#allocation2 + $0x30] sm:$0xff] %vm577_vm5, %v542_v59 }
 0x158   : > { %v850_v60 = vpop.permute.xlu1 %849 }
 0x159   : > { %v834_v61 = vpop.permute.xlu0 %833  ;;  %885 = vst.msk [vmem:[#allocation2 + $0x68] sm:$0xff] %vm871_vm8, %v850_v60 }
 0x15a   : > { %877 = vst.msk [vmem:[#allocation2 + $0x28] sm:$0xff] %vm871_vm8, %v834_v61 }
 0x15c   : > { %v945_v62 = vpop.permute.xlu1 %944 }
 0x15d   : > { %v929_v63 = vpop.permute.xlu0 %928  ;;  %981 = vst.msk [vmem:[#allocation2 + $0x60] sm:$0xff] %vm968_vm9, %v945_v62 }
 0x15e   : > { %973 = vst.msk [vmem:[#allocation2 + $0x20] sm:$0xff] %vm968_vm9, %v929_v63 }
 0x160   : > { %v560_v0 = vpop.permute.xlu1 %559 }
 0x161   : > { %v544_v1 = vpop.permute.xlu0 %543  ;;  %593 = vst.msk [vmem:[#allocation2 + $0x78] sm:$0xff] %vm577_vm5, %v560_v0 }
 0x162   : > { %585 = vst.msk [vmem:[#allocation2 + $0x38] sm:$0xff] %vm577_vm5, %v544_v1 }
 0x164   : > { %v655_v2 = vpop.permute.xlu1 %654  ;;  %v997_v7 = vld [vmem:[#allocation2 + $0x60] sm:$0xff] }
 0x165   : > { %v639_v8 = vpop.permute.xlu0 %638  ;;  %v989_v5 = vld [vmem:[#allocation2 + $0x20] sm:$0xff]  ;;  %689 = vst.msk [vmem:[#allocation2 + $0x70] sm:$0xff] %vm674_vm6, %v655_v2  ;;  %1493 = vmatprep.mubr.msk.f32.mxu1 %vm1006_vm10, %v997_v7 }
 0x166   : > { %681 = vst.msk [vmem:[#allocation2 + $0x30] sm:$0xff] %vm674_vm6, %v639_v8  ;;  %1481 = vmatprep.mubr.msk.f32.mxu0 %vm1006_vm10, %v989_v5 }
 0x168   : > { %v947_v9 = vpop.permute.xlu1 %946 }
 0x169   : > { %v931_v10 = vpop.permute.xlu0 %930  ;;  %982 = vst.msk [vmem:[#allocation2 + $0x68] sm:$0xff] %vm968_vm9, %v947_v9 }
 0x16a   : > { %974 = vst.msk [vmem:[#allocation2 + $0x28] sm:$0xff] %vm968_vm9, %v931_v10 }
 0x16c   : > { %v657_v11 = vpop.permute.xlu1 %656 }
 0x16d   : > { %v641_v12 = vpop.permute.xlu0 %640  ;;  %690 = vst.msk [vmem:[#allocation2 + $0x78] sm:$0xff] %vm674_vm6, %v657_v11 }
 0x16e   : > { %682 = vst.msk [vmem:[#allocation2 + $0x38] sm:$0xff] %vm674_vm6, %v641_v12 }
 0x170   : > { %v755_v14 = vpop.permute.xlu1 %754  ;;  %v998_v4 = vld [vmem:[#allocation2 + $0x68] sm:$0xff] }
 0x171   : > { %v739_v13 = vpop.permute.xlu0 %738  ;;  %v990_v15 = vld [vmem:[#allocation2 + $0x28] sm:$0xff]  ;;  %789 = vst.msk [vmem:[#allocation2 + $0x70] sm:$0xff] %vm774_vm7, %v755_v14  ;;  %1494 = vmatmul.mubr.msk.f32.gmra.mrb[4].mxu1 %vm1006_vm10, %v998_v4 }
 0x172   : > { %781 = vst.msk [vmem:[#allocation2 + $0x30] sm:$0xff] %vm774_vm7, %v739_v13  ;;  %1482 = vmatmul.mubr.msk.f32.gmra.mrb[4].mxu0 %vm1006_vm10, %v990_v15 }
 0x174   : > { %v757_v16 = vpop.permute.xlu1 %756 }
 0x175   : > { %v741_v17 = vpop.permute.xlu0 %740  ;;  %790 = vst.msk [vmem:[#allocation2 + $0x78] sm:$0xff] %vm774_vm7, %v757_v16 }
 0x176   : > { %782 = vst.msk [vmem:[#allocation2 + $0x38] sm:$0xff] %vm774_vm7, %v741_v17 }
 0x178   : > { %v852_v6 = vpop.permute.xlu1 %851 }
 0x179   : > { %v836_v18 = vpop.permute.xlu0 %835  ;;  %886 = vst.msk [vmem:[#allocation2 + $0x70] sm:$0xff] %vm871_vm8, %v852_v6 }
 0x17a   : > { %878 = vst.msk [vmem:[#allocation2 + $0x30] sm:$0xff] %vm871_vm8, %v836_v18 }
 0x17c   : > { %v854_v19 = vpop.permute.xlu1 %853 }
 0x17d   : > { %v838_v24 = vpop.permute.xlu0 %837  ;;  %887 = vst.msk [vmem:[#allocation2 + $0x78] sm:$0xff] %vm871_vm8, %v854_v19 }
 0x17e   : > { %879 = vst.msk [vmem:[#allocation2 + $0x38] sm:$0xff] %vm871_vm8, %v838_v24 }
 0x180   : > { %v949_v22 = vpop.permute.xlu1 %948 }
 0x181   : > { %v933_v23 = vpop.permute.xlu0 %932  ;;  %983 = vst.msk [vmem:[#allocation2 + $0x70] sm:$0xff] %vm968_vm9, %v949_v22 }
 0x182   : > { %975 = vst.msk [vmem:[#allocation2 + $0x30] sm:$0xff] %vm968_vm9, %v933_v23 }
 0x184   : > { %v951_v26 = vpop.permute.xlu1 %950 }
 0x185   : > { %v935_v25 = vpop.permute.xlu0 %934  ;;  %984 = vst.msk [vmem:[#allocation2 + $0x78] sm:$0xff] %vm968_vm9, %v951_v26 }
 0x186   : > { %976 = vst.msk [vmem:[#allocation2 + $0x38] sm:$0xff] %vm968_vm9, %v935_v25 }
 0x188   : > { %v999_v28 = vld [vmem:[#allocation2 + $0x70] sm:$0xff] }
 0x189   : > { %v991_v27 = vld [vmem:[#allocation2 + $0x30] sm:$0xff]  ;;  %1496 = vmatprep.mubr.msk.f32.mxu1 %vm1006_vm10, %v999_v28 }
 0x18a   : > { %1484 = vmatprep.mubr.msk.f32.mxu0 %vm1006_vm10, %v991_v27 }
 0x18c   : > { %v1000_v31 = vld [vmem:[#allocation2 + $0x78] sm:$0xff] }
 0x18d   : > { %v992_v29 = vld [vmem:[#allocation2 + $0x38] sm:$0xff]  ;;  %1497 = vmatmul.mubr.msk.f32.gmra.mrb[6].mxu1 %vm1006_vm10, %v1000_v31 }
 0x18e   : > { %1485 = vmatmul.mubr.msk.f32.gmra.mrb[6].mxu0 %vm1006_vm10, %v992_v29 }
 0x1c8   : > { %v1477_v32 = vpop.f32.mrb[0].mxu0 }
 0x1c9   : > { %v1489_v30 = vpop.f32.mrb[0].mxu1  ;;  %1205 = vst [vmem:[%s2134_s25 + $0x8] sm:$0xff] %v1477_v32  ;;  %v1125_v33 = vpop.f32.mrb[1].mxu0 }
 0x1ca   : > { %1213 = vst [vmem:[%s2134_s25 + $0x48] sm:$0xff] %v1489_v30  ;;  %v1165_v34 = vpop.f32.mrb[1].mxu1  ;;  %1204 = vst [vmem:[%s2134_s25] sm:$0xff] %v1125_v33 }
 0x1cb   : > { %1212 = vst [vmem:[%s2134_s25 + $0x40] sm:$0xff] %v1165_v34 }
 0x208   : > { %v1480_v35 = vpop.f32.mrb[2].mxu0 }
 0x209   : > { %v1492_v36 = vpop.f32.mrb[2].mxu1  ;;  %1207 = vst [vmem:[%s2134_s25 + $0x18] sm:$0xff] %v1480_v35  ;;  %v1135_v37 = vpop.f32.mrb[3].mxu0 }
 0x20a   : > { %1215 = vst [vmem:[%s2134_s25 + $0x58] sm:$0xff] %v1492_v36  ;;  %v1175_v38 = vpop.f32.mrb[3].mxu1  ;;  %1206 = vst [vmem:[%s2134_s25 + $0x10] sm:$0xff] %v1135_v37 }
 0x20b   : > { %1214 = vst [vmem:[%s2134_s25 + $0x50] sm:$0xff] %v1175_v38 }
 0x244   : > { %v1495_v40 = vpop.f32.mrb[4].mxu1 }
 0x245   : > { %v1483_v39 = vpop.f32.mrb[4].mxu0  ;;  %1217 = vst [vmem:[%s2134_s25 + $0x68] sm:$0xff] %v1495_v40  ;;  %v1185_v42 = vpop.f32.mrb[5].mxu1 }
 0x246   : > { %1209 = vst [vmem:[%s2134_s25 + $0x28] sm:$0xff] %v1483_v39  ;;  %v1145_v41 = vpop.f32.mrb[5].mxu0  ;;  %1216 = vst [vmem:[%s2134_s25 + $0x60] sm:$0xff] %v1185_v42 }
 0x247   : > { %1208 = vst [vmem:[%s2134_s25 + $0x20] sm:$0xff] %v1145_v41 }
 0x260   : > { %v1498_v44 = vpop.f32.mrb[6].mxu1 }
 0x261   : > { %v1486_v43 = vpop.f32.mrb[6].mxu0  ;;  %1219 = vst [vmem:[%s2134_s25 + $0x78] sm:$0xff] %v1498_v44  ;;  %v1195_v46 = vpop.f32.mrb[7].mxu1 }
 0x262   : > { %1211 = vst [vmem:[%s2134_s25 + $0x38] sm:$0xff] %v1486_v43  ;;  %v1155_v45 = vpop.f32.mrb[7].mxu0  ;;  %1218 = vst [vmem:[%s2134_s25 + $0x70] sm:$0xff] %v1195_v46 }
 0x263   : > { %1210 = vst [vmem:[%s2134_s25 + $0x30] sm:$0xff] %v1155_v45 }
 0x264 PF: > { %s12_s13 = sadd.s32 1, %s1600_s13   ;;  %s2170_s9 = smov %s1592_s11 }
 0x265   : > { %p9_p7 = scmp.ge.s32.totalorder %s12_s13, 6   ;;  %s2171_s10 = smov %s1596_s12 }
 0x266   : > { %s2172_s11 = smov %s2175_s14  ;;  %s2173_s12 = smov %s2179_s15 }
 0x267   :  { %11 = sbr.rel (!%p9_p7) target bundleno = 3 (0x3), region = 61 }

// kernel: a_call__.3
= control target key start
LH: loop header
LB: loop body
LE: loop exit
PB: predicated region body
PF: predicated region fallthrough
CT: control target
= control target key end

     0   :  { %s3507_s9 = smov 0   ;;  %s3509_s10 = smov 0   ;;  %s5161_s0 = inlined_call_operand.vmem [shape: f32[2,20,20,4], index: 0, kind: input, shape index: {}]   ;;  %s5162_s1 = inlined_call_operand.vmem [shape: f32[100,128], index: 1, kind: input, shape index: {}]   ;;  %s5163_s2 = inlined_call_operand.vmem [shape: f32[2,256,128], index: 2, kind: output, shape index: {}]  }
   0x1   :  { %s3511_s11 = smov 0   ;;  %s3513_s12 = smov 0  }
   0x2   :  { %s3515_s13 = smov 0  }
   0x3 LB: > { %s21_s14 = sadd.s32 1, %s3458_s11  ;;  %s24_s15 = sadd.s32 1, %s3462_s12  ;;  %s3466_s13 = sphi %s3515_s13, %s12_s13   ;;  %s3462_s12 = sphi %s3513_s12, %s5197_s12   ;;  %s3458_s11 = sphi %s3511_s11, %s5196_s11   ;;  %s3454_s10 = sphi %s3509_s10, %s5195_s10   ;;  %s3450_s9 = sphi %s3507_s9, %s5194_s9  }
   0x4   : > { %p22_p0 = scmp.ge.s32.totalorder %s21_s14, 2  ;;  %p2892_p1 = scmp.ge.s32.totalorder %s3466_s13, 1 }
   0x5   : > { %p126_p2 = scmp.lt.s32.totalorder %s3466_s13, 5 }
   0x6   : > { %s5199_s14 = smov (%p22_p0, %s21_s14), 0  ;;  %s5201_s15 = smov (!%p22_p0, %s24_s15), %s3462_s12 }
   0x7   : > { %p127_p3 = pnand %p2892_p1, %p126_p2  ;;  %p26_p4 = scmp.ge.s32.totalorder %s5201_s15, 2 }
   0x9   : > { %s5203_s15 = smov (%p26_p4, %s5201_s15), 0  ;;  %130 = sbr.rel (%p127_p3) target bundleno = 1126 (0x466), region = 28 }
  0x10   : > { %p152_p5 = scmp.lt.s32.totalorder %s3454_s10, 1  ;;  %s2898_s16 = smul.u32 192, %s3450_s9  ;;  %vm186_vm0 = vcmask 31744   ;;  %vm283_vm1 = vcmask 64544   ;;  %vm380_vm2 = vcmask 97344   ;;  %vm477_vm3 = vcmask 130144  }
  0x11   : > { %s3468_s22 = smov 4   ;;  %s3469_s23 = smov 8   ;;  %vm574_vm4 = vcmask 162944   ;;  %vm674_vm5 = vcmask 195744   ;;  %vm771_vm6 = vcmask 228544   ;;  %vm868_vm7 = vcmask 261344  }
  0x12   : > { %s5205_s10 = smov (!%p152_p5, %s3454_s10), 1  ;;  %s3470_s24 = smov 12   ;;  %vm965_vm8 = vcmask 294144   ;;  %vm1062_vm9 = vcmask 326944   ;;  %vm1162_vm10 = vcmask 359744   ;;  %vm1259_vm11 = vcmask 392544  }
  0x13   : > { %s3363_s17 = smul.u32 480, %s5205_s10  ;;  %s3471_s25 = smov 16   ;;  %vm1356_vm12 = vcmask 425344   ;;  %vm1453_vm13 = vcmask 458144   ;;  %vm1550_vm14 = vcmask 490944   ;;  %vm1650_vm15 = vcmask 523744  }
  0x14   : > { %s3472_s26 = smov 20   ;;  %s3473_s27 = smov 24  }
  0x15   : > { %s156_s20 = scalar_lea.vmem %s5161_s0, %s3363_s17  ;;  %s3474_s28 = smov 28  }
  0x16   : > { %s3546_s21 = scalar_lea.vmem %s156_s20, %s2898_s16  ;;  %s3475_s29 = smov 32  }
  0x17   : > { %v3549_v0 = vld [vmem:[%s3546_s21 + $0x19] sm:$0xff]  ;;  %v203_v1 = vld [vmem:[%s3546_s21 + $0x1] sm:$0xff]  ;;  %v204_v3 = vld [vmem:[%s3546_s21 + $0x9] sm:$0xff]  ;;  %s3476_s30 = smov 36   ;;  %s3477_s3 = smov 40  }
  0x18   : > { %239 = vrot.lane.b32.xlu1 %v3549_v0, %s3468_s22  ;;  %235 = vrot.lane.b32.xlu0 %v203_v1, %s3468_s22  ;;  %v3556_v2 = vld [vmem:[%s3546_s21 + $0x21] sm:$0xff]  ;;  %v3563_v4 = vld [vmem:[%s3546_s21 + $0x39] sm:$0xff]  ;;  %s3478_s4 = smov 44   ;;  %s3479_s5 = smov 48  }
  0x19   : > { %v3566_v5 = vld [vmem:[%s3546_s21 + $0x31] sm:$0xff]  ;;  %v3576_v7 = vld [vmem:[%s3546_s21 + $0x49] sm:$0xff]  ;;  %v3586_v9 = vld [vmem:[%s3546_s21 + $0x61] sm:$0xff]  ;;  %s3480_s6 = smov 52   ;;  %s3481_s7 = smov 56  }
  0x1a   : > { %v3573_v6 = vld [vmem:[%s3546_s21 + $0x51] sm:$0xff]  ;;  %v3583_v8 = vld [vmem:[%s3546_s21 + $0x69] sm:$0xff]  ;;  %v3593_v10 = vld [vmem:[%s3546_s21 + $0x81] sm:$0xff]  ;;  %s3482_s8 = smov 60   ;;  %s3483_s16 = smov 64  }
  0x1b   : > { %v3596_v11 = vld [vmem:[%s3546_s21 + $0x79] sm:$0xff]  ;;  %v3610_v15 = vld [vmem:[%s3546_s21 + $0x91] sm:$0xff]  ;;  %v171_v17 = vld [vmem:[%s3546_s21 + $0x8] sm:$0xff]  ;;  %s3484_s17 = smov 68   ;;  %s3485_s18 = smov 72  }
  0x1c   : > { %241 = vrot.lane.b32.xlu1 %v3556_v2, %s3468_s22  ;;  %237 = vrot.lane.b32.xlu0 %v204_v3, %s3468_s22  ;;  %v3603_v12 = vld [vmem:[%s3546_s21 + $0x18] sm:$0xff]  ;;  %v170_v13 = vld [vmem:[%s3546_s21] sm:$0xff]  ;;  %188 = vst.msk [vmem:[#allocation2 + $0x8] sm:$0xff] %vm186_vm0, %v171_v17  ;;  %s3486_s19 = smov 76   ;;  %s3487_s20 = smov 80  }
  0x1d   : > { %v3607_v14 = vld [vmem:[%s3546_s21 + $0x99] sm:$0xff]  ;;  %189 = vst.msk [vmem:[#allocation2 + $0x10] sm:$0xff] %vm186_vm0, %v3603_v12  ;;  %187 = vst.msk [vmem:[#allocation2] sm:$0xff] %vm186_vm0, %v170_v13  ;;  %v3622_v18 = vld [vmem:[%s3546_s21 + $0xb1] sm:$0xff] }
  0x1e   : > { %v3616_v16 = vld [vmem:[%s3546_s21 + $0x20] sm:$0xff]  ;;  %v3626_v19 = vld [vmem:[%s3546_s21 + $0x38] sm:$0xff]  ;;  %v3629_v20 = vld [vmem:[%s3546_s21 + $0x30] sm:$0xff] }
  0x1f   : > { %190 = vst.msk [vmem:[#allocation2 + $0x18] sm:$0xff] %vm186_vm0, %v3616_v16  ;;  %v3636_v21 = vld [vmem:[%s3546_s21 + $0xa9] sm:$0xff]  ;;  %192 = vst.msk [vmem:[#allocation2 + $0x28] sm:$0xff] %vm186_vm0, %v3626_v19  ;;  %v3654_v25 = vld [vmem:[%s3546_s21 + $0x60] sm:$0xff] }
  0x20   : > { %245 = vrot.lane.b32.xlu1 %v3563_v4, %s3468_s22  ;;  %243 = vrot.lane.b32.xlu0 %v3566_v5, %s3468_s22  ;;  %191 = vst.msk [vmem:[#allocation2 + $0x20] sm:$0xff] %vm186_vm0, %v3629_v20  ;;  %v3643_v22 = vld [vmem:[%s3546_s21 + $0x50] sm:$0xff]  ;;  %v3648_v23 = vld [vmem:[%s3546_s21 + $0x48] sm:$0xff]  ;;  %195 = vst.msk [vmem:[#allocation2 + $0x40] sm:$0xff] %vm186_vm0, %v3654_v25 }
  0x21   : > { %194 = vst.msk [vmem:[#allocation2 + $0x38] sm:$0xff] %vm186_vm0, %v3643_v22  ;;  %v3651_v24 = vld [vmem:[%s3546_s21 + $0x68] sm:$0xff]  ;;  %193 = vst.msk [vmem:[#allocation2 + $0x30] sm:$0xff] %vm186_vm0, %v3648_v23  ;;  %v3663_v26 = vld [vmem:[%s3546_s21 + $0x80] sm:$0xff] }
  0x22   : > { %196 = vst.msk [vmem:[#allocation2 + $0x48] sm:$0xff] %vm186_vm0, %v3651_v24  ;;  %v3666_v27 = vld [vmem:[%s3546_s21 + $0x78] sm:$0xff]  ;;  %198 = vst.msk [vmem:[#allocation2 + $0x58] sm:$0xff] %vm186_vm0, %v3663_v26  ;;  %v3678_v29 = vld [vmem:[%s3546_s21 + $0x90] sm:$0xff] }
  0x23   : > { %v3669_v28 = vld [vmem:[%s3546_s21 + $0x98] sm:$0xff]  ;;  %197 = vst.msk [vmem:[#allocation2 + $0x50] sm:$0xff] %vm186_vm0, %v3666_v27  ;;  %v3681_v30 = vld [vmem:[%s3546_s21 + $0xb0] sm:$0xff]  ;;  %v3684_v31 = vld [vmem:[%s3546_s21 + $0xa8] sm:$0xff] }
  0x24   : > { %249 = vrot.lane.b32.xlu1 %v3573_v6, %s3468_s22  ;;  %247 = vrot.lane.b32.xlu0 %v3576_v7, %s3468_s22  ;;  %200 = vst.msk [vmem:[#allocation2 + $0x68] sm:$0xff] %vm186_vm0, %v3669_v28  ;;  %199 = vst.msk [vmem:[#allocation2 + $0x60] sm:$0xff] %vm186_vm0, %v3678_v29  ;;  %v301_v32 = vld [vmem:[%s3546_s21 + $0xa] sm:$0xff]  ;;  %v300_v33 = vld [vmem:[%s3546_s21 + $0x2] sm:$0xff] }
  0x25   : > { %202 = vst.msk [vmem:[#allocation2 + $0x78] sm:$0xff] %vm186_vm0, %v3681_v30  ;;  %201 = vst.msk [vmem:[#allocation2 + $0x70] sm:$0xff] %vm186_vm0, %v3684_v31  ;;  %v3699_v34 = vld [vmem:[%s3546_s21 + $0x22] sm:$0xff]  ;;  %v3702_v35 = vld [vmem:[%s3546_s21 + $0x1a] sm:$0xff]  ;;  %vm1747_vm0 = vcmask 556544  }
  0x26   : > { %v3707_v36 = vld [vmem:[%s3546_s21 + $0x3a] sm:$0xff]  ;;  %v3710_v37 = vld [vmem:[%s3546_s21 + $0x32] sm:$0xff]  ;;  %v3718_v39 = vld [vmem:[%s3546_s21 + $0x4a] sm:$0xff] }
  0x27   : > { %v3715_v38 = vld [vmem:[%s3546_s21 + $0x52] sm:$0xff]  ;;  %v3723_v40 = vld [vmem:[%s3546_s21 + $0x6a] sm:$0xff]  ;;  %v3726_v41 = vld [vmem:[%s3546_s21 + $0x62] sm:$0xff] }
  0x28   : > { %253 = vrot.lane.b32.xlu1 %v3583_v8, %s3468_s22  ;;  %251 = vrot.lane.b32.xlu0 %v3586_v9, %s3468_s22  ;;  %v3731_v42 = vld [vmem:[%s3546_s21 + $0x82] sm:$0xff]  ;;  %v3734_v43 = vld [vmem:[%s3546_s21 + $0x7a] sm:$0xff] }
  0x29   : > { %v3739_v44 = vld [vmem:[%s3546_s21 + $0x9a] sm:$0xff]  ;;  %v3742_v45 = vld [vmem:[%s3546_s21 + $0x92] sm:$0xff]  ;;  %v3750_v47 = vld [vmem:[%s3546_s21 + $0xaa] sm:$0xff] }
  0x2a   : > { %v3747_v46 = vld [vmem:[%s3546_s21 + $0xb2] sm:$0xff]  ;;  %v397_v49 = vld [vmem:[%s3546_s21 + $0x3] sm:$0xff]  ;;  %v3760_v51 = vld [vmem:[%s3546_s21 + $0x1b] sm:$0xff] }
  0x2b   : > { %v398_v48 = vld [vmem:[%s3546_s21 + $0xb] sm:$0xff]  ;;  %v3757_v50 = vld [vmem:[%s3546_s21 + $0x23] sm:$0xff]  ;;  %v3765_v52 = vld [vmem:[%s3546_s21 + $0x3b] sm:$0xff] }
  0x2c   : > { %257 = vrot.lane.b32.xlu1 %v3593_v10, %s3468_s22  ;;  %255 = vrot.lane.b32.xlu0 %v3596_v11, %s3468_s22  ;;  %v3768_v53 = vld [vmem:[%s3546_s21 + $0x33] sm:$0xff]  ;;  %v3776_v55 = vld [vmem:[%s3546_s21 + $0x4b] sm:$0xff] }
  0x2d   : > { %v3773_v54 = vld [vmem:[%s3546_s21 + $0x53] sm:$0xff]  ;;  %v3781_v56 = vld [vmem:[%s3546_s21 + $0x6b] sm:$0xff]  ;;  %v3784_v57 = vld [vmem:[%s3546_s21 + $0x63] sm:$0xff] }
  0x2e   : > { %v3789_v58 = vld [vmem:[%s3546_s21 + $0x83] sm:$0xff]  ;;  %v3792_v59 = vld [vmem:[%s3546_s21 + $0x7b] sm:$0xff]  ;;  %v3800_v61 = vld [vmem:[%s3546_s21 + $0x93] sm:$0xff] }
  0x2f   : > { %v3797_v60 = vld [vmem:[%s3546_s21 + $0x9b] sm:$0xff]  ;;  %v3805_v62 = vld [vmem:[%s3546_s21 + $0xb3] sm:$0xff]  ;;  %v3808_v63 = vld [vmem:[%s3546_s21 + $0xab] sm:$0xff] }
  0x30   : > { %261 = vrot.lane.b32.xlu1 %v3607_v14, %s3468_s22  ;;  %259 = vrot.lane.b32.xlu0 %v3610_v15, %s3468_s22  ;;  %v495_v1 = vld [vmem:[%s3546_s21 + $0xc] sm:$0xff]  ;;  %v494_v3 = vld [vmem:[%s3546_s21 + $0x4] sm:$0xff] }
  0x31   : > { %v3817_v13 = vld [vmem:[%s3546_s21 + $0x24] sm:$0xff]  ;;  %v3820_v17 = vld [vmem:[%s3546_s21 + $0x1c] sm:$0xff] }
  0x32   : > { %5174 = vst [vmem:[#allocation3_spill] sm:$0xff] %v3817_v13  ;;  %5175 = vst [vmem:[#allocation4_spill] sm:$0xff] %v3820_v17 }
  0x34   : > { %265 = vrot.lane.b32.xlu1 %v3622_v18, %s3468_s22  ;;  %263 = vrot.lane.b32.xlu0 %v3636_v21, %s3468_s22  ;;  %s3488_s22 = smov 84  }
  0x38   : > { %334 = vrot.lane.b32.xlu1 %v301_v32, %s3469_s23  ;;  %332 = vrot.lane.b32.xlu0 %v300_v33, %s3469_s23  ;;  %v3827_v32 = vld [vmem:[%s3546_s21 + $0x3c] sm:$0xff]  ;;  %v3830_v33 = vld [vmem:[%s3546_s21 + $0x34] sm:$0xff] }
  0x39   : > { %5176 = vst [vmem:[#allocation5_spill] sm:$0xff] %v3827_v32  ;;  %5177 = vst [vmem:[#allocation6_spill] sm:$0xff] %v3830_v33 }
  0x3c   : > { %338 = vrot.lane.b32.xlu1 %v3699_v34, %s3469_s23  ;;  %336 = vrot.lane.b32.xlu0 %v3702_v35, %s3469_s23 }
  0x40   : > { %342 = vrot.lane.b32.xlu1 %v3707_v36, %s3469_s23  ;;  %340 = vrot.lane.b32.xlu0 %v3710_v37, %s3469_s23 }
  0x44   : > { %346 = vrot.lane.b32.xlu1 %v3715_v38, %s3469_s23  ;;  %344 = vrot.lane.b32.xlu0 %v3718_v39, %s3469_s23 }
  0x48   : > { %350 = vrot.lane.b32.xlu1 %v3723_v40, %s3469_s23  ;;  %348 = vrot.lane.b32.xlu0 %v3726_v41, %s3469_s23 }
  0x4c   : > { %354 = vrot.lane.b32.xlu1 %v3731_v42, %s3469_s23  ;;  %352 = vrot.lane.b32.xlu0 %v3734_v43, %s3469_s23 }
  0x50   : > { %358 = vrot.lane.b32.xlu1 %v3739_v44, %s3469_s23  ;;  %356 = vrot.lane.b32.xlu0 %v3742_v45, %s3469_s23 }
  0x54   : > { %362 = vrot.lane.b32.xlu1 %v3747_v46, %s3469_s23  ;;  %360 = vrot.lane.b32.xlu0 %v3750_v47, %s3469_s23  ;;  %s3489_s23 = smov 88  }
  0x58   : > { %431 = vrot.lane.b32.xlu1 %v398_v48, %s3470_s24  ;;  %429 = vrot.lane.b32.xlu0 %v397_v49, %s3470_s24  ;;  %v3837_v48 = vld [vmem:[%s3546_s21 + $0x54] sm:$0xff]  ;;  %v3840_v49 = vld [vmem:[%s3546_s21 + $0x4c] sm:$0xff] }
  0x59   : > { %5178 = vst [vmem:[#allocation7_spill] sm:$0xff] %v3837_v48  ;;  %5179 = vst [vmem:[#allocation8_spill] sm:$0xff] %v3840_v49 }
  0x5c   : > { %435 = vrot.lane.b32.xlu1 %v3757_v50, %s3470_s24  ;;  %433 = vrot.lane.b32.xlu0 %v3760_v51, %s3470_s24 }
  0x60   : > { %439 = vrot.lane.b32.xlu1 %v3765_v52, %s3470_s24  ;;  %437 = vrot.lane.b32.xlu0 %v3768_v53, %s3470_s24 }
  0x64   : > { %443 = vrot.lane.b32.xlu1 %v3773_v54, %s3470_s24  ;;  %441 = vrot.lane.b32.xlu0 %v3776_v55, %s3470_s24 }
  0x68   : > { %447 = vrot.lane.b32.xlu1 %v3781_v56, %s3470_s24  ;;  %445 = vrot.lane.b32.xlu0 %v3784_v57, %s3470_s24 }
  0x6c   : > { %451 = vrot.lane.b32.xlu1 %v3789_v58, %s3470_s24  ;;  %449 = vrot.lane.b32.xlu0 %v3792_v59, %s3470_s24 }
  0x70   : > { %455 = vrot.lane.b32.xlu1 %v3797_v60, %s3470_s24  ;;  %453 = vrot.lane.b32.xlu0 %v3800_v61, %s3470_s24 }
  0x74   : > { %459 = vrot.lane.b32.xlu1 %v3805_v62, %s3470_s24  ;;  %457 = vrot.lane.b32.xlu0 %v3808_v63, %s3470_s24  ;;  %s3490_s24 = smov 92  }
  0x78   : > { %528 = vrot.lane.b32.xlu1 %v495_v1, %s3471_s25  ;;  %526 = vrot.lane.b32.xlu0 %v494_v3, %s3471_s25  ;;  %v3847_v1 = vld [vmem:[%s3546_s21 + $0x6c] sm:$0xff]  ;;  %v3850_v3 = vld [vmem:[%s3546_s21 + $0x64] sm:$0xff] }
  0x79   : > { %5180 = vst [vmem:[#allocation9_spill] sm:$0xff] %v3847_v1  ;;  %5181 = vst [vmem:[#allocation10_spill] sm:$0xff] %v3850_v3 }
  0x7c   : > { %532 = vrot.lane.b32.xlu1 %v3817_v13, %s3471_s25  ;;  %530 = vrot.lane.b32.xlu0 %v3820_v17, %s3471_s25 }
  0x80   : > { %536 = vrot.lane.b32.xlu1 %v3827_v32, %s3471_s25  ;;  %534 = vrot.lane.b32.xlu0 %v3830_v33, %s3471_s25  ;;  %v3857_v33 = vld [vmem:[%s3546_s21 + $0x84] sm:$0xff]  ;;  %v3860_v32 = vld [vmem:[%s3546_s21 + $0x7c] sm:$0xff] }
  0x81   : > { %5182 = vst [vmem:[#allocation11_spill] sm:$0xff] %v3857_v33  ;;  %5183 = vst [vmem:[#allocation12_spill] sm:$0xff] %v3860_v32 }
  0x84   : > { %540 = vrot.lane.b32.xlu1 %v3837_v48, %s3471_s25  ;;  %538 = vrot.lane.b32.xlu0 %v3840_v49, %s3471_s25 }
  0x88   : > { %544 = vrot.lane.b32.xlu1 %v3847_v1, %s3471_s25  ;;  %542 = vrot.lane.b32.xlu0 %v3850_v3, %s3471_s25  ;;  %v3869_v3 = vld [vmem:[%s3546_s21 + $0x9c] sm:$0xff]  ;;  %v3872_v1 = vld [vmem:[%s3546_s21 + $0x94] sm:$0xff] }
  0x8a   : > { %v240_v48 = vpop.permute.xlu1 %239  ;;  %v236_v17 = vpop.permute.xlu0 %235 }
  0x8b   : > { %286 = vst.msk [vmem:[#allocation2 + $0x10] sm:$0xff] %vm283_vm1, %v240_v48  ;;  %284 = vst.msk [vmem:[#allocation2] sm:$0xff] %vm283_vm1, %v236_v17  ;;  %v3881_v17 = vld [vmem:[%s3546_s21 + $0xb4] sm:$0xff]  ;;  %v3884_v48 = vld [vmem:[%s3546_s21 + $0xac] sm:$0xff] }
  0x8c   : > { %548 = vrot.lane.b32.xlu1 %v3857_v33, %s3471_s25  ;;  %546 = vrot.lane.b32.xlu0 %v3860_v32, %s3471_s25 }
  0x8e   : > { %v242_v49 = vpop.permute.xlu1 %241  ;;  %v238_v13 = vpop.permute.xlu0 %237 }
  0x8f   : > { %287 = vst.msk [vmem:[#allocation2 + $0x18] sm:$0xff] %vm283_vm1, %v242_v49  ;;  %285 = vst.msk [vmem:[#allocation2 + $0x8] sm:$0xff] %vm283_vm1, %v238_v13 }
  0x90   : > { %552 = vrot.lane.b32.xlu1 %v3869_v3, %s3471_s25  ;;  %550 = vrot.lane.b32.xlu0 %v3872_v1, %s3471_s25 }
  0x92   : > { %v246_v32 = vpop.permute.xlu1 %245  ;;  %v244_v33 = vpop.permute.xlu0 %243 }
  0x93   : > { %289 = vst.msk [vmem:[#allocation2 + $0x28] sm:$0xff] %vm283_vm1, %v246_v32  ;;  %288 = vst.msk [vmem:[#allocation2 + $0x20] sm:$0xff] %vm283_vm1, %v244_v33 }
  0x94   : > { %556 = vrot.lane.b32.xlu1 %v3881_v17, %s3471_s25  ;;  %554 = vrot.lane.b32.xlu0 %v3884_v48, %s3471_s25 }
  0x96   : > { %v250_v13 = vpop.permute.xlu1 %249  ;;  %v248_v49 = vpop.permute.xlu0 %247 }
  0x97   : > { %291 = vst.msk [vmem:[#allocation2 + $0x38] sm:$0xff] %vm283_vm1, %v250_v13  ;;  %290 = vst.msk [vmem:[#allocation2 + $0x30] sm:$0xff] %vm283_vm1, %v248_v49 }
  0x98   : > { %628 = vrot.lane.b32.xlu1 %v3616_v16, %s3472_s26  ;;  %626 = vrot.lane.b32.xlu0 %v3603_v12, %s3472_s26 }
  0x9a   : > { %v254_v32 = vpop.permute.xlu1 %253  ;;  %v252_v33 = vpop.permute.xlu0 %251 }
  0x9b   : > { %293 = vst.msk [vmem:[#allocation2 + $0x48] sm:$0xff] %vm283_vm1, %v254_v32  ;;  %292 = vst.msk [vmem:[#allocation2 + $0x40] sm:$0xff] %vm283_vm1, %v252_v33 }
  0x9c   : > { %632 = vrot.lane.b32.xlu1 %v3626_v19, %s3472_s26  ;;  %630 = vrot.lane.b32.xlu0 %v3629_v20, %s3472_s26 }
  0x9e   : > { %v258_v13 = vpop.permute.xlu1 %257  ;;  %v256_v49 = vpop.permute.xlu0 %255 }
  0x9f   : > { %295 = vst.msk [vmem:[#allocation2 + $0x58] sm:$0xff] %vm283_vm1, %v258_v13  ;;  %294 = vst.msk [vmem:[#allocation2 + $0x50] sm:$0xff] %vm283_vm1, %v256_v49 }
  0xa0   : > { %636 = vrot.lane.b32.xlu1 %v3643_v22, %s3472_s26  ;;  %634 = vrot.lane.b32.xlu0 %v3648_v23, %s3472_s26 }
  0xa2   : > { %v262_v12 = vpop.permute.xlu1 %261  ;;  %v260_v16 = vpop.permute.xlu0 %259 }
  0xa3   : > { %297 = vst.msk [vmem:[#allocation2 + $0x68] sm:$0xff] %vm283_vm1, %v262_v12  ;;  %296 = vst.msk [vmem:[#allocation2 + $0x60] sm:$0xff] %vm283_vm1, %v260_v16 }
  0xa4   : > { %640 = vrot.lane.b32.xlu1 %v3651_v24, %s3472_s26  ;;  %638 = vrot.lane.b32.xlu0 %v3654_v25, %s3472_s26 }
  0xa6   : > { %v266_v32 = vpop.permute.xlu1 %265  ;;  %v264_v33 = vpop.permute.xlu0 %263 }
  0xa7   : > { %299 = vst.msk [vmem:[#allocation2 + $0x78] sm:$0xff] %vm283_vm1, %v266_v32  ;;  %298 = vst.msk [vmem:[#allocation2 + $0x70] sm:$0xff] %vm283_vm1, %v264_v33  ;;  %v3935_v32 = vld [vmem:[%s3546_s21 + $0xc8] sm:$0xff]  ;;  %v3938_v33 = vld [vmem:[%s3546_s21 + $0xc0] sm:$0xff]  ;;  %vm1844_vm1 = vcmask 589344  }
  0xa8   : > { %644 = vrot.lane.b32.xlu1 %v3663_v26, %s3472_s26  ;;  %642 = vrot.lane.b32.xlu0 %v3666_v27, %s3472_s26 }
  0xaa   : > { %v335_v13 = vpop.permute.xlu1 %334  ;;  %v333_v49 = vpop.permute.xlu0 %332 }
  0xab   : > { %382 = vst.msk [vmem:[#allocation2 + $0x8] sm:$0xff] %vm380_vm2, %v335_v13  ;;  %381 = vst.msk [vmem:[#allocation2] sm:$0xff] %vm380_vm2, %v333_v49 }
  0xac   : > { %648 = vrot.lane.b32.xlu1 %v3669_v28, %s3472_s26  ;;  %646 = vrot.lane.b32.xlu0 %v3678_v29, %s3472_s26 }
  0xae   : > { %v339_v12 = vpop.permute.xlu1 %338  ;;  %v337_v16 = vpop.permute.xlu0 %336 }
  0xaf   : > { %384 = vst.msk [vmem:[#allocation2 + $0x18] sm:$0xff] %vm380_vm2, %v339_v12  ;;  %383 = vst.msk [vmem:[#allocation2 + $0x10] sm:$0xff] %vm380_vm2, %v337_v16 }
  0xb0   : > { %652 = vrot.lane.b32.xlu1 %v3681_v30, %s3472_s26  ;;  %650 = vrot.lane.b32.xlu0 %v3684_v31, %s3472_s26 }
  0xb2   : > { %v343_v13 = vpop.permute.xlu1 %342  ;;  %v341_v49 = vpop.permute.xlu0 %340 }
  0xb3   : > { %386 = vst.msk [vmem:[#allocation2 + $0x28] sm:$0xff] %vm380_vm2, %v343_v13  ;;  %385 = vst.msk [vmem:[#allocation2 + $0x20] sm:$0xff] %vm380_vm2, %v341_v49 }
  0xb4   : > { %656 = vrot.lane.b32.xlu1 %v3935_v32, %s3472_s26  ;;  %654 = vrot.lane.b32.xlu0 %v3938_v33, %s3472_s26 }
  0xb6   : > { %v347_v12 = vpop.permute.xlu1 %346  ;;  %v345_v16 = vpop.permute.xlu0 %344 }
  0xb7   : > { %388 = vst.msk [vmem:[#allocation2 + $0x38] sm:$0xff] %vm380_vm2, %v347_v12  ;;  %387 = vst.msk [vmem:[#allocation2 + $0x30] sm:$0xff] %vm380_vm2, %v345_v16 }
  0xb8   : > { %725 = vrot.lane.b32.xlu1 %v3556_v2, %s3473_s27  ;;  %723 = vrot.lane.b32.xlu0 %v3549_v0, %s3473_s27 }
  0xba   : > { %v351_v13 = vpop.permute.xlu1 %350  ;;  %v349_v49 = vpop.permute.xlu0 %348 }
  0xbb   : > { %390 = vst.msk [vmem:[#allocation2 + $0x48] sm:$0xff] %vm380_vm2, %v351_v13  ;;  %389 = vst.msk [vmem:[#allocation2 + $0x40] sm:$0xff] %vm380_vm2, %v349_v49 }
  0xbc   : > { %729 = vrot.lane.b32.xlu1 %v3563_v4, %s3473_s27  ;;  %727 = vrot.lane.b32.xlu0 %v3566_v5, %s3473_s27 }
  0xbe   : > { %v355_v12 = vpop.permute.xlu1 %354  ;;  %v353_v16 = vpop.permute.xlu0 %352 }
  0xbf   : > { %392 = vst.msk [vmem:[#allocation2 + $0x58] sm:$0xff] %vm380_vm2, %v355_v12  ;;  %391 = vst.msk [vmem:[#allocation2 + $0x50] sm:$0xff] %vm380_vm2, %v353_v16 }
  0xc0   : > { %733 = vrot.lane.b32.xlu1 %v3573_v6, %s3473_s27  ;;  %731 = vrot.lane.b32.xlu0 %v3576_v7, %s3473_s27 }
  0xc2   : > { %v359_v0 = vpop.permute.xlu1 %358  ;;  %v357_v2 = vpop.permute.xlu0 %356 }
  0xc3   : > { %394 = vst.msk [vmem:[#allocation2 + $0x68] sm:$0xff] %vm380_vm2, %v359_v0  ;;  %393 = vst.msk [vmem:[#allocation2 + $0x60] sm:$0xff] %vm380_vm2, %v357_v2 }
  0xc4   : > { %737 = vrot.lane.b32.xlu1 %v3583_v8, %s3473_s27  ;;  %735 = vrot.lane.b32.xlu0 %v3586_v9, %s3473_s27 }
  0xc6   : > { %v363_v4 = vpop.permute.xlu1 %362  ;;  %v361_v5 = vpop.permute.xlu0 %360 }
  0xc7   : > { %396 = vst.msk [vmem:[#allocation2 + $0x78] sm:$0xff] %vm380_vm2, %v363_v4  ;;  %395 = vst.msk [vmem:[#allocation2 + $0x70] sm:$0xff] %vm380_vm2, %v361_v5  ;;  %vm2621_vm2 = vcmask 1043456  }
  0xc8   : > { %741 = vrot.lane.b32.xlu1 %v3593_v10, %s3473_s27  ;;  %739 = vrot.lane.b32.xlu0 %v3596_v11, %s3473_s27  ;;  %v3989_v10 = vld [vmem:[%s3546_s21 + $0xc9] sm:$0xff]  ;;  %v3992_v11 = vld [vmem:[%s3546_s21 + $0xc1] sm:$0xff] }
  0xca   : > { %v432_v6 = vpop.permute.xlu1 %431  ;;  %v430_v7 = vpop.permute.xlu0 %429 }
  0xcb   : > { %479 = vst.msk [vmem:[#allocation2 + $0x8] sm:$0xff] %vm477_vm3, %v432_v6  ;;  %478 = vst.msk [vmem:[#allocation2] sm:$0xff] %vm477_vm3, %v430_v7  ;;  %v5185_v7 = vld [vmem:[#allocation4_spill] sm:$0xff] }
  0xcc   : > { %745 = vrot.lane.b32.xlu1 %v3607_v14, %s3473_s27  ;;  %743 = vrot.lane.b32.xlu0 %v3610_v15, %s3473_s27 }
  0xce   : > { %v436_v8 = vpop.permute.xlu1 %435  ;;  %v434_v9 = vpop.permute.xlu0 %433 }
  0xcf   : > { %481 = vst.msk [vmem:[#allocation2 + $0x18] sm:$0xff] %vm477_vm3, %v436_v8  ;;  %480 = vst.msk [vmem:[#allocation2 + $0x10] sm:$0xff] %vm477_vm3, %v434_v9 }
  0xd0   : > { %749 = vrot.lane.b32.xlu1 %v3622_v18, %s3473_s27  ;;  %747 = vrot.lane.b32.xlu0 %v3636_v21, %s3473_s27 }
  0xd2   : > { %v440_v14 = vpop.permute.xlu1 %439  ;;  %v438_v13 = vpop.permute.xlu0 %437 }
  0xd3   : > { %483 = vst.msk [vmem:[#allocation2 + $0x28] sm:$0xff] %vm477_vm3, %v440_v14  ;;  %482 = vst.msk [vmem:[#allocation2 + $0x20] sm:$0xff] %vm477_vm3, %v438_v13  ;;  %v5186_v14 = vld [vmem:[#allocation5_spill] sm:$0xff]  ;;  %v5187_v13 = vld [vmem:[#allocation6_spill] sm:$0xff] }
  0xd4   : > { %753 = vrot.lane.b32.xlu1 %v3989_v10, %s3473_s27  ;;  %751 = vrot.lane.b32.xlu0 %v3992_v11, %s3473_s27 }
  0xd6   : > { %v444_v15 = vpop.permute.xlu1 %443  ;;  %v442_v18 = vpop.permute.xlu0 %441 }
  0xd7   : > { %485 = vst.msk [vmem:[#allocation2 + $0x38] sm:$0xff] %vm477_vm3, %v444_v15  ;;  %484 = vst.msk [vmem:[#allocation2 + $0x30] sm:$0xff] %vm477_vm3, %v442_v18 }
  0xd8   : > { %822 = vrot.lane.b32.xlu1 %v3699_v34, %s3474_s28  ;;  %820 = vrot.lane.b32.xlu0 %v3702_v35, %s3474_s28 }
  0xda   : > { %v448_v21 = vpop.permute.xlu1 %447  ;;  %v446_v49 = vpop.permute.xlu0 %445 }
  0xdb   : > { %487 = vst.msk [vmem:[#allocation2 + $0x48] sm:$0xff] %vm477_vm3, %v448_v21  ;;  %486 = vst.msk [vmem:[#allocation2 + $0x40] sm:$0xff] %vm477_vm3, %v446_v49  ;;  %v5188_v21 = vld [vmem:[#allocation7_spill] sm:$0xff]  ;;  %v5189_v49 = vld [vmem:[#allocation8_spill] sm:$0xff] }
  0xdc   : > { %826 = vrot.lane.b32.xlu1 %v3707_v36, %s3474_s28  ;;  %824 = vrot.lane.b32.xlu0 %v3710_v37, %s3474_s28 }
  0xde   : > { %v452_v12 = vpop.permute.xlu1 %451  ;;  %v450_v16 = vpop.permute.xlu0 %449 }
  0xdf   : > { %489 = vst.msk [vmem:[#allocation2 + $0x58] sm:$0xff] %vm477_vm3, %v452_v12  ;;  %488 = vst.msk [vmem:[#allocation2 + $0x50] sm:$0xff] %vm477_vm3, %v450_v16 }
  0xe0   : > { %830 = vrot.lane.b32.xlu1 %v3715_v38, %s3474_s28  ;;  %828 = vrot.lane.b32.xlu0 %v3718_v39, %s3474_s28 }
  0xe2   : > { %v456_v34 = vpop.permute.xlu1 %455  ;;  %v454_v35 = vpop.permute.xlu0 %453 }
  0xe3   : > { %491 = vst.msk [vmem:[#allocation2 + $0x68] sm:$0xff] %vm477_vm3, %v456_v34  ;;  %490 = vst.msk [vmem:[#allocation2 + $0x60] sm:$0xff] %vm477_vm3, %v454_v35  ;;  %v5190_v34 = vld [vmem:[#allocation9_spill] sm:$0xff]  ;;  %v5191_v35 = vld [vmem:[#allocation10_spill] sm:$0xff] }
  0xe4   : > { %834 = vrot.lane.b32.xlu1 %v3723_v40, %s3474_s28  ;;  %832 = vrot.lane.b32.xlu0 %v3726_v41, %s3474_s28 }
  0xe6   : > { %v460_v36 = vpop.permute.xlu1 %459  ;;  %v458_v37 = vpop.permute.xlu0 %457 }
  0xe7   : > { %493 = vst.msk [vmem:[#allocation2 + $0x78] sm:$0xff] %vm477_vm3, %v460_v36  ;;  %492 = vst.msk [vmem:[#allocation2 + $0x70] sm:$0xff] %vm477_vm3, %v458_v37  ;;  %vm1941_vm3 = vcmask 622144  }
  0xe8   : > { %838 = vrot.lane.b32.xlu1 %v3731_v42, %s3474_s28  ;;  %836 = vrot.lane.b32.xlu0 %v3734_v43, %s3474_s28  ;;  %v4043_v42 = vld [vmem:[%s3546_s21 + $0xca] sm:$0xff]  ;;  %v4046_v43 = vld [vmem:[%s3546_s21 + $0xc2] sm:$0xff] }
  0xea   : > { %v529_v38 = vpop.permute.xlu1 %528  ;;  %v527_v39 = vpop.permute.xlu0 %526 }
  0xeb   : > { %576 = vst.msk [vmem:[#allocation2 + $0x8] sm:$0xff] %vm574_vm4, %v529_v38  ;;  %575 = vst.msk [vmem:[#allocation2] sm:$0xff] %vm574_vm4, %v527_v39  ;;  %v5192_v38 = vld [vmem:[#allocation11_spill] sm:$0xff]  ;;  %v5193_v39 = vld [vmem:[#allocation12_spill] sm:$0xff] }
  0xec   : > { %842 = vrot.lane.b32.xlu1 %v3739_v44, %s3474_s28  ;;  %840 = vrot.lane.b32.xlu0 %v3742_v45, %s3474_s28 }
  0xee   : > { %v533_v40 = vpop.permute.xlu1 %532  ;;  %v531_v41 = vpop.permute.xlu0 %530 }
  0xef   : > { %578 = vst.msk [vmem:[#allocation2 + $0x18] sm:$0xff] %vm574_vm4, %v533_v40  ;;  %577 = vst.msk [vmem:[#allocation2 + $0x10] sm:$0xff] %vm574_vm4, %v531_v41 }
  0xf0   : > { %846 = vrot.lane.b32.xlu1 %v3747_v46, %s3474_s28  ;;  %844 = vrot.lane.b32.xlu0 %v3750_v47, %s3474_s28 }
  0xf2   : > { %v537_v44 = vpop.permute.xlu1 %536  ;;  %v535_v0 = vpop.permute.xlu0 %534 }
  0xf3   : > { %580 = vst.msk [vmem:[#allocation2 + $0x28] sm:$0xff] %vm574_vm4, %v537_v44  ;;  %579 = vst.msk [vmem:[#allocation2 + $0x20] sm:$0xff] %vm574_vm4, %v535_v0 }
  0xf4   : > { %850 = vrot.lane.b32.xlu1 %v4043_v42, %s3474_s28  ;;  %848 = vrot.lane.b32.xlu0 %v4046_v43, %s3474_s28 }
  0xf6   : > { %v541_v45 = vpop.permute.xlu1 %540  ;;  %v539_v46 = vpop.permute.xlu0 %538 }
  0xf7   : > { %582 = vst.msk [vmem:[#allocation2 + $0x38] sm:$0xff] %vm574_vm4, %v541_v45  ;;  %581 = vst.msk [vmem:[#allocation2 + $0x30] sm:$0xff] %vm574_vm4, %v539_v46  ;;  %v4151_v45 = vld [vmem:[%s3546_s21 + $0xcc] sm:$0xff]  ;;  %v4154_v46 = vld [vmem:[%s3546_s21 + $0xc4] sm:$0xff] }
  0xf8   : > { %919 = vrot.lane.b32.xlu1 %v3757_v50, %s3475_s29  ;;  %917 = vrot.lane.b32.xlu0 %v3760_v51, %s3475_s29 }
  0xfa   : > { %v545_v47 = vpop.permute.xlu1 %544  ;;  %v543_v2 = vpop.permute.xlu0 %542 }
  0xfb   : > { %584 = vst.msk [vmem:[#allocation2 + $0x48] sm:$0xff] %vm574_vm4, %v545_v47  ;;  %583 = vst.msk [vmem:[#allocation2 + $0x40] sm:$0xff] %vm574_vm4, %v543_v2 }
  0xfc   : > { %923 = vrot.lane.b32.xlu1 %v3765_v52, %s3475_s29  ;;  %921 = vrot.lane.b32.xlu0 %v3768_v53, %s3475_s29 }
  0xfe   : > { %v549_v4 = vpop.permute.xlu1 %548  ;;  %v547_v5 = vpop.permute.xlu0 %546 }
  0xff   : > { %586 = vst.msk [vmem:[#allocation2 + $0x58] sm:$0xff] %vm574_vm4, %v549_v4  ;;  %585 = vst.msk [vmem:[#allocation2 + $0x50] sm:$0xff] %vm574_vm4, %v547_v5 }
 0x100   : > { %927 = vrot.lane.b32.xlu1 %v3773_v54, %s3475_s29  ;;  %925 = vrot.lane.b32.xlu0 %v3776_v55, %s3475_s29 }
 0x102   : > { %v553_v50 = vpop.permute.xlu1 %552  ;;  %v551_v51 = vpop.permute.xlu0 %550 }
 0x103   : > { %588 = vst.msk [vmem:[#allocation2 + $0x68] sm:$0xff] %vm574_vm4, %v553_v50  ;;  %587 = vst.msk [vmem:[#allocation2 + $0x60] sm:$0xff] %vm574_vm4, %v551_v51 }
 0x104   : > { %931 = vrot.lane.b32.xlu1 %v3781_v56, %s3475_s29  ;;  %929 = vrot.lane.b32.xlu0 %v3784_v57, %s3475_s29 }
 0x106   : > { %v557_v52 = vpop.permute.xlu1 %556  ;;  %v555_v53 = vpop.permute.xlu0 %554 }
 0x107   : > { %590 = vst.msk [vmem:[#allocation2 + $0x78] sm:$0xff] %vm574_vm4, %v557_v52  ;;  %589 = vst.msk [vmem:[#allocation2 + $0x70] sm:$0xff] %vm574_vm4, %v555_v53  ;;  %v4223_v52 = vld [vmem:[%s3546_s21 + $0x51] sm:$0xff]  ;;  %v4226_v53 = vld [vmem:[%s3546_s21 + $0x49] sm:$0xff]  ;;  %vm2038_vm4 = vcmask 654944  }
 0x108   : > { %935 = vrot.lane.b32.xlu1 %v3789_v58, %s3475_s29  ;;  %933 = vrot.lane.b32.xlu0 %v3792_v59, %s3475_s29  ;;  %v4097_v58 = vld [vmem:[%s3546_s21 + $0xcb] sm:$0xff]  ;;  %v4100_v59 = vld [vmem:[%s3546_s21 + $0xc3] sm:$0xff] }
 0x10a   : > { %v629_v54 = vpop.permute.xlu1 %628  ;;  %v627_v55 = vpop.permute.xlu0 %626 }
 0x10b   : > { %676 = vst.msk [vmem:[#allocation2 + $0x8] sm:$0xff] %vm674_vm5, %v629_v54  ;;  %675 = vst.msk [vmem:[#allocation2] sm:$0xff] %vm674_vm5, %v627_v55 }
 0x10c   : > { %939 = vrot.lane.b32.xlu1 %v3797_v60, %s3475_s29  ;;  %937 = vrot.lane.b32.xlu0 %v3800_v61, %s3475_s29 }
 0x10e   : > { %v633_v56 = vpop.permute.xlu1 %632  ;;  %v631_v57 = vpop.permute.xlu0 %630 }
 0x10f   : > { %678 = vst.msk [vmem:[#allocation2 + $0x18] sm:$0xff] %vm674_vm5, %v633_v56  ;;  %677 = vst.msk [vmem:[#allocation2 + $0x10] sm:$0xff] %vm674_vm5, %v631_v57  ;;  %v4235_v56 = vld [vmem:[%s3546_s21 + $0x69] sm:$0xff]  ;;  %v4238_v57 = vld [vmem:[%s3546_s21 + $0x61] sm:$0xff] }
 0x110   : > { %943 = vrot.lane.b32.xlu1 %v3805_v62, %s3475_s29  ;;  %941 = vrot.lane.b32.xlu0 %v3808_v63, %s3475_s29  ;;  %v5184_v63 = vld [vmem:[#allocation3_spill] sm:$0xff] }
 0x112   : > { %v637_v60 = vpop.permute.xlu1 %636  ;;  %v635_v6 = vpop.permute.xlu0 %634 }
 0x113   : > { %680 = vst.msk [vmem:[#allocation2 + $0x28] sm:$0xff] %vm674_vm5, %v637_v60  ;;  %679 = vst.msk [vmem:[#allocation2 + $0x20] sm:$0xff] %vm674_vm5, %v635_v6 }
 0x114   : > { %947 = vrot.lane.b32.xlu1 %v4097_v58, %s3475_s29  ;;  %945 = vrot.lane.b32.xlu0 %v4100_v59, %s3475_s29 }
 0x116   : > { %v641_v61 = vpop.permute.xlu1 %640  ;;  %v639_v62 = vpop.permute.xlu0 %638 }
 0x117   : > { %682 = vst.msk [vmem:[#allocation2 + $0x38] sm:$0xff] %vm674_vm5, %v641_v61  ;;  %681 = vst.msk [vmem:[#allocation2 + $0x30] sm:$0xff] %vm674_vm5, %v639_v62  ;;  %v3006_v61 = vld [vmem:[%s3546_s21 + $0x81] sm:$0xff]  ;;  %v4248_v62 = vld [vmem:[%s3546_s21 + $0x79] sm:$0xff] }
 0x118   : > { %1016 = vrot.lane.b32.xlu1 %v5184_v63, %s3476_s30  ;;  %1014 = vrot.lane.b32.xlu0 %v5185_v7, %s3476_s30 }
 0x11a   : > { %v645_v8 = vpop.permute.xlu1 %644  ;;  %v643_v9 = vpop.permute.xlu0 %642 }
 0x11b   : > { %684 = vst.msk [vmem:[#allocation2 + $0x48] sm:$0xff] %vm674_vm5, %v645_v8  ;;  %683 = vst.msk [vmem:[#allocation2 + $0x40] sm:$0xff] %vm674_vm5, %v643_v9  ;;  %v3008_v8 = vld [vmem:[%s3546_s21 + $0x99] sm:$0xff]  ;;  %v3007_v9 = vld [vmem:[%s3546_s21 + $0x91] sm:$0xff] }
 0x11c   : > { %1020 = vrot.lane.b32.xlu1 %v5186_v14, %s3476_s30  ;;  %1018 = vrot.lane.b32.xlu0 %v5187_v13, %s3476_s30 }
 0x11e   : > { %v649_v15 = vpop.permute.xlu1 %648  ;;  %v647_v18 = vpop.permute.xlu0 %646 }
 0x11f   : > { %686 = vst.msk [vmem:[#allocation2 + $0x58] sm:$0xff] %vm674_vm5, %v649_v15  ;;  %685 = vst.msk [vmem:[#allocation2 + $0x50] sm:$0xff] %vm674_vm5, %v647_v18  ;;  %v4262_v15 = vld [vmem:[%s3546_s21 + $0xb1] sm:$0xff]  ;;  %v4265_v18 = vld [vmem:[%s3546_s21 + $0xa9] sm:$0xff] }
 0x120   : > { %1024 = vrot.lane.b32.xlu1 %v5188_v21, %s3476_s30  ;;  %1022 = vrot.lane.b32.xlu0 %v5189_v49, %s3476_s30 }
 0x122   : > { %v653_v12 = vpop.permute.xlu1 %652  ;;  %v651_v16 = vpop.permute.xlu0 %650 }
 0x123   : > { %688 = vst.msk [vmem:[#allocation2 + $0x68] sm:$0xff] %vm674_vm5, %v653_v12  ;;  %687 = vst.msk [vmem:[#allocation2 + $0x60] sm:$0xff] %vm674_vm5, %v651_v16 }
 0x124   : > { %1028 = vrot.lane.b32.xlu1 %v5190_v34, %s3476_s30  ;;  %1026 = vrot.lane.b32.xlu0 %v5191_v35, %s3476_s30  ;;  %v4280_v34 = vld [vmem:[%s3546_s21 + $0xe1] sm:$0xff]  ;;  %v4283_v35 = vld [vmem:[%s3546_s21 + $0xd9] sm:$0xff] }
 0x126   : > { %v657_v36 = vpop.permute.xlu1 %656  ;;  %v655_v37 = vpop.permute.xlu0 %654 }
 0x127   : > { %690 = vst.msk [vmem:[#allocation2 + $0x78] sm:$0xff] %vm674_vm5, %v657_v36  ;;  %689 = vst.msk [vmem:[#allocation2 + $0x70] sm:$0xff] %vm674_vm5, %v655_v37  ;;  %vm2138_vm5 = vcmask 687744  }
 0x128   : > { %1032 = vrot.lane.b32.xlu1 %v5192_v38, %s3476_s30  ;;  %1030 = vrot.lane.b32.xlu0 %v5193_v39, %s3476_s30 }
 0x12a   : > { %v726_v40 = vpop.permute.xlu1 %725  ;;  %v724_v41 = vpop.permute.xlu0 %723 }
 0x12b   : > { %773 = vst.msk [vmem:[#allocation2 + $0x8] sm:$0xff] %vm771_vm6, %v726_v40  ;;  %772 = vst.msk [vmem:[#allocation2] sm:$0xff] %vm771_vm6, %v724_v41  ;;  %v4298_v40 = vld [vmem:[%s3546_s21 + $0x52] sm:$0xff]  ;;  %v4301_v41 = vld [vmem:[%s3546_s21 + $0x4a] sm:$0xff] }
 0x12c   : > { %1036 = vrot.lane.b32.xlu1 %v3869_v3, %s3476_s30  ;;  %1034 = vrot.lane.b32.xlu0 %v3872_v1, %s3476_s30 }
 0x12e   : > { %v730_v44 = vpop.permute.xlu1 %729  ;;  %v728_v0 = vpop.permute.xlu0 %727 }
 0x12f   : > { %775 = vst.msk [vmem:[#allocation2 + $0x18] sm:$0xff] %vm771_vm6, %v730_v44  ;;  %774 = vst.msk [vmem:[#allocation2 + $0x10] sm:$0xff] %vm771_vm6, %v728_v0 }
 0x130   : > { %1040 = vrot.lane.b32.xlu1 %v3881_v17, %s3476_s30  ;;  %1038 = vrot.lane.b32.xlu0 %v3884_v48, %s3476_s30 }
 0x132   : > { %v734_v3 = vpop.permute.xlu1 %733  ;;  %v732_v47 = vpop.permute.xlu0 %731 }
 0x133   : > { %777 = vst.msk [vmem:[#allocation2 + $0x28] sm:$0xff] %vm771_vm6, %v734_v3  ;;  %776 = vst.msk [vmem:[#allocation2 + $0x20] sm:$0xff] %vm771_vm6, %v732_v47  ;;  %v4310_v3 = vld [vmem:[%s3546_s21 + $0x6a] sm:$0xff]  ;;  %v4313_v47 = vld [vmem:[%s3546_s21 + $0x62] sm:$0xff] }
 0x134   : > { %1044 = vrot.lane.b32.xlu1 %v4151_v45, %s3476_s30  ;;  %1042 = vrot.lane.b32.xlu0 %v4154_v46, %s3476_s30  ;;  %s3491_s30 = smov 96  }
 0x136   : > { %v738_v1 = vpop.permute.xlu1 %737  ;;  %v736_v17 = vpop.permute.xlu0 %735 }
 0x137   : > { %779 = vst.msk [vmem:[#allocation2 + $0x38] sm:$0xff] %vm771_vm6, %v738_v1  ;;  %778 = vst.msk [vmem:[#allocation2 + $0x30] sm:$0xff] %vm771_vm6, %v736_v17 }
 0x138   : > { %1116 = vrot.lane.b32.xlu1 %v3626_v19, %s3477_s3  ;;  %1114 = vrot.lane.b32.xlu0 %v3629_v20, %s3477_s3 }
 0x13a   : > { %v742_v48 = vpop.permute.xlu1 %741  ;;  %v740_v2 = vpop.permute.xlu0 %739 }
 0x13b   : > { %781 = vst.msk [vmem:[#allocation2 + $0x48] sm:$0xff] %vm771_vm6, %v742_v48  ;;  %780 = vst.msk [vmem:[#allocation2 + $0x40] sm:$0xff] %vm771_vm6, %v740_v2  ;;  %v4322_v48 = vld [vmem:[%s3546_s21 + $0x82] sm:$0xff]  ;;  %v4325_v2 = vld [vmem:[%s3546_s21 + $0x7a] sm:$0xff] }
 0x13c   : > { %1120 = vrot.lane.b32.xlu1 %v3643_v22, %s3477_s3  ;;  %1118 = vrot.lane.b32.xlu0 %v3648_v23, %s3477_s3 }
 0x13e   : > { %v746_v4 = vpop.permute.xlu1 %745  ;;  %v744_v5 = vpop.permute.xlu0 %743 }
 0x13f   : > { %783 = vst.msk [vmem:[#allocation2 + $0x58] sm:$0xff] %vm771_vm6, %v746_v4  ;;  %782 = vst.msk [vmem:[#allocation2 + $0x50] sm:$0xff] %vm771_vm6, %v744_v5 }
 0x140   : > { %1124 = vrot.lane.b32.xlu1 %v3651_v24, %s3477_s3  ;;  %1122 = vrot.lane.b32.xlu0 %v3654_v25, %s3477_s3 }
 0x142   : > { %v750_v19 = vpop.permute.xlu1 %749  ;;  %v748_v20 = vpop.permute.xlu0 %747 }
 0x143   : > { %785 = vst.msk [vmem:[#allocation2 + $0x68] sm:$0xff] %vm771_vm6, %v750_v19  ;;  %784 = vst.msk [vmem:[#allocation2 + $0x60] sm:$0xff] %vm771_vm6, %v748_v20  ;;  %v3024_v19 = vld [vmem:[%s3546_s21 + $0x9a] sm:$0xff]  ;;  %v3023_v20 = vld [vmem:[%s3546_s21 + $0x92] sm:$0xff] }
 0x144   : > { %1128 = vrot.lane.b32.xlu1 %v3663_v26, %s3477_s3  ;;  %1126 = vrot.lane.b32.xlu0 %v3666_v27, %s3477_s3 }
 0x146   : > { %v754_v22 = vpop.permute.xlu1 %753  ;;  %v752_v23 = vpop.permute.xlu0 %751 }
 0x147   : > { %787 = vst.msk [vmem:[#allocation2 + $0x78] sm:$0xff] %vm771_vm6, %v754_v22  ;;  %786 = vst.msk [vmem:[#allocation2 + $0x70] sm:$0xff] %vm771_vm6, %v752_v23  ;;  %vm2235_vm6 = vcmask 720544  }
 0x148   : > { %1132 = vrot.lane.b32.xlu1 %v3669_v28, %s3477_s3  ;;  %1130 = vrot.lane.b32.xlu0 %v3678_v29, %s3477_s3  ;;  %v4205_v28 = vld [vmem:[%s3546_s21 + $0xe0] sm:$0xff]  ;;  %v4208_v29 = vld [vmem:[%s3546_s21 + $0xd8] sm:$0xff] }
 0x14a   : > { %v823_v24 = vpop.permute.xlu1 %822  ;;  %v821_v25 = vpop.permute.xlu0 %820 }
 0x14b   : > { %870 = vst.msk [vmem:[#allocation2 + $0x8] sm:$0xff] %vm868_vm7, %v823_v24  ;;  %869 = vst.msk [vmem:[#allocation2] sm:$0xff] %vm868_vm7, %v821_v25  ;;  %v4340_v24 = vld [vmem:[%s3546_s21 + $0xb2] sm:$0xff]  ;;  %v4343_v25 = vld [vmem:[%s3546_s21 + $0xaa] sm:$0xff] }
 0x14c   : > { %1136 = vrot.lane.b32.xlu1 %v3681_v30, %s3477_s3  ;;  %1134 = vrot.lane.b32.xlu0 %v3684_v31, %s3477_s3 }
 0x14e   : > { %v827_v26 = vpop.permute.xlu1 %826  ;;  %v825_v27 = vpop.permute.xlu0 %824 }
 0x14f   : > { %872 = vst.msk [vmem:[#allocation2 + $0x18] sm:$0xff] %vm868_vm7, %v827_v26  ;;  %871 = vst.msk [vmem:[#allocation2 + $0x10] sm:$0xff] %vm868_vm7, %v825_v27 }
 0x150   : > { %1140 = vrot.lane.b32.xlu1 %v3935_v32, %s3477_s3  ;;  %1138 = vrot.lane.b32.xlu0 %v3938_v33, %s3477_s3  ;;  %v3000_v32 = vld [vmem:[%s3546_s21 + $0x39] sm:$0xff]  ;;  %v2999_v33 = vld [vmem:[%s3546_s21 + $0x31] sm:$0xff] }
 0x152   : > { %v831_v30 = vpop.permute.xlu1 %830  ;;  %v829_v31 = vpop.permute.xlu0 %828 }
 0x153   : > { %874 = vst.msk [vmem:[#allocation2 + $0x28] sm:$0xff] %vm868_vm7, %v831_v30  ;;  %873 = vst.msk [vmem:[#allocation2 + $0x20] sm:$0xff] %vm868_vm7, %v829_v31 }
 0x154   : > { %1144 = vrot.lane.b32.xlu1 %v4205_v28, %s3477_s3  ;;  %1142 = vrot.lane.b32.xlu0 %v4208_v29, %s3477_s3 }
 0x156   : > { %v835_v50 = vpop.permute.xlu1 %834  ;;  %v833_v51 = vpop.permute.xlu0 %832 }
 0x157   : > { %876 = vst.msk [vmem:[#allocation2 + $0x38] sm:$0xff] %vm868_vm7, %v835_v50  ;;  %875 = vst.msk [vmem:[#allocation2 + $0x30] sm:$0xff] %vm868_vm7, %v833_v51 }
 0x158   : > { %1213 = vrot.lane.b32.xlu1 %v3000_v32, %s3478_s4  ;;  %1211 = vrot.lane.b32.xlu0 %v2999_v33, %s3478_s4  ;;  %v4358_v32 = vld [vmem:[%s3546_s21 + $0xe2] sm:$0xff]  ;;  %v4361_v33 = vld [vmem:[%s3546_s21 + $0xda] sm:$0xff] }
 0x15a   : > { %v839_v54 = vpop.permute.xlu1 %838  ;;  %v837_v55 = vpop.permute.xlu0 %836 }
 0x15b   : > { %878 = vst.msk [vmem:[#allocation2 + $0x48] sm:$0xff] %vm868_vm7, %v839_v54  ;;  %877 = vst.msk [vmem:[#allocation2 + $0x40] sm:$0xff] %vm868_vm7, %v837_v55 }
 0x15c   : > { %1217 = vrot.lane.b32.xlu1 %v4223_v52, %s3478_s4  ;;  %1215 = vrot.lane.b32.xlu0 %v4226_v53, %s3478_s4 }
 0x15e   : > { %v843_v60 = vpop.permute.xlu1 %842  ;;  %v841_v6 = vpop.permute.xlu0 %840 }
 0x15f   : > { %880 = vst.msk [vmem:[#allocation2 + $0x58] sm:$0xff] %vm868_vm7, %v843_v60  ;;  %879 = vst.msk [vmem:[#allocation2 + $0x50] sm:$0xff] %vm868_vm7, %v841_v6  ;;  %v4376_v60 = vld [vmem:[%s3546_s21 + $0x53] sm:$0xff]  ;;  %v4379_v6 = vld [vmem:[%s3546_s21 + $0x4b] sm:$0xff] }
 0x160   : > { %1221 = vrot.lane.b32.xlu1 %v4235_v56, %s3478_s4  ;;  %1219 = vrot.lane.b32.xlu0 %v4238_v57, %s3478_s4 }
 0x162   : > { %v847_v63 = vpop.permute.xlu1 %846  ;;  %v845_v7 = vpop.permute.xlu0 %844 }
 0x163   : > { %882 = vst.msk [vmem:[#allocation2 + $0x68] sm:$0xff] %vm868_vm7, %v847_v63  ;;  %881 = vst.msk [vmem:[#allocation2 + $0x60] sm:$0xff] %vm868_vm7, %v845_v7  ;;  %v4388_v7 = vld [vmem:[%s3546_s21 + $0x6b] sm:$0xff] }
 0x164   : > { %1225 = vrot.lane.b32.xlu1 %v3006_v61, %s3478_s4  ;;  %1223 = vrot.lane.b32.xlu0 %v4248_v62, %s3478_s4 }
 0x166   : > { %v851_v14 = vpop.permute.xlu1 %850  ;;  %v849_v13 = vpop.permute.xlu0 %848 }
 0x167   : > { %884 = vst.msk [vmem:[#allocation2 + $0x78] sm:$0xff] %vm868_vm7, %v851_v14  ;;  %883 = vst.msk [vmem:[#allocation2 + $0x70] sm:$0xff] %vm868_vm7, %v849_v13  ;;  %v4400_v13 = vld [vmem:[%s3546_s21 + $0x83] sm:$0xff]  ;;  %vm2332_vm7 = vcmask 753344  }
 0x168   : > { %1229 = vrot.lane.b32.xlu1 %v3008_v8, %s3478_s4  ;;  %1227 = vrot.lane.b32.xlu0 %v3007_v9, %s3478_s4  ;;  %v4391_v8 = vld [vmem:[%s3546_s21 + $0x63] sm:$0xff] }
 0x16a   : > { %v920_v21 = vpop.permute.xlu1 %919  ;;  %v918_v49 = vpop.permute.xlu0 %917 }
 0x16b   : > { %967 = vst.msk [vmem:[#allocation2 + $0x8] sm:$0xff] %vm965_vm8, %v920_v21  ;;  %966 = vst.msk [vmem:[#allocation2] sm:$0xff] %vm965_vm8, %v918_v49  ;;  %v4403_v21 = vld [vmem:[%s3546_s21 + $0x7b] sm:$0xff] }
 0x16c   : > { %1233 = vrot.lane.b32.xlu1 %v4262_v15, %s3478_s4  ;;  %1231 = vrot.lane.b32.xlu0 %v4265_v18, %s3478_s4 }
 0x16e   : > { %v924_v12 = vpop.permute.xlu1 %923  ;;  %v922_v16 = vpop.permute.xlu0 %921 }
 0x16f   : > { %969 = vst.msk [vmem:[#allocation2 + $0x18] sm:$0xff] %vm965_vm8, %v924_v12  ;;  %968 = vst.msk [vmem:[#allocation2 + $0x10] sm:$0xff] %vm965_vm8, %v922_v16  ;;  %v3040_v16 = vld [vmem:[%s3546_s21 + $0x9b] sm:$0xff] }
 0x170   : > { %1237 = vrot.lane.b32.xlu1 %v3989_v10, %s3478_s4  ;;  %1235 = vrot.lane.b32.xlu0 %v3992_v11, %s3478_s4  ;;  %v3016_v10 = vld [vmem:[%s3546_s21 + $0x3a] sm:$0xff]  ;;  %v3015_v11 = vld [vmem:[%s3546_s21 + $0x32] sm:$0xff] }
 0x172   : > { %v928_v36 = vpop.permute.xlu1 %927  ;;  %v926_v37 = vpop.permute.xlu0 %925 }
 0x173   : > { %971 = vst.msk [vmem:[#allocation2 + $0x28] sm:$0xff] %vm965_vm8, %v928_v36  ;;  %970 = vst.msk [vmem:[#allocation2 + $0x20] sm:$0xff] %vm965_vm8, %v926_v37  ;;  %v3039_v36 = vld [vmem:[%s3546_s21 + $0x93] sm:$0xff] }
 0x174   : > { %1241 = vrot.lane.b32.xlu1 %v4280_v34, %s3478_s4  ;;  %1239 = vrot.lane.b32.xlu0 %v4283_v35, %s3478_s4 }
 0x176   : > { %v932_v38 = vpop.permute.xlu1 %931  ;;  %v930_v39 = vpop.permute.xlu0 %929 }
 0x177   : > { %973 = vst.msk [vmem:[#allocation2 + $0x38] sm:$0xff] %vm965_vm8, %v932_v38  ;;  %972 = vst.msk [vmem:[#allocation2 + $0x30] sm:$0xff] %vm965_vm8, %v930_v39  ;;  %v4421_v38 = vld [vmem:[%s3546_s21 + $0xab] sm:$0xff] }
 0x178   : > { %1310 = vrot.lane.b32.xlu1 %v3016_v10, %s3479_s5  ;;  %1308 = vrot.lane.b32.xlu0 %v3015_v11, %s3479_s5  ;;  %v4418_v11 = vld [vmem:[%s3546_s21 + $0xb3] sm:$0xff] }
 0x17a   : > { %v936_v44 = vpop.permute.xlu1 %935  ;;  %v934_v0 = vpop.permute.xlu0 %933 }
 0x17b   : > { %975 = vst.msk [vmem:[#allocation2 + $0x48] sm:$0xff] %vm965_vm8, %v936_v44  ;;  %974 = vst.msk [vmem:[#allocation2 + $0x40] sm:$0xff] %vm965_vm8, %v934_v0 }
 0x17c   : > { %1314 = vrot.lane.b32.xlu1 %v4298_v40, %s3479_s5  ;;  %1312 = vrot.lane.b32.xlu0 %v4301_v41, %s3479_s5 }
 0x17e   : > { %v940_v1 = vpop.permute.xlu1 %939  ;;  %v938_v17 = vpop.permute.xlu0 %937 }
 0x17f   : > { %977 = vst.msk [vmem:[#allocation2 + $0x58] sm:$0xff] %vm965_vm8, %v940_v1  ;;  %976 = vst.msk [vmem:[#allocation2 + $0x50] sm:$0xff] %vm965_vm8, %v938_v17  ;;  %v4436_v17 = vld [vmem:[%s3546_s21 + $0xe3] sm:$0xff] }
 0x180   : > { %1318 = vrot.lane.b32.xlu1 %v4310_v3, %s3479_s5  ;;  %1316 = vrot.lane.b32.xlu0 %v4313_v47, %s3479_s5 }
 0x182   : > { %v944_v4 = vpop.permute.xlu1 %943  ;;  %v942_v5 = vpop.permute.xlu0 %941 }
 0x183   : > { %979 = vst.msk [vmem:[#allocation2 + $0x68] sm:$0xff] %vm965_vm8, %v944_v4  ;;  %978 = vst.msk [vmem:[#allocation2 + $0x60] sm:$0xff] %vm965_vm8, %v942_v5  ;;  %v4439_v4 = vld [vmem:[%s3546_s21 + $0xdb] sm:$0xff] }
 0x184   : > { %1322 = vrot.lane.b32.xlu1 %v4322_v48, %s3479_s5  ;;  %1320 = vrot.lane.b32.xlu0 %v4325_v2, %s3479_s5 }
 0x186   : > { %v948_v22 = vpop.permute.xlu1 %947  ;;  %v946_v23 = vpop.permute.xlu0 %945 }
 0x187   : > { %981 = vst.msk [vmem:[#allocation2 + $0x78] sm:$0xff] %vm965_vm8, %v948_v22  ;;  %980 = vst.msk [vmem:[#allocation2 + $0x70] sm:$0xff] %vm965_vm8, %v946_v23  ;;  %v4454_v23 = vld [vmem:[%s3546_s21 + $0x54] sm:$0xff]  ;;  %vm2429_vm8 = vcmask 786144  }
 0x188   : > { %1326 = vrot.lane.b32.xlu1 %v3024_v19, %s3479_s5  ;;  %1324 = vrot.lane.b32.xlu0 %v3023_v20, %s3479_s5 }
 0x18a   : > { %v1017_v26 = vpop.permute.xlu1 %1016  ;;  %v1015_v27 = vpop.permute.xlu0 %1014 }
 0x18b   : > { %1064 = vst.msk [vmem:[#allocation2 + $0x8] sm:$0xff] %vm1062_vm9, %v1017_v26  ;;  %1063 = vst.msk [vmem:[#allocation2] sm:$0xff] %vm1062_vm9, %v1015_v27  ;;  %v4457_v26 = vld [vmem:[%s3546_s21 + $0x4c] sm:$0xff] }
 0x18c   : > { %1330 = vrot.lane.b32.xlu1 %v4340_v24, %s3479_s5  ;;  %1328 = vrot.lane.b32.xlu0 %v4343_v25, %s3479_s5 }
 0x18e   : > { %v1021_v30 = vpop.permute.xlu1 %1020  ;;  %v1019_v31 = vpop.permute.xlu0 %1018 }
 0x18f   : > { %1066 = vst.msk [vmem:[#allocation2 + $0x18] sm:$0xff] %vm1062_vm9, %v1021_v30  ;;  %1065 = vst.msk [vmem:[#allocation2 + $0x10] sm:$0xff] %vm1062_vm9, %v1019_v31  ;;  %v4466_v31 = vld [vmem:[%s3546_s21 + $0x6c] sm:$0xff] }
 0x190   : > { %1334 = vrot.lane.b32.xlu1 %v4043_v42, %s3479_s5  ;;  %1332 = vrot.lane.b32.xlu0 %v4046_v43, %s3479_s5  ;;  %v3032_v42 = vld [vmem:[%s3546_s21 + $0x3b] sm:$0xff]  ;;  %v3031_v43 = vld [vmem:[%s3546_s21 + $0x33] sm:$0xff] }
 0x192   : > { %v1025_v50 = vpop.permute.xlu1 %1024  ;;  %v1023_v51 = vpop.permute.xlu0 %1022 }
 0x193   : > { %1068 = vst.msk [vmem:[#allocation2 + $0x28] sm:$0xff] %vm1062_vm9, %v1025_v50  ;;  %1067 = vst.msk [vmem:[#allocation2 + $0x20] sm:$0xff] %vm1062_vm9, %v1023_v51  ;;  %v4469_v50 = vld [vmem:[%s3546_s21 + $0x64] sm:$0xff] }
 0x194   : > { %1338 = vrot.lane.b32.xlu1 %v4358_v32, %s3479_s5  ;;  %1336 = vrot.lane.b32.xlu0 %v4361_v33, %s3479_s5 }
 0x196   : > { %v1029_v54 = vpop.permute.xlu1 %1028  ;;  %v1027_v55 = vpop.permute.xlu0 %1026 }
 0x197   : > { %1070 = vst.msk [vmem:[#allocation2 + $0x38] sm:$0xff] %vm1062_vm9, %v1029_v54  ;;  %1069 = vst.msk [vmem:[#allocation2 + $0x30] sm:$0xff] %vm1062_vm9, %v1027_v55  ;;  %v4481_v54 = vld [vmem:[%s3546_s21 + $0x7c] sm:$0xff] }
 0x198   : > { %1407 = vrot.lane.b32.xlu1 %v3032_v42, %s3480_s6  ;;  %1405 = vrot.lane.b32.xlu0 %v3031_v43, %s3480_s6  ;;  %v4478_v43 = vld [vmem:[%s3546_s21 + $0x84] sm:$0xff] }
 0x19a   : > { %v1033_v61 = vpop.permute.xlu1 %1032  ;;  %v1031_v63 = vpop.permute.xlu0 %1030 }
 0x19b   : > { %1072 = vst.msk [vmem:[#allocation2 + $0x48] sm:$0xff] %vm1062_vm9, %v1033_v61  ;;  %1071 = vst.msk [vmem:[#allocation2 + $0x40] sm:$0xff] %vm1062_vm9, %v1031_v63  ;;  %v3056_v63 = vld [vmem:[%s3546_s21 + $0x9c] sm:$0xff] }
 0x19c   : > { %1411 = vrot.lane.b32.xlu1 %v4376_v60, %s3480_s6  ;;  %1409 = vrot.lane.b32.xlu0 %v4379_v6, %s3480_s6 }
 0x19e   : > { %v1037_v9 = vpop.permute.xlu1 %1036  ;;  %v1035_v14 = vpop.permute.xlu0 %1034 }
 0x19f   : > { %1074 = vst.msk [vmem:[#allocation2 + $0x58] sm:$0xff] %vm1062_vm9, %v1037_v9  ;;  %1073 = vst.msk [vmem:[#allocation2 + $0x50] sm:$0xff] %vm1062_vm9, %v1035_v14  ;;  %v3055_v9 = vld [vmem:[%s3546_s21 + $0x94] sm:$0xff] }
 0x1a0   : > { %1415 = vrot.lane.b32.xlu1 %v4388_v7, %s3480_s6  ;;  %1413 = vrot.lane.b32.xlu0 %v4391_v8, %s3480_s6 }
 0x1a2   : > { %v1041_v49 = vpop.permute.xlu1 %1040  ;;  %v1039_v12 = vpop.permute.xlu0 %1038 }
 0x1a3   : > { %1076 = vst.msk [vmem:[#allocation2 + $0x68] sm:$0xff] %vm1062_vm9, %v1041_v49  ;;  %1075 = vst.msk [vmem:[#allocation2 + $0x60] sm:$0xff] %vm1062_vm9, %v1039_v12  ;;  %v4496_v12 = vld [vmem:[%s3546_s21 + $0xb4] sm:$0xff] }
 0x1a4   : > { %1419 = vrot.lane.b32.xlu1 %v4400_v13, %s3480_s6  ;;  %1417 = vrot.lane.b32.xlu0 %v4403_v21, %s3480_s6 }
 0x1a6   : > { %v1045_v37 = vpop.permute.xlu1 %1044  ;;  %v1043_v10 = vpop.permute.xlu0 %1042 }
 0x1a7   : > { %1078 = vst.msk [vmem:[#allocation2 + $0x78] sm:$0xff] %vm1062_vm9, %v1045_v37  ;;  %1077 = vst.msk [vmem:[#allocation2 + $0x70] sm:$0xff] %vm1062_vm9, %v1043_v10  ;;  %vm2526_vm9 = vcmask 818944  }
 0x1a8   : > { %1423 = vrot.lane.b32.xlu1 %v3040_v16, %s3480_s6  ;;  %1421 = vrot.lane.b32.xlu0 %v3039_v36, %s3480_s6  ;;  %v4499_v16 = vld [vmem:[%s3546_s21 + $0xac] sm:$0xff] }
 0x1aa   : > { %v1117_v39 = vpop.permute.xlu1 %1116  ;;  %v1115_v44 = vpop.permute.xlu0 %1114 }
 0x1ab   : > { %1164 = vst.msk [vmem:[#allocation2 + $0x8] sm:$0xff] %vm1162_vm10, %v1117_v39  ;;  %1163 = vst.msk [vmem:[#allocation2] sm:$0xff] %vm1162_vm10, %v1115_v44  ;;  %v4514_v44 = vld [vmem:[%s3546_s21 + $0xe4] sm:$0xff] }
 0x1ac   : > { %1427 = vrot.lane.b32.xlu1 %v4418_v11, %s3480_s6  ;;  %1425 = vrot.lane.b32.xlu0 %v4421_v38, %s3480_s6 }
 0x1ae   : > { %v1121_v0 = vpop.permute.xlu1 %1120  ;;  %v1119_v1 = vpop.permute.xlu0 %1118 }
 0x1af   : > { %1166 = vst.msk [vmem:[#allocation2 + $0x18] sm:$0xff] %vm1162_vm10, %v1121_v0  ;;  %1165 = vst.msk [vmem:[#allocation2 + $0x10] sm:$0xff] %vm1162_vm10, %v1119_v1  ;;  %v4517_v0 = vld [vmem:[%s3546_s21 + $0xdc] sm:$0xff] }
 0x1b0   : > { %1431 = vrot.lane.b32.xlu1 %v4097_v58, %s3480_s6  ;;  %1429 = vrot.lane.b32.xlu0 %v4100_v59, %s3480_s6  ;;  %v3048_v58 = vld [vmem:[%s3546_s21 + $0x3c] sm:$0xff]  ;;  %v3047_v59 = vld [vmem:[%s3546_s21 + $0x34] sm:$0xff] }
 0x1b2   : > { %v1125_v5 = vpop.permute.xlu1 %1124  ;;  %v1123_v19 = vpop.permute.xlu0 %1122 }
 0x1b3   : > { %1168 = vst.msk [vmem:[#allocation2 + $0x28] sm:$0xff] %vm1162_vm10, %v1125_v5  ;;  %1167 = vst.msk [vmem:[#allocation2 + $0x20] sm:$0xff] %vm1162_vm10, %v1123_v19 }
 0x1b4   : > { %1435 = vrot.lane.b32.xlu1 %v4436_v17, %s3480_s6  ;;  %1433 = vrot.lane.b32.xlu0 %v4439_v4, %s3480_s6 }
 0x1b6   : > { %v1129_v20 = vpop.permute.xlu1 %1128  ;;  %v1127_v22 = vpop.permute.xlu0 %1126 }
 0x1b7   : > { %1170 = vst.msk [vmem:[#allocation2 + $0x38] sm:$0xff] %vm1162_vm10, %v1129_v20  ;;  %1169 = vst.msk [vmem:[#allocation2 + $0x30] sm:$0xff] %vm1162_vm10, %v1127_v22  ;;  %v4535_v20 = vld [vmem:[%s3546_s21 + $0x60] sm:$0xff] }
 0x1b8   : > { %1504 = vrot.lane.b32.xlu1 %v3048_v58, %s3481_s7  ;;  %1502 = vrot.lane.b32.xlu0 %v3047_v59, %s3481_s7  ;;  %v4532_v59 = vld [vmem:[%s3546_s21 + $0x68] sm:$0xff] }
 0x1ba   : > { %v1133_v27 = vpop.permute.xlu1 %1132  ;;  %v1131_v30 = vpop.permute.xlu0 %1130 }
 0x1bb   : > { %1172 = vst.msk [vmem:[#allocation2 + $0x48] sm:$0xff] %vm1162_vm10, %v1133_v27  ;;  %1171 = vst.msk [vmem:[#allocation2 + $0x40] sm:$0xff] %vm1162_vm10, %v1131_v30  ;;  %v4544_v30 = vld [vmem:[%s3546_s21 + $0x80] sm:$0xff] }
 0x1bc   : > { %1508 = vrot.lane.b32.xlu1 %v4454_v23, %s3481_s7  ;;  %1506 = vrot.lane.b32.xlu0 %v4457_v26, %s3481_s7 }
 0x1be   : > { %v1137_v51 = vpop.permute.xlu1 %1136  ;;  %v1135_v42 = vpop.permute.xlu0 %1134 }
 0x1bf   : > { %1174 = vst.msk [vmem:[#allocation2 + $0x58] sm:$0xff] %vm1162_vm10, %v1137_v51  ;;  %1173 = vst.msk [vmem:[#allocation2 + $0x50] sm:$0xff] %vm1162_vm10, %v1135_v42  ;;  %v4547_v51 = vld [vmem:[%s3546_s21 + $0x78] sm:$0xff] }
 0x1c0   : > { %1512 = vrot.lane.b32.xlu1 %v4466_v31, %s3481_s7  ;;  %1510 = vrot.lane.b32.xlu0 %v4469_v50, %s3481_s7 }
 0x1c2   : > { %v1141_v55 = vpop.permute.xlu1 %1140  ;;  %v1139_v61 = vpop.permute.xlu0 %1138 }
 0x1c3   : > { %1176 = vst.msk [vmem:[#allocation2 + $0x68] sm:$0xff] %vm1162_vm10, %v1141_v55  ;;  %1175 = vst.msk [vmem:[#allocation2 + $0x60] sm:$0xff] %vm1162_vm10, %v1139_v61  ;;  %v4556_v61 = vld [vmem:[%s3546_s21 + $0x98] sm:$0xff] }
 0x1c4   : > { %1516 = vrot.lane.b32.xlu1 %v4478_v43, %s3481_s7  ;;  %1514 = vrot.lane.b32.xlu0 %v4481_v54, %s3481_s7 }
 0x1c6   : > { %v1145_v14 = vpop.permute.xlu1 %1144  ;;  %v1143_v49 = vpop.permute.xlu0 %1142 }
 0x1c7   : > { %1178 = vst.msk [vmem:[#allocation2 + $0x78] sm:$0xff] %vm1162_vm10, %v1145_v14  ;;  %1177 = vst.msk [vmem:[#allocation2 + $0x70] sm:$0xff] %vm1162_vm10, %v1143_v49  ;;  %v3074_v49 = vld [vmem:[%s3546_s21 + $0xb0] sm:$0xff]  ;;  %vm2572_vm10 = vcmask 818176  }
 0x1c8   : > { %1520 = vrot.lane.b32.xlu1 %v3056_v63, %s3481_s7  ;;  %1518 = vrot.lane.b32.xlu0 %v3055_v9, %s3481_s7  ;;  %v4559_v63 = vld [vmem:[%s3546_s21 + $0x90] sm:$0xff] }
 0x1ca   : > { %v1214_v36 = vpop.permute.xlu1 %1213  ;;  %v1212_v37 = vpop.permute.xlu0 %1211 }
 0x1cb   : > { %1261 = vst.msk [vmem:[#allocation2 + $0x8] sm:$0xff] %vm1259_vm11, %v1214_v36  ;;  %1260 = vst.msk [vmem:[#allocation2] sm:$0xff] %vm1259_vm11, %v1212_v37  ;;  %v3073_v36 = vld [vmem:[%s3546_s21 + $0xa8] sm:$0xff] }
 0x1cc   : > { %1524 = vrot.lane.b32.xlu1 %v4496_v12, %s3481_s7  ;;  %1522 = vrot.lane.b32.xlu0 %v4499_v16, %s3481_s7 }
 0x1ce   : > { %v1218_v10 = vpop.permute.xlu1 %1217  ;;  %v1216_v39 = vpop.permute.xlu0 %1215 }
 0x1cf   : > { %1263 = vst.msk [vmem:[#allocation2 + $0x18] sm:$0xff] %vm1259_vm11, %v1218_v10  ;;  %1262 = vst.msk [vmem:[#allocation2 + $0x10] sm:$0xff] %vm1259_vm11, %v1216_v39 }
 0x1d0   : > { %1528 = vrot.lane.b32.xlu1 %v4151_v45, %s3481_s7  ;;  %1526 = vrot.lane.b32.xlu0 %v4154_v46, %s3481_s7  ;;  %v3066_v45 = vld [vmem:[%s3546_s21 + $0x50] sm:$0xff]  ;;  %v3065_v46 = vld [vmem:[%s3546_s21 + $0x48] sm:$0xff] }
 0x1d2   : > { %v1222_v1 = vpop.permute.xlu1 %1221  ;;  %v1220_v5 = vpop.permute.xlu0 %1219 }
 0x1d3   : > { %1265 = vst.msk [vmem:[#allocation2 + $0x28] sm:$0xff] %vm1259_vm11, %v1222_v1  ;;  %1264 = vst.msk [vmem:[#allocation2 + $0x20] sm:$0xff] %vm1259_vm11, %v1220_v5 }
 0x1d4   : > { %1532 = vrot.lane.b32.xlu1 %v4514_v44, %s3481_s7  ;;  %1530 = vrot.lane.b32.xlu0 %v4517_v0, %s3481_s7 }
 0x1d6   : > { %v1226_v19 = vpop.permute.xlu1 %1225  ;;  %v1224_v58 = vpop.permute.xlu0 %1223 }
 0x1d7   : > { %1267 = vst.msk [vmem:[#allocation2 + $0x38] sm:$0xff] %vm1259_vm11, %v1226_v19  ;;  %1266 = vst.msk [vmem:[#allocation2 + $0x30] sm:$0xff] %vm1259_vm11, %v1224_v58 }
 0x1d8   : > { %1604 = vrot.lane.b32.xlu1 %v3066_v45, %s3482_s8  ;;  %1602 = vrot.lane.b32.xlu0 %v3065_v46, %s3482_s8 }
 0x1da   : > { %v1230_v22 = vpop.permute.xlu1 %1229  ;;  %v1228_v27 = vpop.permute.xlu0 %1227 }
 0x1db   : > { %1269 = vst.msk [vmem:[#allocation2 + $0x48] sm:$0xff] %vm1259_vm11, %v1230_v22  ;;  %1268 = vst.msk [vmem:[#allocation2 + $0x40] sm:$0xff] %vm1259_vm11, %v1228_v27 }
 0x1dc   : > { %1608 = vrot.lane.b32.xlu1 %v4532_v59, %s3482_s8  ;;  %1606 = vrot.lane.b32.xlu0 %v4535_v20, %s3482_s8 }
 0x1de   : > { %v1234_v42 = vpop.permute.xlu1 %1233  ;;  %v1232_v55 = vpop.permute.xlu0 %1231 }
 0x1df   : > { %1271 = vst.msk [vmem:[#allocation2 + $0x58] sm:$0xff] %vm1259_vm11, %v1234_v42  ;;  %1270 = vst.msk [vmem:[#allocation2 + $0x50] sm:$0xff] %vm1259_vm11, %v1232_v55 }
 0x1e0   : > { %1612 = vrot.lane.b32.xlu1 %v4544_v30, %s3482_s8  ;;  %1610 = vrot.lane.b32.xlu0 %v4547_v51, %s3482_s8 }
 0x1e2   : > { %v1238_v9 = vpop.permute.xlu1 %1237  ;;  %v1236_v14 = vpop.permute.xlu0 %1235 }
 0x1e3   : > { %1273 = vst.msk [vmem:[#allocation2 + $0x68] sm:$0xff] %vm1259_vm11, %v1238_v9  ;;  %1272 = vst.msk [vmem:[#allocation2 + $0x60] sm:$0xff] %vm1259_vm11, %v1236_v14  ;;  %v3092_v9 = vld [vmem:[%s3546_s21 + $0xc9] sm:$0xff] }
 0x1e4   : > { %1616 = vrot.lane.b32.xlu1 %v4556_v61, %s3482_s8  ;;  %1614 = vrot.lane.b32.xlu0 %v4559_v63, %s3482_s8 }
 0x1e6   : > { %v1242_v37 = vpop.permute.xlu1 %1241  ;;  %v1240_v10 = vpop.permute.xlu0 %1239 }
 0x1e7   : > { %1275 = vst.msk [vmem:[#allocation2 + $0x78] sm:$0xff] %vm1259_vm11, %v1242_v37  ;;  %1274 = vst.msk [vmem:[#allocation2 + $0x70] sm:$0xff] %vm1259_vm11, %v1240_v10 }
 0x1e8   : > { %1620 = vrot.lane.b32.xlu1 %v3074_v49, %s3482_s8  ;;  %1618 = vrot.lane.b32.xlu0 %v3073_v36, %s3482_s8 }
 0x1ea   : > { %v1311_v39 = vpop.permute.xlu1 %1310  ;;  %v1309_v1 = vpop.permute.xlu0 %1308 }
 0x1eb   : > { %1358 = vst.msk [vmem:[#allocation2 + $0x8] sm:$0xff] %vm1356_vm12, %v1311_v39  ;;  %1357 = vst.msk [vmem:[#allocation2] sm:$0xff] %vm1356_vm12, %v1309_v1  ;;  %v3108_v1 = vld [vmem:[%s3546_s21 + $0xca] sm:$0xff] }
 0x1ec   : > { %1715 = vrot.lane.b32.xlu1 %v4265_v18, %s3483_s16  ;;  %1699 = vrot.lane.b32.xlu0 %v4226_v53, %s3483_s16 }
 0x1ee   : > { %v1315_v5 = vpop.permute.xlu1 %1314  ;;  %v1313_v45 = vpop.permute.xlu0 %1312 }
 0x1ef   : > { %1360 = vst.msk [vmem:[#allocation2 + $0x18] sm:$0xff] %vm1356_vm12, %v1315_v5  ;;  %1359 = vst.msk [vmem:[#allocation2 + $0x10] sm:$0xff] %vm1356_vm12, %v1313_v45 }
 0x1f0   : > { %1717 = vrot.lane.b32.xlu1 %v4262_v15, %s3483_s16  ;;  %1701 = vrot.lane.b32.xlu0 %v4223_v52, %s3483_s16 }
 0x1f2   : > { %v1319_v46 = vpop.permute.xlu1 %1318  ;;  %v1317_v19 = vpop.permute.xlu0 %1316 }
 0x1f3   : > { %1362 = vst.msk [vmem:[#allocation2 + $0x28] sm:$0xff] %vm1356_vm12, %v1319_v46  ;;  %1361 = vst.msk [vmem:[#allocation2 + $0x20] sm:$0xff] %vm1356_vm12, %v1317_v19 }
 0x1f4   : > { %1812 = vrot.lane.b32.xlu1 %v4343_v25, %s3484_s17  ;;  %1796 = vrot.lane.b32.xlu0 %v4301_v41, %s3484_s17  ;;  %v3075_v41 = vld [vmem:[%s3546_s21 + $0xc0] sm:$0xff] }
 0x1f6   : > { %v1323_v53 = vpop.permute.xlu1 %1322  ;;  %v1321_v18 = vpop.permute.xlu0 %1320 }
 0x1f7   : > { %1364 = vst.msk [vmem:[#allocation2 + $0x38] sm:$0xff] %vm1356_vm12, %v1323_v53  ;;  %1363 = vst.msk [vmem:[#allocation2 + $0x30] sm:$0xff] %vm1356_vm12, %v1321_v18 }
 0x1f8   : > { %1814 = vrot.lane.b32.xlu1 %v4340_v24, %s3484_s17  ;;  %1798 = vrot.lane.b32.xlu0 %v4298_v40, %s3484_s17 }
 0x1fa   : > { %v1327_v52 = vpop.permute.xlu1 %1326  ;;  %v1325_v15 = vpop.permute.xlu0 %1324 }
 0x1fb   : > { %1366 = vst.msk [vmem:[#allocation2 + $0x48] sm:$0xff] %vm1356_vm12, %v1327_v52  ;;  %1365 = vst.msk [vmem:[#allocation2 + $0x40] sm:$0xff] %vm1356_vm12, %v1325_v15 }
 0x1fc   : > { %1909 = vrot.lane.b32.xlu1 %v4421_v38, %s3485_s18  ;;  %1893 = vrot.lane.b32.xlu0 %v4379_v6, %s3485_s18  ;;  %v3076_v6 = vld [vmem:[%s3546_s21 + $0xc8] sm:$0xff] }
 0x1fe   : > { %v1331_v25 = vpop.permute.xlu1 %1330  ;;  %v1329_v24 = vpop.permute.xlu0 %1328 }
 0x1ff   : > { %1368 = vst.msk [vmem:[#allocation2 + $0x58] sm:$0xff] %vm1356_vm12, %v1331_v25  ;;  %1367 = vst.msk [vmem:[#allocation2 + $0x50] sm:$0xff] %vm1356_vm12, %v1329_v24 }
 0x200   : > { %1895 = vrot.lane.b32.xlu1 %v4376_v60, %s3485_s18  ;;  %1622 = vrot.lane.b32.xlu0 %v3075_v41, %s3482_s8  ;;  %v3091_v60 = vld [vmem:[%s3546_s21 + $0xc1] sm:$0xff] }
 0x202   : > { %v1335_v40 = vpop.permute.xlu1 %1334  ;;  %v1333_v58 = vpop.permute.xlu0 %1332 }
 0x203   : > { %1370 = vst.msk [vmem:[#allocation2 + $0x68] sm:$0xff] %vm1356_vm12, %v1335_v40  ;;  %1369 = vst.msk [vmem:[#allocation2 + $0x60] sm:$0xff] %vm1356_vm12, %v1333_v58 }
 0x204   : > { %1990 = vrot.lane.b32.xlu1 %v4457_v26, %s3486_s19  ;;  %1911 = vrot.lane.b32.xlu0 %v4418_v11, %s3485_s18 }
 0x206   : > { %v1339_v38 = vpop.permute.xlu1 %1338  ;;  %v1337_v22 = vpop.permute.xlu0 %1336 }
 0x207   : > { %1372 = vst.msk [vmem:[#allocation2 + $0x78] sm:$0xff] %vm1356_vm12, %v1339_v38  ;;  %1371 = vst.msk [vmem:[#allocation2 + $0x70] sm:$0xff] %vm1356_vm12, %v1337_v22 }
 0x208   : > { %1624 = vrot.lane.b32.xlu1 %v3076_v6, %s3482_s8  ;;  %2006 = vrot.lane.b32.xlu0 %v4499_v16, %s3486_s19 }
 0x20a   : > { %v1408_v27 = vpop.permute.xlu1 %1407  ;;  %v1406_v42 = vpop.permute.xlu0 %1405 }
 0x20b   : > { %1455 = vst.msk [vmem:[#allocation2 + $0x8] sm:$0xff] %vm1453_vm13, %v1408_v27  ;;  %1454 = vst.msk [vmem:[#allocation2] sm:$0xff] %vm1453_vm13, %v1406_v42  ;;  %v2559_v42 = vld [vmem:[%s5162_s1] sm:$0xff] }
 0x20c   : > { %1719 = vrot.lane.b32.xlu1 %v3091_v60, %s3483_s16  ;;  %1703 = vrot.lane.b32.xlu0 %v4238_v57, %s3483_s16 }
 0x20e   : > { %v1412_v11 = vpop.permute.xlu1 %1411  ;;  %v1410_v26 = vpop.permute.xlu0 %1409 }
 0x20f   : > { %1457 = vst.msk [vmem:[#allocation2 + $0x18] sm:$0xff] %vm1453_vm13, %v1412_v11  ;;  %1456 = vst.msk [vmem:[#allocation2 + $0x10] sm:$0xff] %vm1453_vm13, %v1410_v26  ;;  %v2560_v11 = vld [vmem:[%s5162_s1 + $0x8] sm:$0xff] }
 0x210   : > { %2008 = vrot.lane.b32.xlu1 %v4496_v12, %s3486_s19  ;;  %1992 = vrot.lane.b32.xlu0 %v4454_v23, %s3486_s19  ;;  %v3107_v23 = vld [vmem:[%s3546_s21 + $0xc2] sm:$0xff] }
 0x212   : > { %v1416_v16 = vpop.permute.xlu1 %1415  ;;  %v1414_v55 = vpop.permute.xlu0 %1413 }
 0x213   : > { %1459 = vst.msk [vmem:[#allocation2 + $0x28] sm:$0xff] %vm1453_vm13, %v1416_v16  ;;  %1458 = vst.msk [vmem:[#allocation2 + $0x20] sm:$0xff] %vm1453_vm13, %v1414_v55  ;;  %v2561_v55 = vld [vmem:[%s5162_s1 + $0x10] sm:$0xff] }
 0x214   : > { %2106 = vrot.lane.b32.xlu1 %v3075_v41, %s3487_s20  ;;  %2090 = vrot.lane.b32.xlu0 %v4535_v20, %s3487_s20 }
 0x216   : > { %v1420_v14 = vpop.permute.xlu1 %1419  ;;  %v1418_v49 = vpop.permute.xlu0 %1417 }
 0x217   : > { %1461 = vst.msk [vmem:[#allocation2 + $0x38] sm:$0xff] %vm1453_vm13, %v1420_v14  ;;  %1460 = vst.msk [vmem:[#allocation2 + $0x30] sm:$0xff] %vm1453_vm13, %v1418_v49 }
 0x218   : > { %1721 = vrot.lane.b32.xlu1 %v3092_v9, %s3483_s16  ;;  %1705 = vrot.lane.b32.xlu0 %v4235_v56, %s3483_s16 }
 0x21a   : > { %v1424_v12 = vpop.permute.xlu1 %1423  ;;  %v1422_v36 = vpop.permute.xlu0 %1421 }
 0x21b   : > { %1463 = vst.msk [vmem:[#allocation2 + $0x48] sm:$0xff] %vm1453_vm13, %v1424_v12  ;;  %1462 = vst.msk [vmem:[#allocation2 + $0x40] sm:$0xff] %vm1453_vm13, %v1422_v36  ;;  %v2563_v12 = vld [vmem:[%s5162_s1 + $0x20] sm:$0xff]  ;;  %v2564_v36 = vld [vmem:[%s5162_s1 + $0x28] sm:$0xff] }
 0x21c   : > { %1816 = vrot.lane.b32.xlu1 %v3107_v23, %s3484_s17  ;;  %1800 = vrot.lane.b32.xlu0 %v4313_v47, %s3484_s17 }
 0x21e   : > { %v1428_v20 = vpop.permute.xlu1 %1427  ;;  %v1426_v37 = vpop.permute.xlu0 %1425 }
 0x21f   : > { %1465 = vst.msk [vmem:[#allocation2 + $0x58] sm:$0xff] %vm1453_vm13, %v1428_v20  ;;  %1464 = vst.msk [vmem:[#allocation2 + $0x50] sm:$0xff] %vm1453_vm13, %v1426_v37  ;;  %v3333_v20 = vpack.c.bf16 %v2564_v36, %v2563_v12 }
 0x220   : > { %2108 = vrot.lane.b32.xlu1 %v3076_v6, %s3487_s20  ;;  %2092 = vrot.lane.b32.xlu0 %v4532_v59, %s3487_s20  ;;  %v3123_v59 = vld [vmem:[%s3546_s21 + $0xc3] sm:$0xff] }
 0x222   : > { %v1432_v10 = vpop.permute.xlu1 %1431  ;;  %v1430_v39 = vpop.permute.xlu0 %1429 }
 0x223   : > { %1467 = vst.msk [vmem:[#allocation2 + $0x68] sm:$0xff] %vm1453_vm13, %v1432_v10  ;;  %1466 = vst.msk [vmem:[#allocation2 + $0x60] sm:$0xff] %vm1453_vm13, %v1430_v39  ;;  %v2565_v10 = vld [vmem:[%s5162_s1 + $0x30] sm:$0xff]  ;;  %v2566_v39 = vld [vmem:[%s5162_s1 + $0x38] sm:$0xff] }
 0x224   : > { %2203 = vrot.lane.b32.xlu1 %v3091_v60, %s3488_s22  ;;  %2187 = vrot.lane.b32.xlu0 %v4238_v57, %s3488_s22 }
 0x226   : > { %v1436_v5 = vpop.permute.xlu1 %1435  ;;  %v1434_v45 = vpop.permute.xlu0 %1433 }
 0x227   : > { %1469 = vst.msk [vmem:[#allocation2 + $0x78] sm:$0xff] %vm1453_vm13, %v1436_v5  ;;  %1468 = vst.msk [vmem:[#allocation2 + $0x70] sm:$0xff] %vm1453_vm13, %v1434_v45 }
 0x228   : > { %1818 = vrot.lane.b32.xlu1 %v3108_v1, %s3484_s17  ;;  %1802 = vrot.lane.b32.xlu0 %v4310_v3, %s3484_s17 }
 0x22a   : > { %v1505_v46 = vpop.permute.xlu1 %1504  ;;  %v1503_v19 = vpop.permute.xlu0 %1502 }
 0x22b   : > { %1552 = vst.msk [vmem:[#allocation2 + $0x8] sm:$0xff] %vm1550_vm14, %v1505_v46  ;;  %1551 = vst.msk [vmem:[#allocation2] sm:$0xff] %vm1550_vm14, %v1503_v19  ;;  %v2568_v46 = vld [vmem:[%s5162_s1 + $0x48] sm:$0xff] }
 0x22c   : > { %1913 = vrot.lane.b32.xlu1 %v3123_v59, %s3485_s18  ;;  %1897 = vrot.lane.b32.xlu0 %v4391_v8, %s3485_s18 }
 0x22e   : > { %v1509_v57 = vpop.permute.xlu1 %1508  ;;  %v1507_v53 = vpop.permute.xlu0 %1506 }
 0x22f   : > { %1554 = vst.msk [vmem:[#allocation2 + $0x18] sm:$0xff] %vm1550_vm14, %v1509_v57  ;;  %1553 = vst.msk [vmem:[#allocation2 + $0x10] sm:$0xff] %vm1550_vm14, %v1507_v53  ;;  %v2569_v53 = vld [vmem:[%s5162_s1 + $0x50] sm:$0xff] }
 0x230   : > { %2205 = vrot.lane.b32.xlu1 %v3092_v9, %s3488_s22  ;;  %2189 = vrot.lane.b32.xlu0 %v4235_v56, %s3488_s22  ;;  %v4689_v56 = vld [vmem:[%s3546_s21 + $0xcb] sm:$0xff]  ;;  %v2562_v9 = vld [vmem:[%s5162_s1 + $0x18] sm:$0xff] }
 0x231   : > { %v3329_v14 = vpack.c.bf16 %v2562_v9, %v2561_v55  ;;  %v3080_v55 = vld [vmem:[%s3546_s21 + $0xf8] sm:$0xff] }
 0x232   : > { %v1513_v18 = vpop.permute.xlu1 %1512  ;;  %v1511_v52 = vpop.permute.xlu0 %1510 }
 0x233   : > { %1556 = vst.msk [vmem:[#allocation2 + $0x28] sm:$0xff] %vm1550_vm14, %v1513_v18  ;;  %1555 = vst.msk [vmem:[#allocation2 + $0x20] sm:$0xff] %vm1550_vm14, %v1511_v52  ;;  %v2570_v18 = vld [vmem:[%s5162_s1 + $0x58] sm:$0xff]  ;;  %v3158_v52 = vld [vmem:[%s3546_s21 + $0xe0] sm:$0xff] }
 0x234   : > { %2300 = vrot.lane.b32.xlu1 %v3107_v23, %s3489_s23  ;;  %2284 = vrot.lane.b32.xlu0 %v4313_v47, %s3489_s23  ;;  %v4698_v47 = vld [vmem:[%s3546_s21 + $0xc4] sm:$0xff] }
 0x236   : > { %v1517_v15 = vpop.permute.xlu1 %1516  ;;  %v1515_v41 = vpop.permute.xlu0 %1514 }
 0x237   : > { %1558 = vst.msk [vmem:[#allocation2 + $0x38] sm:$0xff] %vm1550_vm14, %v1517_v15  ;;  %1557 = vst.msk [vmem:[#allocation2 + $0x30] sm:$0xff] %vm1550_vm14, %v1515_v41 }
 0x238   : > { %1899 = vrot.lane.b32.xlu1 %v4388_v7, %s3485_s18  ;;  %1626 = vrot.lane.b32.xlu0 %v4208_v29, %s3482_s8 }
 0x23a   : > { %v1521_v25 = vpop.permute.xlu1 %1520  ;;  %v1519_v24 = vpop.permute.xlu0 %1518 }
 0x23b   : > { %1560 = vst.msk [vmem:[#allocation2 + $0x48] sm:$0xff] %vm1550_vm14, %v1521_v25  ;;  %1559 = vst.msk [vmem:[#allocation2 + $0x40] sm:$0xff] %vm1550_vm14, %v1519_v24  ;;  %v3165_v25 = vld [vmem:[%s3546_s21 + $0x79] sm:$0xff] }
 0x23c   : > { %1994 = vrot.lane.b32.xlu1 %v4469_v50, %s3486_s19  ;;  %1915 = vrot.lane.b32.xlu0 %v4689_v56, %s3485_s18 }
 0x23e   : > { %v1525_v40 = vpop.permute.xlu1 %1524  ;;  %v1523_v58 = vpop.permute.xlu0 %1522 }
 0x23f   : > { %1562 = vst.msk [vmem:[#allocation2 + $0x58] sm:$0xff] %vm1550_vm14, %v1525_v40  ;;  %1561 = vst.msk [vmem:[#allocation2 + $0x50] sm:$0xff] %vm1550_vm14, %v1523_v58 }
 0x240   : > { %2286 = vrot.lane.b32.xlu1 %v4310_v3, %s3489_s23  ;;  %2010 = vrot.lane.b32.xlu0 %v4698_v47, %s3486_s19 }
 0x242   : > { %v1529_v29 = vpop.permute.xlu1 %1528  ;;  %v1527_v6 = vpop.permute.xlu0 %1526 }
 0x243   : > { %1564 = vst.msk [vmem:[#allocation2 + $0x68] sm:$0xff] %vm1550_vm14, %v1529_v29  ;;  %1563 = vst.msk [vmem:[#allocation2 + $0x60] sm:$0xff] %vm1550_vm14, %v1527_v6 }
 0x244   : > { %2381 = vrot.lane.b32.xlu1 %v4391_v8, %s3490_s24  ;;  %2302 = vrot.lane.b32.xlu0 %v3108_v1, %s3489_s23  ;;  %v4723_v8 = vld [vmem:[%s3546_s21 + $0xcc] sm:$0xff]  ;;  %v4774_v1 = vld [vmem:[%s3546_s21 + $0x81] sm:$0xff] }
 0x246   : > { %v1533_v38 = vpop.permute.xlu1 %1532  ;;  %v1531_v22 = vpop.permute.xlu0 %1530 }
 0x247   : > { %1566 = vst.msk [vmem:[#allocation2 + $0x78] sm:$0xff] %vm1550_vm14, %v1533_v38  ;;  %1565 = vst.msk [vmem:[#allocation2 + $0x70] sm:$0xff] %vm1550_vm14, %v1531_v22 }
 0x248   : > { %1628 = vrot.lane.b32.xlu1 %v4205_v28, %s3482_s8  ;;  %2397 = vrot.lane.b32.xlu0 %v3123_v59, %s3490_s24  ;;  %v2567_v59 = vld [vmem:[%s5162_s1 + $0x40] sm:$0xff] }
 0x24a   : > { %v1605_v3 = vpop.permute.xlu1 %1604  ;;  %v1603_v60 = vpop.permute.xlu0 %1602 }
 0x24b   : > { %1652 = vst.msk [vmem:[#allocation2 + $0x8] sm:$0xff] %vm1650_vm15, %v1605_v3  ;;  %1651 = vst.msk [vmem:[#allocation2] sm:$0xff] %vm1650_vm15, %v1603_v60 }
 0x24c   : > { %1723 = vrot.lane.b32.xlu1 %v4283_v35, %s3483_s16  ;;  %1707 = vrot.lane.b32.xlu0 %v4248_v62, %s3483_s16  ;;  %v3325_v35 = vpack.c.bf16 %v2560_v11, %v2559_v42  ;;  %v3157_v62 = vld [vmem:[%s3546_s21 + $0xd8] sm:$0xff] }
 0x24e   : > { %v1609_v27 = vpop.permute.xlu1 %1608  ;;  %v1607_v28 = vpop.permute.xlu0 %1606  ;;  %3326 = vmatprep.subr.bf16.mxu0 %v3325_v35  ;;  %3349 = vmatprep.subr.bf16.mxu1 %v3325_v35 }
 0x24f   : > { %1654 = vst.msk [vmem:[#allocation2 + $0x18] sm:$0xff] %vm1650_vm15, %v1609_v27  ;;  %1653 = vst.msk [vmem:[#allocation2 + $0x10] sm:$0xff] %vm1650_vm15, %v1607_v28  ;;  %3328 = vmatpush3.bf16.msra.mxu0 %v3325_v35  ;;  %3356 = vmatpush3.bf16.msra.mxu1 %v3325_v35 }
 0x250   : > { %2012 = vrot.lane.b32.xlu1 %v4723_v8, %s3486_s19  ;;  %1996 = vrot.lane.b32.xlu0 %v4466_v31, %s3486_s19 }
 0x251   : > { %3330 = vmatprep.subr.bf16.mxu0 %v3329_v14  ;;  %3350 = vmatprep.subr.bf16.mxu1 %v3329_v14 }
 0x252   : > { %v1613_v26 = vpop.permute.xlu1 %1612  ;;  %v1611_v16 = vpop.permute.xlu0 %1610 }
 0x253   : > { %1656 = vst.msk [vmem:[#allocation2 + $0x28] sm:$0xff] %vm1650_vm15, %v1613_v26  ;;  %1655 = vst.msk [vmem:[#allocation2 + $0x20] sm:$0xff] %vm1650_vm15, %v1611_v16  ;;  %3332 = vmatpush3.bf16.msra.mxu0 %v3329_v14  ;;  %3357 = vmatpush3.bf16.msra.mxu1 %v3329_v14 }
 0x254   : > { %2110 = vrot.lane.b32.xlu1 %v3157_v62, %s3487_s20  ;;  %2094 = vrot.lane.b32.xlu0 %v4547_v51, %s3487_s20  ;;  %v3190_v62 = vld [vmem:[%s3546_s21 + $0xe2] sm:$0xff] }
 0x255   : > { %3334 = vmatprep.subr.bf16.mxu0 %v3333_v20  ;;  %3351 = vmatprep.subr.bf16.mxu1 %v3333_v20 }
 0x256   : > { %v1617_v49 = vpop.permute.xlu1 %1616  ;;  %v1615_v23 = vpop.permute.xlu0 %1614 }
 0x257   : > { %1658 = vst.msk [vmem:[#allocation2 + $0x38] sm:$0xff] %vm1650_vm15, %v1617_v49  ;;  %1657 = vst.msk [vmem:[#allocation2 + $0x30] sm:$0xff] %vm1650_vm15, %v1615_v23  ;;  %3336 = vmatpush3.bf16.msra.mxu0 %v3333_v20  ;;  %3358 = vmatpush3.bf16.msra.mxu1 %v3333_v20  ;;  %v3095_v49 = vld [vmem:[%s3546_s21 + $0xf1] sm:$0xff] }
 0x258   : > { %2399 = vrot.lane.b32.xlu1 %v4689_v56, %s3490_s24  ;;  %2383 = vrot.lane.b32.xlu0 %v4388_v7, %s3490_s24  ;;  %v3337_v7 = vpack.c.bf16 %v2566_v39, %v2565_v10  ;;  %v3173_v56 = vld [vmem:[%s3546_s21 + $0xd9] sm:$0xff]  ;;  %v3087_v23 = vld [vmem:[%s3546_s21 + $0x91] sm:$0xff] }
 0x25a   : > { %v1621_v51 = vpop.permute.xlu1 %1620  ;;  %v1619_v37 = vpop.permute.xlu0 %1618  ;;  %3338 = vmatprep.subr.bf16.mxu0 %v3337_v7  ;;  %3352 = vmatprep.subr.bf16.mxu1 %v3337_v7 }
 0x25b   : > { %1660 = vst.msk [vmem:[#allocation2 + $0x48] sm:$0xff] %vm1650_vm15, %v1621_v51  ;;  %1659 = vst.msk [vmem:[#allocation2 + $0x40] sm:$0xff] %vm1650_vm15, %v1619_v37  ;;  %3340 = vmatpush3.bf16.msra.mxu0 %v3337_v7  ;;  %3359 = vmatpush3.bf16.msra.mxu1 %v3337_v7  ;;  %v3198_v37 = vld [vmem:[%s3546_s21 + $0x83] sm:$0xff] }
 0x25c   : > { %2494 = vrot.lane.b32.xlu1 %v4698_v47, %s3491_s30  ;;  %2478 = vrot.lane.b32.xlu0 %v4469_v50, %s3491_s30  ;;  %v3341_v50 = vpack.c.bf16 %v2568_v46, %v2567_v59  ;;  %v3103_v59 = vld [vmem:[%s3546_s21 + $0x92] sm:$0xff] }
 0x25e   : > { %v1716_v5 = vpop.permute.xlu1 %1715  ;;  %v1700_v45 = vpop.permute.xlu0 %1699  ;;  %3342 = vmatprep.subr.bf16.mxu0 %v3341_v50  ;;  %3353 = vmatprep.subr.bf16.mxu1 %v3341_v50 }
 0x25f   : > { %1756 = vst.msk [vmem:[#allocation2 + $0x40] sm:$0xff] %vm1747_vm0, %v1716_v5  ;;  %1748 = vst.msk [vmem:[#allocation2] sm:$0xff] %vm1747_vm0, %v1700_v45  ;;  %3344 = vmatpush3.bf16.msra.mxu0 %v3341_v50  ;;  %3360 = vmatpush3.bf16.msra.mxu1 %v3341_v50  ;;  %v3111_v45 = vld [vmem:[%s3546_s21 + $0xf2] sm:$0xff] }
 0x260   : > { %1725 = vrot.lane.b32.xlu1 %v4280_v34, %s3483_s16  ;;  %1709 = vrot.lane.b32.xlu0 %v4774_v1, %s3483_s16  ;;  %v3345_v34 = vpack.c.bf16 %v2570_v18, %v2569_v53  ;;  %v3214_v53 = vld [vmem:[%s3546_s21 + $0x84] sm:$0xff] }
 0x262   : > { %v1718_v19 = vpop.permute.xlu1 %1717  ;;  %v1702_v57 = vpop.permute.xlu0 %1701  ;;  %3346 = vmatprep.subr.bf16.mxu0 %v3345_v34  ;;  %3354 = vmatprep.subr.bf16.mxu1 %v3345_v34 }
 0x263   : > { %1757 = vst.msk [vmem:[#allocation2 + $0x48] sm:$0xff] %vm1747_vm0, %v1718_v19  ;;  %1749 = vst.msk [vmem:[#allocation2 + $0x8] sm:$0xff] %vm1747_vm0, %v1702_v57  ;;  %3348 = vmatpush3.bf16.msra.mxu0 %v3345_v34  ;;  %3361 = vmatpush3.bf16.msra.mxu1 %v3345_v34 }
 0x264   : > { %1820 = vrot.lane.b32.xlu1 %v4361_v33, %s3484_s17  ;;  %1804 = vrot.lane.b32.xlu0 %v4325_v2, %s3484_s17  ;;  %v2571_v2 = vld [vmem:[%s5162_s1 + $0x60] sm:$0xf] }
 0x265   : > { %3299 = vmatprep.subr.msk.mxu0 %vm2621_vm2, %v2571_v2  ;;  %3355 = vmatprep.subr.msk.mxu1 %vm2621_vm2, %v2571_v2 }
 0x266   : > { %v1813_v15 = vpop.permute.xlu1 %1812  ;;  %v1797_v41 = vpop.permute.xlu0 %1796 }
 0x267   : > { %1853 = vst.msk [vmem:[#allocation2 + $0x40] sm:$0xff] %vm1844_vm1, %v1813_v15  ;;  %1845 = vst.msk [vmem:[#allocation2] sm:$0xff] %vm1844_vm1, %v1797_v41  ;;  %3300 = vmatpush3.msk.msra.mxu0 %vm2621_vm2, %v2571_v2  ;;  %3362 = vmatpush3.msk.msra.mxu1 %vm2621_vm2, %v2571_v2  ;;  %v3127_v2 = vld [vmem:[%s3546_s21 + $0xf3] sm:$0xff] }
 0x268   : > { %2112 = vrot.lane.b32.xlu1 %v3158_v52, %s3487_s20  ;;  %2096 = vrot.lane.b32.xlu0 %v4544_v30, %s3487_s20  ;;  %v3104_v52 = vld [vmem:[%s3546_s21 + $0x9a] sm:$0xff] }
 0x26a   : > { %v1815_v24 = vpop.permute.xlu1 %1814  ;;  %v1799_v47 = vpop.permute.xlu0 %1798 }
 0x26b   : > { %1854 = vst.msk [vmem:[#allocation2 + $0x48] sm:$0xff] %vm1844_vm1, %v1815_v24  ;;  %1846 = vst.msk [vmem:[#allocation2 + $0x8] sm:$0xff] %vm1844_vm1, %v1799_v47 }
 0x26c   : > { %2207 = vrot.lane.b32.xlu1 %v3173_v56, %s3488_s22  ;;  %2191 = vrot.lane.b32.xlu0 %v3165_v25, %s3488_s22  ;;  %v3119_v56 = vld [vmem:[%s3546_s21 + $0x93] sm:$0xff] }
 0x26e   : > { %v1910_v30 = vpop.permute.xlu1 %1909  ;;  %v1894_v40 = vpop.permute.xlu0 %1893 }
 0x26f   : > { %1950 = vst.msk [vmem:[#allocation2 + $0x40] sm:$0xff] %vm1941_vm3, %v1910_v30  ;;  %1942 = vst.msk [vmem:[#allocation2] sm:$0xff] %vm1941_vm3, %v1894_v40 }
 0x270   : > { %2496 = vrot.lane.b32.xlu1 %v4723_v8, %s3491_s30  ;;  %2480 = vrot.lane.b32.xlu0 %v4466_v31, %s3491_s30  ;;  %v3174_v31 = vld [vmem:[%s3546_s21 + $0xe1] sm:$0xff]  ;;  %v3079_v8 = vld [vmem:[%s3546_s21 + $0xf0] sm:$0xff] }
 0x272   : > { %v1896_v58 = vpop.permute.xlu1 %1895  ;;  %v1623_v29 = vpop.permute.xlu0 %1622 }
 0x273   : > { %1943 = vst.msk [vmem:[#allocation2 + $0x8] sm:$0xff] %vm1941_vm3, %v1896_v58  ;;  %v3128_v58 = vld [vmem:[%s3546_s21 + $0xfb] sm:$0xff] }
 0x274   : > { %1661 = vst.msk [vmem:[#allocation2 + $0x50] sm:$0xff] %vm1650_vm15, %v1623_v29  ;;  %1822 = vrot.lane.b32.xlu1 %v4358_v32, %s3484_s17  ;;  %1806 = vrot.lane.b32.xlu0 %v4322_v48, %s3484_s17  ;;  %v3181_v48 = vld [vmem:[%s3546_s21 + $0x7a] sm:$0xff] }
 0x275   : > { %v3120_v29 = vld [vmem:[%s3546_s21 + $0x9b] sm:$0xff] }
 0x276   : > { %v1991_v6 = vpop.permute.xlu1 %1990  ;;  %v1912_v38 = vpop.permute.xlu0 %1911 }
 0x277   : > { %2039 = vst.msk [vmem:[#allocation2] sm:$0xff] %vm2038_vm4, %v1991_v6 }
 0x278   : > { %1951 = vst.msk [vmem:[#allocation2 + $0x48] sm:$0xff] %vm1941_vm3, %v1912_v38  ;;  %1917 = vrot.lane.b32.xlu1 %v4439_v4, %s3485_s18  ;;  %1901 = vrot.lane.b32.xlu0 %v4403_v21, %s3485_s18 }
 0x27a   : > { %v1625_v32 = vpop.permute.xlu1 %1624  ;;  %v2007_v22 = vpop.permute.xlu0 %2006 }
 0x27b   : > { %1662 = vst.msk [vmem:[#allocation2 + $0x58] sm:$0xff] %vm1650_vm15, %v1625_v32  ;;  %v3135_v32 = vld [vmem:[%s3546_s21 + $0x94] sm:$0xff] }
 0x27c   : > { %2047 = vst.msk [vmem:[#allocation2 + $0x40] sm:$0xff] %vm2038_vm4, %v2007_v22  ;;  %2209 = vrot.lane.b32.xlu1 %v3174_v31, %s3488_s22  ;;  %2193 = vrot.lane.b32.xlu0 %v4774_v1, %s3488_s22  ;;  %v3088_v1 = vld [vmem:[%s3546_s21 + $0x99] sm:$0xff] }
 0x27d   : > { %v3143_v31 = vld [vmem:[%s3546_s21 + $0xf4] sm:$0xff] }
 0x27e   : > { %v1720_v3 = vpop.permute.xlu1 %1719  ;;  %v1704_v60 = vpop.permute.xlu0 %1703 }
 0x27f   : > { %1758 = vst.msk [vmem:[#allocation2 + $0x50] sm:$0xff] %vm1747_vm0, %v1720_v3  ;;  %1750 = vst.msk [vmem:[#allocation2 + $0x10] sm:$0xff] %vm1747_vm0, %v1704_v60 }
 0x280   : > { %2304 = vrot.lane.b32.xlu1 %v4361_v33, %s3489_s23  ;;  %2288 = vrot.lane.b32.xlu0 %v3181_v48, %s3489_s23  ;;  %v3182_v33 = vld [vmem:[%s3546_s21 + $0x82] sm:$0xff] }
 0x282   : > { %v2009_v27 = vpop.permute.xlu1 %2008  ;;  %v1993_v28 = vpop.permute.xlu0 %1992 }
 0x283   : > { %2048 = vst.msk [vmem:[#allocation2 + $0x48] sm:$0xff] %vm2038_vm4, %v2009_v27  ;;  %2040 = vst.msk [vmem:[#allocation2 + $0x8] sm:$0xff] %vm2038_vm4, %v1993_v28 }
 0x284   : > { %1903 = vrot.lane.b32.xlu1 %v4400_v13, %s3485_s18  ;;  %1630 = vrot.lane.b32.xlu0 %v3079_v8, %s3482_s8 }
 0x286   : > { %v2107_v42 = vpop.permute.xlu1 %2106  ;;  %v2091_v11 = vpop.permute.xlu0 %2090 }
 0x287   : > { %2147 = vst.msk [vmem:[#allocation2 + $0x40] sm:$0xff] %vm2138_vm5, %v2107_v42  ;;  %2139 = vst.msk [vmem:[#allocation2] sm:$0xff] %vm2138_vm5, %v2091_v11  ;;  %v3144_v11 = vld [vmem:[%s3546_s21 + $0xfc] sm:$0xff] }
 0x288   : > { %1998 = vrot.lane.b32.xlu1 %v4481_v54, %s3486_s19  ;;  %1919 = vrot.lane.b32.xlu0 %v4436_v17, %s3485_s18 }
 0x28a   : > { %v1722_v35 = vpop.permute.xlu1 %1721  ;;  %v1706_v13 = vpop.permute.xlu0 %1705 }
 0x28b   : > { %1759 = vst.msk [vmem:[#allocation2 + $0x58] sm:$0xff] %vm1747_vm0, %v1722_v35  ;;  %1751 = vst.msk [vmem:[#allocation2 + $0x18] sm:$0xff] %vm1747_vm0, %v1706_v13 }
 0x28c   : > { %2290 = vrot.lane.b32.xlu1 %v3182_v33, %s3489_s23  ;;  %2014 = vrot.lane.b32.xlu0 %v4517_v0, %s3486_s19  ;;  %v3136_v33 = vld [vmem:[%s3546_s21 + $0x9c] sm:$0xff] }
 0x28e   : > { %v1817_v26 = vpop.permute.xlu1 %1816  ;;  %v1801_v16 = vpop.permute.xlu0 %1800 }
 0x28f   : > { %1855 = vst.msk [vmem:[#allocation2 + $0x50] sm:$0xff] %vm1844_vm1, %v1817_v26  ;;  %1847 = vst.msk [vmem:[#allocation2 + $0x10] sm:$0xff] %vm1844_vm1, %v1801_v16  ;;  %v3153_v26 = vld [vmem:[%s3546_s21 + $0xa8] sm:$0xff] }
 0x290   : > { %2385 = vrot.lane.b32.xlu1 %v4403_v21, %s3490_s24  ;;  %2306 = vrot.lane.b32.xlu0 %v3190_v62, %s3489_s23  ;;  %v3161_v62 = vld [vmem:[%s3546_s21 + $0x108] sm:$0xff] }
 0x292   : > { %v2109_v9 = vpop.permute.xlu1 %2108  ;;  %v2093_v14 = vpop.permute.xlu0 %2092 }
 0x293   : > { %2148 = vst.msk [vmem:[#allocation2 + $0x48] sm:$0xff] %vm2138_vm5, %v2109_v9  ;;  %2140 = vst.msk [vmem:[#allocation2 + $0x8] sm:$0xff] %vm2138_vm5, %v2093_v14 }
 0x294   : > { %1632 = vrot.lane.b32.xlu1 %v3080_v55, %s3482_s8  ;;  %2401 = vrot.lane.b32.xlu0 %v4439_v4, %s3490_s24  ;;  %s2895_s8 = sshll.u32 %s5205_s10, 5 }
 0x296   : > { %v2204_v12 = vpop.permute.xlu1 %2203  ;;  %v2188_v36 = vpop.permute.xlu0 %2187 }
 0x297   : > { %2244 = vst.msk [vmem:[#allocation2 + $0x40] sm:$0xff] %vm2235_vm6, %v2204_v12  ;;  %2236 = vst.msk [vmem:[#allocation2] sm:$0xff] %vm2235_vm6, %v2188_v36 }
 0x298   : > { %1727 = vrot.lane.b32.xlu1 %v3095_v49, %s3483_s16  ;;  %1711 = vrot.lane.b32.xlu0 %v3087_v23, %s3483_s16 }
 0x29a   : > { %v1819_v21 = vpop.permute.xlu1 %1818  ;;  %v1803_v20 = vpop.permute.xlu0 %1802 }
 0x29b   : > { %1856 = vst.msk [vmem:[#allocation2 + $0x58] sm:$0xff] %vm1844_vm1, %v1819_v21  ;;  %1848 = vst.msk [vmem:[#allocation2 + $0x18] sm:$0xff] %vm1844_vm1, %v1803_v20  ;;  %v3162_v21 = vld [vmem:[%s3546_s21 + $0x110] sm:$0xff] }
 0x29c   : > { %2016 = vrot.lane.b32.xlu1 %v4514_v44, %s3486_s19  ;;  %2000 = vrot.lane.b32.xlu0 %v4478_v43, %s3486_s19  ;;  %v3154_v20 = vld [vmem:[%s3546_s21 + $0xb0] sm:$0xff] }
 0x29e   : > { %v1914_v4 = vpop.permute.xlu1 %1913  ;;  %v1898_v51 = vpop.permute.xlu0 %1897 }
 0x29f   : > { %1952 = vst.msk [vmem:[#allocation2 + $0x50] sm:$0xff] %vm1941_vm3, %v1914_v4  ;;  %1944 = vst.msk [vmem:[#allocation2 + $0x10] sm:$0xff] %vm1941_vm3, %v1898_v51 }
 0x2a0   : > { %2114 = vrot.lane.b32.xlu1 %v3079_v8, %s3487_s20  ;;  %2098 = vrot.lane.b32.xlu0 %v4559_v63, %s3487_s20  ;;  %v3096_v63 = vld [vmem:[%s3546_s21 + $0xf9] sm:$0xff] }
 0x2a2   : > { %v2206_v10 = vpop.permute.xlu1 %2205  ;;  %v2190_v39 = vpop.permute.xlu0 %2189 }
 0x2a3   : > { %2245 = vst.msk [vmem:[#allocation2 + $0x48] sm:$0xff] %vm2235_vm6, %v2206_v10  ;;  %2237 = vst.msk [vmem:[#allocation2 + $0x8] sm:$0xff] %vm2235_vm6, %v2190_v39  ;;  %v3169_v10 = vld [vmem:[%s3546_s21 + $0xa9] sm:$0xff] }
 0x2a4   : > { %2403 = vrot.lane.b32.xlu1 %v4436_v17, %s3490_s24  ;;  %2387 = vrot.lane.b32.xlu0 %v3198_v37, %s3490_s24  ;;  %v3177_v37 = vld [vmem:[%s3546_s21 + $0x109] sm:$0xff] }
 0x2a6   : > { %v2301_v43 = vpop.permute.xlu1 %2300  ;;  %v2285_v7 = vpop.permute.xlu0 %2284 }
 0x2a7   : > { %2341 = vst.msk [vmem:[#allocation2 + $0x40] sm:$0xff] %vm2332_vm7, %v2301_v43  ;;  %2333 = vst.msk [vmem:[#allocation2] sm:$0xff] %vm2332_vm7, %v2285_v7 }
 0x2a8   : > { %2498 = vrot.lane.b32.xlu1 %v4517_v0, %s3491_s30  ;;  %2482 = vrot.lane.b32.xlu0 %v4481_v54, %s3491_s30 }
 0x2aa   : > { %v1900_v17 = vpop.permute.xlu1 %1899  ;;  %v1627_v5 = vpop.permute.xlu0 %1626 }
 0x2ab   : > { %1945 = vst.msk [vmem:[#allocation2 + $0x18] sm:$0xff] %vm1941_vm3, %v1900_v17  ;;  %v3170_v17 = vld [vmem:[%s3546_s21 + $0xb1] sm:$0xff] }
 0x2ac   : > { %1663 = vst.msk [vmem:[#allocation2 + $0x60] sm:$0xff] %vm1650_vm15, %v1627_v5  ;;  %1729 = vrot.lane.b32.xlu1 %v3096_v63, %s3483_s16  ;;  %1713 = vrot.lane.b32.xlu0 %v3088_v1, %s3483_s16 }
 0x2ae   : > { %v1995_v46 = vpop.permute.xlu1 %1994  ;;  %v1916_v50 = vpop.permute.xlu0 %1915 }
 0x2af   : > { %2041 = vst.msk [vmem:[#allocation2 + $0x10] sm:$0xff] %vm2038_vm4, %v1995_v46  ;;  %v3185_v46 = vld [vmem:[%s3546_s21 + $0xaa] sm:$0xff] }
 0x2b0   : > { %1953 = vst.msk [vmem:[#allocation2 + $0x58] sm:$0xff] %vm1941_vm3, %v1916_v50  ;;  %1824 = vrot.lane.b32.xlu1 %v3111_v45, %s3484_s17  ;;  %1808 = vrot.lane.b32.xlu0 %v3103_v59, %s3484_s17 }
 0x2b2   : > { %v2287_v54 = vpop.permute.xlu1 %2286  ;;  %v2011_v0 = vpop.permute.xlu0 %2010 }
 0x2b3   : > { %2334 = vst.msk [vmem:[#allocation2 + $0x8] sm:$0xff] %vm2332_vm7, %v2287_v54 }
 0x2b4   : > { %2049 = vst.msk [vmem:[#allocation2 + $0x50] sm:$0xff] %vm2038_vm4, %v2011_v0  ;;  %2116 = vrot.lane.b32.xlu1 %v3080_v55, %s3487_s20  ;;  %2100 = vrot.lane.b32.xlu0 %v4556_v61, %s3487_s20  ;;  %v3112_v61 = vld [vmem:[%s3546_s21 + $0xfa] sm:$0xff]  ;;  %v3194_v0 = vld [vmem:[%s3546_s21 + $0x112] sm:$0xff] }
 0x2b6   : > { %v2382_v19 = vpop.permute.xlu1 %2381  ;;  %v2303_v57 = vpop.permute.xlu0 %2302 }
 0x2b7   : > { %2430 = vst.msk [vmem:[#allocation2] sm:$0xff] %vm2429_vm8, %v2382_v19  ;;  %v3186_v19 = vld [vmem:[%s3546_s21 + $0xb2] sm:$0xff] }
 0x2b8   : > { %2342 = vst.msk [vmem:[#allocation2 + $0x48] sm:$0xff] %vm2332_vm7, %v2303_v57  ;;  %2211 = vrot.lane.b32.xlu1 %v3095_v49, %s3488_s22  ;;  %2195 = vrot.lane.b32.xlu0 %v3087_v23, %s3488_s22 }
 0x2ba   : > { %v1629_v18 = vpop.permute.xlu1 %1628  ;;  %v2398_v34 = vpop.permute.xlu0 %2397 }
 0x2bb   : > { %1664 = vst.msk [vmem:[#allocation2 + $0x68] sm:$0xff] %vm1650_vm15, %v1629_v18  ;;  %v3209_v18 = vld [vmem:[%s3546_s21 + $0x10b] sm:$0xff] }
 0x2bc   : > { %2438 = vst.msk [vmem:[#allocation2 + $0x40] sm:$0xff] %vm2429_vm8, %v2398_v34  ;;  %2500 = vrot.lane.b32.xlu1 %v4514_v44, %s3491_s30  ;;  %2484 = vrot.lane.b32.xlu0 %v3214_v53, %s3491_s30  ;;  %v3201_v34 = vld [vmem:[%s3546_s21 + $0xab] sm:$0xff] }
 0x2be   : > { %v1724_v15 = vpop.permute.xlu1 %1723  ;;  %v1708_v41 = vpop.permute.xlu0 %1707 }
 0x2bf   : > { %1760 = vst.msk [vmem:[#allocation2 + $0x60] sm:$0xff] %vm1747_vm0, %v1724_v15  ;;  %1752 = vst.msk [vmem:[#allocation2 + $0x20] sm:$0xff] %vm1747_vm0, %v1708_v41  ;;  %v3210_v15 = vld [vmem:[%s3546_s21 + $0x113] sm:$0xff] }
 0x2c0   : > { %1826 = vrot.lane.b32.xlu1 %v3112_v61, %s3484_s17  ;;  %1810 = vrot.lane.b32.xlu0 %v3104_v52, %s3484_s17  ;;  %v3202_v41 = vld [vmem:[%s3546_s21 + $0xb3] sm:$0xff] }
 0x2c2   : > { %v2013_v25 = vpop.permute.xlu1 %2012  ;;  %v1997_v24 = vpop.permute.xlu0 %1996 }
 0x2c3   : > { %2050 = vst.msk [vmem:[#allocation2 + $0x58] sm:$0xff] %vm2038_vm4, %v2013_v25  ;;  %2042 = vst.msk [vmem:[#allocation2 + $0x18] sm:$0xff] %vm2038_vm4, %v1997_v24  ;;  %v3225_v25 = vld [vmem:[%s3546_s21 + $0x10c] sm:$0xff] }
 0x2c4   : > { %1921 = vrot.lane.b32.xlu1 %v3127_v2, %s3485_s18  ;;  %1905 = vrot.lane.b32.xlu0 %v3119_v56, %s3485_s18  ;;  %v3217_v24 = vld [vmem:[%s3546_s21 + $0xac] sm:$0xff] }
 0x2c6   : > { %v2111_v44 = vpop.permute.xlu1 %2110  ;;  %v2095_v47 = vpop.permute.xlu0 %2094 }
 0x2c7   : > { %2149 = vst.msk [vmem:[#allocation2 + $0x50] sm:$0xff] %vm2138_vm5, %v2111_v44  ;;  %2141 = vst.msk [vmem:[#allocation2 + $0x10] sm:$0xff] %vm2138_vm5, %v2095_v47 }
 0x2c8   : > { %2213 = vrot.lane.b32.xlu1 %v3096_v63, %s3488_s22  ;;  %2197 = vrot.lane.b32.xlu0 %v3088_v1, %s3488_s22  ;;  %v3178_v1 = vld [vmem:[%s3546_s21 + $0x111] sm:$0xff] }
 0x2ca   : > { %v2400_v30 = vpop.permute.xlu1 %2399  ;;  %v2384_v40 = vpop.permute.xlu0 %2383 }
 0x2cb   : > { %2439 = vst.msk [vmem:[#allocation2 + $0x48] sm:$0xff] %vm2429_vm8, %v2400_v30  ;;  %2431 = vst.msk [vmem:[#allocation2 + $0x8] sm:$0xff] %vm2429_vm8, %v2384_v40  ;;  %v3226_v30 = vld [vmem:[%s3546_s21 + $0x114] sm:$0xff] }
 0x2cc   : > { %2308 = vrot.lane.b32.xlu1 %v3111_v45, %s3489_s23  ;;  %2292 = vrot.lane.b32.xlu0 %v3103_v59, %s3489_s23  ;;  %v3193_v59 = vld [vmem:[%s3546_s21 + $0x10a] sm:$0xff]  ;;  %v3218_v40 = vld [vmem:[%s3546_s21 + $0xb4] sm:$0xff]  ;;  %s2894_s21 = sshll.u32 %s3450_s9, 4 }
 0x2cd   : > { %p160_p6 = scmp.lt.s32.totalorder %s2894_s21, 31 }
 0x2ce   : > { %v2495_v6 = vpop.permute.xlu1 %2494  ;;  %v2479_v38 = vpop.permute.xlu0 %2478 }
 0x2cf   : > { %2535 = vst.msk [vmem:[#allocation2 + $0x40] sm:$0xff] %vm2526_vm9, %v2495_v6  ;;  %2527 = vst.msk [vmem:[#allocation2] sm:$0xff] %vm2526_vm9, %v2479_v38  ;;  %s5207_s21 = smov (!%p160_p6, %s2894_s21), 31 }
 0x2d0   : > { %1923 = vrot.lane.b32.xlu1 %v3128_v58, %s3485_s18  ;;  %1907 = vrot.lane.b32.xlu0 %v3120_v29, %s3485_s18  ;;  %s163_s16 = sadd.s32 %s2895_s8, %s5207_s21 }
 0x2d1   : > { %s2896_s17 = sshll.u32 %s163_s16, 3 }
 0x2d2   : > { %v1726_v22 = vpop.permute.xlu1 %1725  ;;  %v1710_v48 = vpop.permute.xlu0 %1709 }
 0x2d3   : > { %1761 = vst.msk [vmem:[#allocation2 + $0x68] sm:$0xff] %vm1747_vm0, %v1726_v22  ;;  %1753 = vst.msk [vmem:[#allocation2 + $0x28] sm:$0xff] %vm1747_vm0, %v1710_v48 }
 0x2d4   : > { %2018 = vrot.lane.b32.xlu1 %v3143_v31, %s3486_s19  ;;  %2002 = vrot.lane.b32.xlu0 %v3135_v32, %s3486_s19 }
 0x2d6   : > { %v1821_v3 = vpop.permute.xlu1 %1820  ;;  %v1805_v60 = vpop.permute.xlu0 %1804  ;;  %v2543_v8 = vld [vmem:[#allocation2] sm:$0xff] }
 0x2d7   : > { %v2551_v27 = vld [vmem:[#allocation2 + $0x40] sm:$0xff]  ;;  %1857 = vst.msk [vmem:[#allocation2 + $0x60] sm:$0xff] %vm1844_vm1, %v1821_v3  ;;  %1849 = vst.msk [vmem:[#allocation2 + $0x20] sm:$0xff] %vm1844_vm1, %v1805_v60  ;;  %3301 = vmatprep.mubr.msk.f32.mxu0 %vm2572_vm10, %v2543_v8 }
 0x2d8   : > { %3313 = vmatprep.mubr.msk.f32.mxu1 %vm2572_vm10, %v2551_v27  ;;  %2310 = vrot.lane.b32.xlu1 %v3112_v61, %s3489_s23 }
 0x2d9   : > { %2294 = vrot.lane.b32.xlu0 %v3104_v52, %s3489_s23 }
 0x2da   : > { %v2113_v28 = vpop.permute.xlu1 %2112  ;;  %v2097_v42 = vpop.permute.xlu0 %2096 }
 0x2db   : > { %2150 = vst.msk [vmem:[#allocation2 + $0x58] sm:$0xff] %vm2138_vm5, %v2113_v28  ;;  %2142 = vst.msk [vmem:[#allocation2 + $0x18] sm:$0xff] %vm2138_vm5, %v2097_v42 }
 0x2dc   : > { %2405 = vrot.lane.b32.xlu1 %v3127_v2, %s3490_s24 }
 0x2dd   : > { %2389 = vrot.lane.b32.xlu0 %v3119_v56, %s3490_s24 }
 0x2de   : > { %v2208_v35 = vpop.permute.xlu1 %2207  ;;  %v2192_v13 = vpop.permute.xlu0 %2191 }
 0x2df   : > { %2246 = vst.msk [vmem:[#allocation2 + $0x50] sm:$0xff] %vm2235_vm6, %v2208_v35  ;;  %2238 = vst.msk [vmem:[#allocation2 + $0x10] sm:$0xff] %vm2235_vm6, %v2192_v13 }
 0x2e0   : > { %2020 = vrot.lane.b32.xlu1 %v3144_v11, %s3486_s19 }
 0x2e1   : > { %2004 = vrot.lane.b32.xlu0 %v3136_v33, %s3486_s19 }
 0x2e2   : > { %v2497_v16 = vpop.permute.xlu1 %2496  ;;  %v2481_v55 = vpop.permute.xlu0 %2480 }
 0x2e3   : > { %2536 = vst.msk [vmem:[#allocation2 + $0x48] sm:$0xff] %vm2526_vm9, %v2497_v16  ;;  %2528 = vst.msk [vmem:[#allocation2 + $0x8] sm:$0xff] %vm2526_vm9, %v2481_v55 }
 0x2e4   : > { %2118 = vrot.lane.b32.xlu1 %v3161_v62, %s3487_s20 }
 0x2e5   : > { %2102 = vrot.lane.b32.xlu0 %v3153_v26, %s3487_s20 }
 0x2e6   : > { %v1823_v9 = vpop.permute.xlu1 %1822  ;;  %v1807_v14 = vpop.permute.xlu0 %1806 }
 0x2e7   : > { %1858 = vst.msk [vmem:[#allocation2 + $0x68] sm:$0xff] %vm1844_vm1, %v1823_v9  ;;  %1850 = vst.msk [vmem:[#allocation2 + $0x28] sm:$0xff] %vm1844_vm1, %v1807_v14 }
 0x2e8   : > { %2407 = vrot.lane.b32.xlu1 %v3128_v58, %s3490_s24 }
 0x2e9   : > { %2391 = vrot.lane.b32.xlu0 %v3120_v29, %s3490_s24 }
 0x2ea   : > { %v1918_v49 = vpop.permute.xlu1 %1917  ;;  %v1902_v23 = vpop.permute.xlu0 %1901  ;;  %v2544_v12 = vld [vmem:[#allocation2 + $0x8] sm:$0xff] }
 0x2eb   : > { %v2552_v36 = vld [vmem:[#allocation2 + $0x48] sm:$0xff]  ;;  %1954 = vst.msk [vmem:[#allocation2 + $0x60] sm:$0xff] %vm1941_vm3, %v1918_v49  ;;  %1946 = vst.msk [vmem:[#allocation2 + $0x20] sm:$0xff] %vm1941_vm3, %v1902_v23  ;;  %3302 = vmatmul.mubr.msk.f32.vlgmr.msra.gmra.mrb[0].mxu0 %vm2572_vm10, %v2544_v12 }
 0x2ec   : > { %3314 = vmatmul.mubr.msk.f32.vlgmr.msra.gmra.mrb[0].mxu1 %vm2572_vm10, %v2552_v36  ;;  %2502 = vrot.lane.b32.xlu1 %v3143_v31, %s3491_s30 }
 0x2ed   : > { %2486 = vrot.lane.b32.xlu0 %v3135_v32, %s3491_s30 }
 0x2ee   : > { %v2210_v4 = vpop.permute.xlu1 %2209  ;;  %v2194_v51 = vpop.permute.xlu0 %2193 }
 0x2ef   : > { %2247 = vst.msk [vmem:[#allocation2 + $0x58] sm:$0xff] %vm2235_vm6, %v2210_v4  ;;  %2239 = vst.msk [vmem:[#allocation2 + $0x18] sm:$0xff] %vm2235_vm6, %v2194_v51 }
 0x2f0   : > { %2120 = vrot.lane.b32.xlu1 %v3162_v21, %s3487_s20 }
 0x2f1   : > { %2104 = vrot.lane.b32.xlu0 %v3154_v20, %s3487_s20  ;;  %s5128_s20 = scalar_lea.vmem %s5163_s2, %s2896_s17 }
 0x2f2   : > { %v2305_v39 = vpop.permute.xlu1 %2304  ;;  %v2289_v43 = vpop.permute.xlu0 %2288 }
 0x2f3   : > { %2343 = vst.msk [vmem:[#allocation2 + $0x50] sm:$0xff] %vm2332_vm7, %v2305_v39  ;;  %2335 = vst.msk [vmem:[#allocation2 + $0x10] sm:$0xff] %vm2332_vm7, %v2289_v43 }
 0x2f4   : > { %2215 = vrot.lane.b32.xlu1 %v3177_v37, %s3488_s22 }
 0x2f5   : > { %2199 = vrot.lane.b32.xlu0 %v3169_v10, %s3488_s22 }
 0x2f6   : > { %v1904_v7 = vpop.permute.xlu1 %1903  ;;  %v1631_v63 = vpop.permute.xlu0 %1630 }
 0x2f7   : > { %1947 = vst.msk [vmem:[#allocation2 + $0x28] sm:$0xff] %vm1941_vm3, %v1904_v7 }
 0x2f8   : > { %1665 = vst.msk [vmem:[#allocation2 + $0x70] sm:$0xff] %vm1650_vm15, %v1631_v63  ;;  %2504 = vrot.lane.b32.xlu1 %v3144_v11, %s3491_s30 }
 0x2f9   : > { %2488 = vrot.lane.b32.xlu0 %v3136_v33, %s3491_s30 }
 0x2fa   : > { %v1999_v5 = vpop.permute.xlu1 %1998  ;;  %v1920_v45 = vpop.permute.xlu0 %1919 }
 0x2fb   : > { %2043 = vst.msk [vmem:[#allocation2 + $0x20] sm:$0xff] %vm2038_vm4, %v1999_v5 }
 0x2fc   : > { %1955 = vst.msk [vmem:[#allocation2 + $0x68] sm:$0xff] %vm1941_vm3, %v1920_v45  ;;  %2217 = vrot.lane.b32.xlu1 %v3178_v1, %s3488_s22 }
 0x2fd   : > { %2201 = vrot.lane.b32.xlu0 %v3170_v17, %s3488_s22 }
 0x2fe   : > { %v2291_v50 = vpop.permute.xlu1 %2290  ;;  %v2015_v54 = vpop.permute.xlu0 %2014 }
 0x2ff   : > { %2336 = vst.msk [vmem:[#allocation2 + $0x18] sm:$0xff] %vm2332_vm7, %v2291_v50 }
 0x300   : > { %2051 = vst.msk [vmem:[#allocation2 + $0x60] sm:$0xff] %vm2038_vm4, %v2015_v54  ;;  %2312 = vrot.lane.b32.xlu1 %v3193_v59, %s3489_s23 }
 0x301   : > { %2296 = vrot.lane.b32.xlu0 %v3185_v46, %s3489_s23 }
 0x302   : > { %v2386_v57 = vpop.permute.xlu1 %2385  ;;  %v2307_v53 = vpop.permute.xlu0 %2306 }
 0x303   : > { %2432 = vst.msk [vmem:[#allocation2 + $0x10] sm:$0xff] %vm2429_vm8, %v2386_v57 }
 0x304   : > { %2344 = vst.msk [vmem:[#allocation2 + $0x58] sm:$0xff] %vm2332_vm7, %v2307_v53  ;;  %2314 = vrot.lane.b32.xlu1 %v3194_v0, %s3489_s23 }
 0x305   : > { %2298 = vrot.lane.b32.xlu0 %v3186_v19, %s3489_s23 }
 0x306   : > { %v1633_v61 = vpop.permute.xlu1 %1632  ;;  %v2402_v52 = vpop.permute.xlu0 %2401 }
 0x307   : > { %1666 = vst.msk [vmem:[#allocation2 + $0x78] sm:$0xff] %vm1650_vm15, %v1633_v61 }
 0x308   : > { %2440 = vst.msk [vmem:[#allocation2 + $0x50] sm:$0xff] %vm2429_vm8, %v2402_v52  ;;  %2409 = vrot.lane.b32.xlu1 %v3209_v18, %s3490_s24 }
 0x309   : > { %2393 = vrot.lane.b32.xlu0 %v3201_v34, %s3490_s24 }
 0x30a   : > { %v1728_v2 = vpop.permute.xlu1 %1727  ;;  %v1712_v56 = vpop.permute.xlu0 %1711 }
 0x30b   : > { %1762 = vst.msk [vmem:[#allocation2 + $0x70] sm:$0xff] %vm1747_vm0, %v1728_v2  ;;  %1754 = vst.msk [vmem:[#allocation2 + $0x30] sm:$0xff] %vm1747_vm0, %v1712_v56 }
 0x30c   : > { %2411 = vrot.lane.b32.xlu1 %v3210_v15, %s3490_s24 }
 0x30d   : > { %2395 = vrot.lane.b32.xlu0 %v3202_v41, %s3490_s24 }
 0x30e   : > { %v2017_v44 = vpop.permute.xlu1 %2016  ;;  %v2001_v47 = vpop.permute.xlu0 %2000 }
 0x30f   : > { %2052 = vst.msk [vmem:[#allocation2 + $0x68] sm:$0xff] %vm2038_vm4, %v2017_v44  ;;  %2044 = vst.msk [vmem:[#allocation2 + $0x28] sm:$0xff] %vm2038_vm4, %v2001_v47 }
 0x310   : > { %2506 = vrot.lane.b32.xlu1 %v3225_v25, %s3491_s30 }
 0x311   : > { %2490 = vrot.lane.b32.xlu0 %v3217_v24, %s3491_s30 }
 0x312   : > { %v2115_v58 = vpop.permute.xlu1 %2114  ;;  %v2099_v29 = vpop.permute.xlu0 %2098 }
 0x313   : > { %2151 = vst.msk [vmem:[#allocation2 + $0x60] sm:$0xff] %vm2138_vm5, %v2115_v58  ;;  %2143 = vst.msk [vmem:[#allocation2 + $0x20] sm:$0xff] %vm2138_vm5, %v2099_v29 }
 0x314   : > { %2508 = vrot.lane.b32.xlu1 %v3226_v30, %s3491_s30 }
 0x315   : > { %2492 = vrot.lane.b32.xlu0 %v3218_v40, %s3491_s30 }
 0x316   : > { %v2404_v6 = vpop.permute.xlu1 %2403  ;;  %v2388_v38 = vpop.permute.xlu0 %2387 }
 0x317   : > { %2441 = vst.msk [vmem:[#allocation2 + $0x58] sm:$0xff] %vm2429_vm8, %v2404_v6  ;;  %2433 = vst.msk [vmem:[#allocation2 + $0x18] sm:$0xff] %vm2429_vm8, %v2388_v38 }
 0x31a   : > { %v2499_v31 = vpop.permute.xlu1 %2498  ;;  %v2483_v32 = vpop.permute.xlu0 %2482 }
 0x31b   : > { %2537 = vst.msk [vmem:[#allocation2 + $0x50] sm:$0xff] %vm2526_vm9, %v2499_v31  ;;  %2529 = vst.msk [vmem:[#allocation2 + $0x10] sm:$0xff] %vm2526_vm9, %v2483_v32 }
 0x31e   : > { %v1730_v22 = vpop.permute.xlu1 %1729  ;;  %v1714_v48 = vpop.permute.xlu0 %1713 }
 0x31f   : > { %1763 = vst.msk [vmem:[#allocation2 + $0x78] sm:$0xff] %vm1747_vm0, %v1730_v22  ;;  %1755 = vst.msk [vmem:[#allocation2 + $0x38] sm:$0xff] %vm1747_vm0, %v1714_v48 }
 0x322   : > { %v1825_v3 = vpop.permute.xlu1 %1824  ;;  %v1809_v60 = vpop.permute.xlu0 %1808  ;;  %v2545_v8 = vld [vmem:[#allocation2 + $0x10] sm:$0xff] }
 0x323   : > { %v2553_v27 = vld [vmem:[#allocation2 + $0x50] sm:$0xff]  ;;  %1859 = vst.msk [vmem:[#allocation2 + $0x70] sm:$0xff] %vm1844_vm1, %v1825_v3  ;;  %1851 = vst.msk [vmem:[#allocation2 + $0x30] sm:$0xff] %vm1844_vm1, %v1809_v60  ;;  %3304 = vmatprep.mubr.msk.f32.mxu0 %vm2572_vm10, %v2545_v8 }
 0x324   : > { %3316 = vmatprep.mubr.msk.f32.mxu1 %vm2572_vm10, %v2553_v27 }
 0x326   : > { %v2117_v28 = vpop.permute.xlu1 %2116  ;;  %v2101_v42 = vpop.permute.xlu0 %2100 }
 0x327   : > { %2152 = vst.msk [vmem:[#allocation2 + $0x68] sm:$0xff] %vm2138_vm5, %v2117_v28  ;;  %2144 = vst.msk [vmem:[#allocation2 + $0x28] sm:$0xff] %vm2138_vm5, %v2101_v42 }
 0x32a   : > { %v2212_v11 = vpop.permute.xlu1 %2211  ;;  %v2196_v33 = vpop.permute.xlu0 %2195 }
 0x32b   : > { %2248 = vst.msk [vmem:[#allocation2 + $0x60] sm:$0xff] %vm2235_vm6, %v2212_v11  ;;  %2240 = vst.msk [vmem:[#allocation2 + $0x20] sm:$0xff] %vm2235_vm6, %v2196_v33 }
 0x32e   : > { %v2501_v35 = vpop.permute.xlu1 %2500  ;;  %v2485_v13 = vpop.permute.xlu0 %2484 }
 0x32f   : > { %2538 = vst.msk [vmem:[#allocation2 + $0x58] sm:$0xff] %vm2526_vm9, %v2501_v35  ;;  %2530 = vst.msk [vmem:[#allocation2 + $0x18] sm:$0xff] %vm2526_vm9, %v2485_v13 }
 0x332   : > { %v1827_v62 = vpop.permute.xlu1 %1826  ;;  %v1811_v26 = vpop.permute.xlu0 %1810 }
 0x333   : > { %1860 = vst.msk [vmem:[#allocation2 + $0x78] sm:$0xff] %vm1844_vm1, %v1827_v62  ;;  %1852 = vst.msk [vmem:[#allocation2 + $0x38] sm:$0xff] %vm1844_vm1, %v1811_v26 }
 0x336   : > { %v1922_v16 = vpop.permute.xlu1 %1921  ;;  %v1906_v55 = vpop.permute.xlu0 %1905  ;;  %v2546_v9 = vld [vmem:[#allocation2 + $0x18] sm:$0xff] }
 0x337   : > { %v2554_v14 = vld [vmem:[#allocation2 + $0x58] sm:$0xff]  ;;  %1956 = vst.msk [vmem:[#allocation2 + $0x70] sm:$0xff] %vm1941_vm3, %v1922_v16  ;;  %1948 = vst.msk [vmem:[#allocation2 + $0x30] sm:$0xff] %vm1941_vm3, %v1906_v55  ;;  %3305 = vmatmul.mubr.msk.f32.gmra.mrb[2].mxu0 %vm2572_vm10, %v2546_v9 }
 0x338   : > { %3317 = vmatmul.mubr.msk.f32.gmra.mrb[2].mxu1 %vm2572_vm10, %v2554_v14 }
 0x33a   : > { %v2214_v49 = vpop.permute.xlu1 %2213  ;;  %v2198_v23 = vpop.permute.xlu0 %2197 }
 0x33b   : > { %2249 = vst.msk [vmem:[#allocation2 + $0x68] sm:$0xff] %vm2235_vm6, %v2214_v49  ;;  %2241 = vst.msk [vmem:[#allocation2 + $0x28] sm:$0xff] %vm2235_vm6, %v2198_v23 }
 0x33e   : > { %v2309_v12 = vpop.permute.xlu1 %2308  ;;  %v2293_v36 = vpop.permute.xlu0 %2292 }
 0x33f   : > { %2345 = vst.msk [vmem:[#allocation2 + $0x60] sm:$0xff] %vm2332_vm7, %v2309_v12  ;;  %2337 = vst.msk [vmem:[#allocation2 + $0x20] sm:$0xff] %vm2332_vm7, %v2293_v36 }
 0x342   : > { %v1924_v21 = vpop.permute.xlu1 %1923  ;;  %v1908_v20 = vpop.permute.xlu0 %1907 }
 0x343   : > { %1957 = vst.msk [vmem:[#allocation2 + $0x78] sm:$0xff] %vm1941_vm3, %v1924_v21  ;;  %1949 = vst.msk [vmem:[#allocation2 + $0x38] sm:$0xff] %vm1941_vm3, %v1908_v20 }
 0x346   : > { %v2019_v4 = vpop.permute.xlu1 %2018  ;;  %v2003_v51 = vpop.permute.xlu0 %2002 }
 0x347   : > { %2053 = vst.msk [vmem:[#allocation2 + $0x70] sm:$0xff] %vm2038_vm4, %v2019_v4  ;;  %2045 = vst.msk [vmem:[#allocation2 + $0x30] sm:$0xff] %vm2038_vm4, %v2003_v51 }
 0x34a   : > { %v2311_v37 = vpop.permute.xlu1 %2310 }
 0x34b   : > { %v2295_v10 = vpop.permute.xlu0 %2294  ;;  %2346 = vst.msk [vmem:[#allocation2 + $0x68] sm:$0xff] %vm2332_vm7, %v2311_v37 }
 0x34c   : > { %2338 = vst.msk [vmem:[#allocation2 + $0x28] sm:$0xff] %vm2332_vm7, %v2295_v10 }
 0x34e   : > { %v2406_v39 = vpop.permute.xlu1 %2405 }
 0x34f   : > { %v2390_v43 = vpop.permute.xlu0 %2389  ;;  %2442 = vst.msk [vmem:[#allocation2 + $0x60] sm:$0xff] %vm2429_vm8, %v2406_v39 }
 0x350   : > { %2434 = vst.msk [vmem:[#allocation2 + $0x20] sm:$0xff] %vm2429_vm8, %v2390_v43 }
 0x352   : > { %v2021_v7 = vpop.permute.xlu1 %2020 }
 0x353   : > { %v2005_v63 = vpop.permute.xlu0 %2004  ;;  %2054 = vst.msk [vmem:[#allocation2 + $0x78] sm:$0xff] %vm2038_vm4, %v2021_v7 }
 0x354   : > { %2046 = vst.msk [vmem:[#allocation2 + $0x38] sm:$0xff] %vm2038_vm4, %v2005_v63 }
 0x356   : > { %v2119_v1 = vpop.permute.xlu1 %2118 }
 0x357   : > { %v2103_v17 = vpop.permute.xlu0 %2102  ;;  %2153 = vst.msk [vmem:[#allocation2 + $0x70] sm:$0xff] %vm2138_vm5, %v2119_v1 }
 0x358   : > { %2145 = vst.msk [vmem:[#allocation2 + $0x30] sm:$0xff] %vm2138_vm5, %v2103_v17 }
 0x35a   : > { %v2408_v5 = vpop.permute.xlu1 %2407 }
 0x35b   : > { %v2392_v45 = vpop.permute.xlu0 %2391  ;;  %2443 = vst.msk [vmem:[#allocation2 + $0x68] sm:$0xff] %vm2429_vm8, %v2408_v5 }
 0x35c   : > { %2435 = vst.msk [vmem:[#allocation2 + $0x28] sm:$0xff] %vm2429_vm8, %v2392_v45 }
 0x35e   : > { %v2503_v59 = vpop.permute.xlu1 %2502 }
 0x35f   : > { %v2487_v46 = vpop.permute.xlu0 %2486  ;;  %2539 = vst.msk [vmem:[#allocation2 + $0x60] sm:$0xff] %vm2526_vm9, %v2503_v59 }
 0x360   : > { %2531 = vst.msk [vmem:[#allocation2 + $0x20] sm:$0xff] %vm2526_vm9, %v2487_v46 }
 0x362   : > { %v2121_v50 = vpop.permute.xlu1 %2120 }
 0x363   : > { %v2105_v54 = vpop.permute.xlu0 %2104  ;;  %2154 = vst.msk [vmem:[#allocation2 + $0x78] sm:$0xff] %vm2138_vm5, %v2121_v50 }
 0x364   : > { %2146 = vst.msk [vmem:[#allocation2 + $0x38] sm:$0xff] %vm2138_vm5, %v2105_v54 }
 0x366   : > { %v2216_v0 = vpop.permute.xlu1 %2215  ;;  %v2555_v53 = vld [vmem:[#allocation2 + $0x60] sm:$0xff] }
 0x367   : > { %v2200_v19 = vpop.permute.xlu0 %2199  ;;  %v2547_v57 = vld [vmem:[#allocation2 + $0x20] sm:$0xff]  ;;  %2250 = vst.msk [vmem:[#allocation2 + $0x70] sm:$0xff] %vm2235_vm6, %v2216_v0  ;;  %3319 = vmatprep.mubr.msk.f32.mxu1 %vm2572_vm10, %v2555_v53 }
 0x368   : > { %2242 = vst.msk [vmem:[#allocation2 + $0x30] sm:$0xff] %vm2235_vm6, %v2200_v19  ;;  %3307 = vmatprep.mubr.msk.f32.mxu0 %vm2572_vm10, %v2547_v57 }
 0x36a   : > { %v2505_v18 = vpop.permute.xlu1 %2504 }
 0x36b   : > { %v2489_v34 = vpop.permute.xlu0 %2488  ;;  %2540 = vst.msk [vmem:[#allocation2 + $0x68] sm:$0xff] %vm2526_vm9, %v2505_v18 }
 0x36c   : > { %2532 = vst.msk [vmem:[#allocation2 + $0x28] sm:$0xff] %vm2526_vm9, %v2489_v34 }
 0x36e   : > { %v2218_v61 = vpop.permute.xlu1 %2217 }
 0x36f   : > { %v2202_v52 = vpop.permute.xlu0 %2201  ;;  %2251 = vst.msk [vmem:[#allocation2 + $0x78] sm:$0xff] %vm2235_vm6, %v2218_v61 }
 0x370   : > { %2243 = vst.msk [vmem:[#allocation2 + $0x38] sm:$0xff] %vm2235_vm6, %v2202_v52 }
 0x372   : > { %v2313_v15 = vpop.permute.xlu1 %2312  ;;  %v2556_v56 = vld [vmem:[#allocation2 + $0x68] sm:$0xff] }
 0x373   : > { %v2297_v41 = vpop.permute.xlu0 %2296  ;;  %v2548_v2 = vld [vmem:[#allocation2 + $0x28] sm:$0xff]  ;;  %2347 = vst.msk [vmem:[#allocation2 + $0x70] sm:$0xff] %vm2332_vm7, %v2313_v15  ;;  %3320 = vmatmul.mubr.msk.f32.gmra.mrb[4].mxu1 %vm2572_vm10, %v2556_v56 }
 0x374   : > { %2339 = vst.msk [vmem:[#allocation2 + $0x30] sm:$0xff] %vm2332_vm7, %v2297_v41  ;;  %3308 = vmatmul.mubr.msk.f32.gmra.mrb[4].mxu0 %vm2572_vm10, %v2548_v2 }
 0x376   : > { %v2315_v25 = vpop.permute.xlu1 %2314 }
 0x377   : > { %v2299_v24 = vpop.permute.xlu0 %2298  ;;  %2348 = vst.msk [vmem:[#allocation2 + $0x78] sm:$0xff] %vm2332_vm7, %v2315_v25 }
 0x378   : > { %2340 = vst.msk [vmem:[#allocation2 + $0x38] sm:$0xff] %vm2332_vm7, %v2299_v24 }
 0x37a   : > { %v2410_v44 = vpop.permute.xlu1 %2409 }
 0x37b   : > { %v2394_v47 = vpop.permute.xlu0 %2393  ;;  %2444 = vst.msk [vmem:[#allocation2 + $0x70] sm:$0xff] %vm2429_vm8, %v2410_v44 }
 0x37c   : > { %2436 = vst.msk [vmem:[#allocation2 + $0x30] sm:$0xff] %vm2429_vm8, %v2394_v47 }
 0x37e   : > { %v2412_v30 = vpop.permute.xlu1 %2411 }
 0x37f   : > { %v2396_v40 = vpop.permute.xlu0 %2395  ;;  %2445 = vst.msk [vmem:[#allocation2 + $0x78] sm:$0xff] %vm2429_vm8, %v2412_v30 }
 0x380   : > { %2437 = vst.msk [vmem:[#allocation2 + $0x38] sm:$0xff] %vm2429_vm8, %v2396_v40 }
 0x382   : > { %v2507_v58 = vpop.permute.xlu1 %2506 }
 0x383   : > { %v2491_v29 = vpop.permute.xlu0 %2490  ;;  %2541 = vst.msk [vmem:[#allocation2 + $0x70] sm:$0xff] %vm2526_vm9, %v2507_v58 }
 0x384   : > { %2533 = vst.msk [vmem:[#allocation2 + $0x30] sm:$0xff] %vm2526_vm9, %v2491_v29 }
 0x386   : > { %v2509_v6 = vpop.permute.xlu1 %2508 }
 0x387   : > { %v2493_v38 = vpop.permute.xlu0 %2492  ;;  %2542 = vst.msk [vmem:[#allocation2 + $0x78] sm:$0xff] %vm2526_vm9, %v2509_v6 }
 0x388   : > { %2534 = vst.msk [vmem:[#allocation2 + $0x38] sm:$0xff] %vm2526_vm9, %v2493_v38 }
 0x38a   : > { %v2557_v32 = vld [vmem:[#allocation2 + $0x70] sm:$0xff] }
 0x38b   : > { %v2549_v31 = vld [vmem:[#allocation2 + $0x30] sm:$0xff]  ;;  %3322 = vmatprep.mubr.msk.f32.mxu1 %vm2572_vm10, %v2557_v32 }
 0x38c   : > { %3310 = vmatprep.mubr.msk.f32.mxu0 %vm2572_vm10, %v2549_v31 }
 0x38e   : > { %v2558_v48 = vld [vmem:[#allocation2 + $0x78] sm:$0xff] }
 0x38f   : > { %v2550_v22 = vld [vmem:[#allocation2 + $0x38] sm:$0xff]  ;;  %3323 = vmatmul.mubr.msk.f32.gmra.mrb[6].mxu1 %vm2572_vm10, %v2558_v48 }
 0x390   : > { %3311 = vmatmul.mubr.msk.f32.gmra.mrb[6].mxu0 %vm2572_vm10, %v2550_v22 }
 0x3be   : > { %v3303_v3 = vpop.f32.mrb[0].mxu0 }
 0x3bf   : > { %v3315_v60 = vpop.f32.mrb[0].mxu1  ;;  %2771 = vst [vmem:[%s5128_s20 + $0x8] sm:$0xff] %v3303_v3  ;;  %v2691_v8 = vpop.f32.mrb[1].mxu0 }
 0x3c0   : > { %2779 = vst [vmem:[%s5128_s20 + $0x48] sm:$0xff] %v3315_v60  ;;  %v2731_v27 = vpop.f32.mrb[1].mxu1  ;;  %2770 = vst [vmem:[%s5128_s20] sm:$0xff] %v2691_v8 }
 0x3c1   : > { %2778 = vst [vmem:[%s5128_s20 + $0x40] sm:$0xff] %v2731_v27 }
 0x40a   : > { %v3306_v28 = vpop.f32.mrb[2].mxu0 }
 0x40b   : > { %v3318_v42 = vpop.f32.mrb[2].mxu1  ;;  %2773 = vst [vmem:[%s5128_s20 + $0x18] sm:$0xff] %v3306_v28  ;;  %v2701_v11 = vpop.f32.mrb[3].mxu0 }
 0x40c   : > { %2781 = vst [vmem:[%s5128_s20 + $0x58] sm:$0xff] %v3318_v42  ;;  %v2741_v33 = vpop.f32.mrb[3].mxu1  ;;  %2772 = vst [vmem:[%s5128_s20 + $0x10] sm:$0xff] %v2701_v11 }
 0x40d   : > { %2780 = vst [vmem:[%s5128_s20 + $0x50] sm:$0xff] %v2741_v33 }
 0x446   : > { %v3321_v13 = vpop.f32.mrb[4].mxu1 }
 0x447   : > { %v3309_v35 = vpop.f32.mrb[4].mxu0  ;;  %2783 = vst [vmem:[%s5128_s20 + $0x68] sm:$0xff] %v3321_v13  ;;  %v2751_v26 = vpop.f32.mrb[5].mxu1 }
 0x448   : > { %2775 = vst [vmem:[%s5128_s20 + $0x28] sm:$0xff] %v3309_v35  ;;  %v2711_v62 = vpop.f32.mrb[5].mxu0  ;;  %2782 = vst [vmem:[%s5128_s20 + $0x60] sm:$0xff] %v2751_v26 }
 0x449   : > { %2774 = vst [vmem:[%s5128_s20 + $0x20] sm:$0xff] %v2711_v62 }
 0x462   : > { %v3324_v55 = vpop.f32.mrb[6].mxu1 }
 0x463   : > { %v3312_v16 = vpop.f32.mrb[6].mxu0  ;;  %2785 = vst [vmem:[%s5128_s20 + $0x78] sm:$0xff] %v3324_v55  ;;  %v2761_v14 = vpop.f32.mrb[7].mxu1 }
 0x464   : > { %2777 = vst [vmem:[%s5128_s20 + $0x38] sm:$0xff] %v3312_v16  ;;  %v2721_v9 = vpop.f32.mrb[7].mxu0  ;;  %2784 = vst [vmem:[%s5128_s20 + $0x70] sm:$0xff] %v2761_v14 }
 0x465   : > { %2776 = vst [vmem:[%s5128_s20 + $0x30] sm:$0xff] %v2721_v9 }
 0x466 PF: > { %s12_s13 = sadd.s32 1, %s3466_s13   ;;  %s5194_s9 = smov %s3458_s11 }
 0x467   : > { %p9_p7 = scmp.ge.s32.totalorder %s12_s13, 6   ;;  %s5195_s10 = smov %s3462_s12 }
 0x468   : > { %s5196_s11 = smov %s5199_s14  ;;  %s5197_s12 = smov %s5203_s15 }
 0x469   :  { %11 = sbr.rel (!%p9_p7) target bundleno = 3 (0x3), region = 63 }

</bundles_post_ra>
